<compile_context>
chip_gen: v6e
topology: v6e:2x2x1
jax: 0.10.0
libtpu: 0.0.40
codegen_flags: <defaults>
</compile_context>

<pallas_src>
import jax
import jax.numpy as jnp
from jax import lax
from jax.experimental import pallas as pl
from jax.experimental.pallas import tpu as pltpu

N_EMBD = 128
N_HEAD = 4
HEAD_DIM = N_EMBD // N_HEAD
T = 128          # sequence length (== block_size)
B = 2            # batch


def _attn_kernel(x_ref, w_attn_ref, b_attn_ref, w_proj_ref, b_proj_ref, o_ref):
    """One grid step = `bb` batch elements (bb = B on v5e/v6e, 1 on v7x).

    x_ref:      (bb, T, C)
    w_attn_ref: (C, 3C)   b_attn_ref: (1, 3C)
    w_proj_ref: (C, C)    b_proj_ref: (1, C)
    o_ref:      (bb, T, C)
    """
    bb, Tt, C = x_ref.shape
    hd = C // N_HEAD
    bf16 = jnp.bfloat16

    # ---- fused qkv projection, batched over the whole block: (bb*T, C) @ (C, 3C) ----
    x2d = x_ref[...].reshape(bb * Tt, C)
    w_attn_bf = w_attn_ref[...].astype(bf16)
    qkv = jnp.dot(x2d.astype(bf16), w_attn_bf, preferred_element_type=jnp.float32)
    qkv = qkv + b_attn_ref[0][None, :]                        # (bb*T, 3C), f32

    scale = 1.0 / (hd ** 0.5)
    q = qkv[:, 0 * C:1 * C] * scale                           # fold 1/sqrt(hd) into q once
    k = qkv[:, 1 * C:2 * C]
    v = qkv[:, 2 * C:3 * C]

    # additive causal mask, built once per grid step
    row = lax.broadcasted_iota(jnp.int32, (Tt, Tt), 0)
    col = lax.broadcasted_iota(jnp.int32, (Tt, Tt), 1)
    neg_mask = jnp.where(col <= row, 0.0, -1e30).astype(jnp.float32)

    w_proj_bf = w_proj_ref[...].astype(bf16)
    b_proj = b_proj_ref[0][None, :]                           # (1, C)

    dn = (((1,), (1,)), ((), ()))                             # contract last dims: q . k^T

    for b in range(bb):                                       # static unroll over batch
        base = b * Tt
        acc = jnp.zeros((Tt, C), jnp.float32)
        for h in range(N_HEAD):                               # static unroll over heads
            lo = h * hd
            qh = q[base:base + Tt, lo:lo + hd].astype(bf16)   # (T, hd)
            kh = k[base:base + Tt, lo:lo + hd].astype(bf16)
            vh = v[base:base + Tt, lo:lo + hd].astype(bf16)

            s = lax.dot_general(qh, kh, dimension_numbers=dn,
                                preferred_element_type=jnp.float32)    # (T, T) f32
            s = s + neg_mask
            s = s - jnp.max(s, axis=-1, keepdims=True)        # stable softmax (f32)
            p = jnp.exp(s)
            p = p * pl.reciprocal(jnp.sum(p, axis=-1, keepdims=True), approx=True)

            yh = jnp.dot(p.astype(bf16), vh,
                         preferred_element_type=jnp.float32)           # (T, hd)
            # accumulate this head straight into the output projection (no concat)
            acc = acc + jnp.dot(yh.astype(bf16), w_proj_bf[lo:lo + hd, :],
                                preferred_element_type=jnp.float32)

        o_ref[b] = (acc + b_proj).astype(o_ref.dtype)


def _two_tensorcores_per_chip():
    """True on chips with 2 TensorCores (v7x); conservative False otherwise."""
    try:
        kind = jax.devices()[0].device_kind.lower()
    except Exception:
        return False
    return "v7" in kind


def causal_self_attention(x, w_attn, b_attn, w_proj, b_proj):
    """x: (B, T, C) float32 -> (B, T, C) float32."""
    Bx, Tx, Cx = x.shape
    assert Cx == N_EMBD

    # v5e/v6e (1 TC): fuse the whole batch into one grid step (grid=(1,)).
    # v7x (2 TCs): one batch element per grid step, sharded across cores.
    bb = 1 if (_two_tensorcores_per_chip() and Bx > 1) else Bx
    grid = (Bx // bb,)

    return pl.pallas_call(
        _attn_kernel,
        out_shape=jax.ShapeDtypeStruct((Bx, Tx, Cx), jnp.float32),
        grid_spec=pltpu.PrefetchScalarGridSpec(
            num_scalar_prefetch=0,
            grid=grid,
            in_specs=[
                pl.BlockSpec((bb, Tx, Cx), lambda i: (i, 0, 0)),
                pl.BlockSpec((Cx, 3 * Cx), lambda i: (0, 0)),
                pl.BlockSpec((1, 3 * Cx), lambda i: (0, 0)),
                pl.BlockSpec((Cx, Cx), lambda i: (0, 0)),
                pl.BlockSpec((1, Cx), lambda i: (0, 0)),
            ],
            out_specs=pl.BlockSpec((bb, Tx, Cx), lambda i: (i, 0, 0)),
        ),
        compiler_params=pltpu.CompilerParams(
            dimension_semantics=("parallel",)),
    )(x, w_attn, b_attn, w_proj, b_proj)


def reference(x, w_attn, b_attn, w_proj, b_proj):
    """Pure-JAX f32 reference mirroring the PyTorch forward."""
    Bx, Tx, Cx = x.shape
    qkv = x @ w_attn + b_attn[0]
    q, k, v = jnp.split(qkv, 3, axis=2)

    def heads(t):  # (B, T, C) -> (B, nh, T, hd)
        return t.reshape(Bx, Tx, N_HEAD, HEAD_DIM).transpose(0, 2, 1, 3)

    q, k, v = heads(q), heads(k), heads(v)
    att = (q @ k.transpose(0, 1, 3, 2)) * (1.0 / HEAD_DIM ** 0.5)
    mask = jnp.tril(jnp.ones((Tx, Tx), dtype=bool))
    att = jnp.where(mask[None, None], att, -jnp.inf)
    att = jax.nn.softmax(att, axis=-1)
    y = (att @ v).transpose(0, 2, 1, 3).reshape(Bx, Tx, Cx)
    return y @ w_proj + b_proj[0]


if __name__ == "__main__":
    key = jax.random.PRNGKey(0)
    kx, k1, k2, k3, k4 = jax.random.split(key, 5)

    x = jax.random.normal(kx, (B, T, N_EMBD), dtype=jnp.float32)

    # deterministic synthetic parameters (Linear-ish scale 1/sqrt(fan_in))
    s = 1.0 / (N_EMBD ** 0.5)
    w_attn = jax.random.uniform(k1, (N_EMBD, 3 * N_EMBD), jnp.float32, -s, s)
    b_attn = jax.random.uniform(k2, (1, 3 * N_EMBD), jnp.float32, -s, s)
    w_proj = jax.random.uniform(k3, (N_EMBD, N_EMBD), jnp.float32, -s, s)
    b_proj = jax.random.uniform(k4, (1, N_EMBD), jnp.float32, -s, s)

    out = causal_self_attention(x, w_attn, b_attn, w_proj, b_proj)
    out = jax.block_until_ready(out)

    ref = reference(x, w_attn, b_attn, w_proj, b_proj)
    assert out.shape == (B, T, N_EMBD)
    # bf16 MXU operands (f32 accumulation) + approx reciprocal => relaxed tolerance
    # vs the pure-f32 reference.
    assert jnp.allclose(out, ref, atol=2e-2, rtol=2e-2), "mismatch vs reference"

    print("KERNEL_OK")
</pallas_src>

<mosaic_0001>
module attributes {stable_mosaic.version = 11 : i64} {
  func.func @_attn_kernel(%arg0: i32, %arg1: memref<2x128x128xf32, #tpu.memory_space<vmem>>, %arg2: memref<128x384xf32, #tpu.memory_space<vmem>>, %arg3: memref<1x384xf32, #tpu.memory_space<vmem>>, %arg4: memref<128x128xf32, #tpu.memory_space<vmem>>, %arg5: memref<1x128xf32, #tpu.memory_space<vmem>>, %arg6: memref<2x128x128xf32, #tpu.memory_space<vmem>>) attributes {dimension_semantics = [#tpu.dimension_semantics<parallel>], iteration_bounds = array<i64: 1>, scalar_prefetch = 0 : i64, scratch_operands = 0 : i64, tpu.core_type = #tpu.core_type<tc>, window_params = [{transform_indices = @transform_0, window_bounds = array<i64: 2, 128, 128>}, {pipeline_mode = #tpu.pipeline_mode<synchronous>, transform_indices = @transform_1, window_bounds = array<i64: 128, 384>}, {pipeline_mode = #tpu.pipeline_mode<synchronous>, transform_indices = @transform_2, window_bounds = array<i64: 1, 384>}, {pipeline_mode = #tpu.pipeline_mode<synchronous>, transform_indices = @transform_3, window_bounds = array<i64: 128, 128>}, {pipeline_mode = #tpu.pipeline_mode<synchronous>, transform_indices = @transform_4, window_bounds = array<i64: 1, 128>}, {transform_indices = @transform_5, window_bounds = array<i64: 2, 128, 128>}]} {
    %c0 = arith.constant 0 : index
    %c0_0 = arith.constant 0 : index
    %c0_1 = arith.constant 0 : index
    %0 = vector.load %arg1[%c0, %c0_0, %c0_1] : memref<2x128x128xf32, #tpu.memory_space<vmem>>, vector<2x128x128xf32>
    %1 = vector.shape_cast %0 : vector<2x128x128xf32> to vector<256x128xf32>
    %c0_2 = arith.constant 0 : index
    %c0_3 = arith.constant 0 : index
    %2 = vector.load %arg2[%c0_2, %c0_3] : memref<128x384xf32, #tpu.memory_space<vmem>>, vector<128x384xf32>
    %3 = arith.truncf %2 : vector<128x384xf32> to vector<128x384xbf16>
    %4 = arith.truncf %1 : vector<256x128xf32> to vector<256x128xbf16>
    %cst = arith.constant dense<0.000000e+00> : vector<256x384xf32>
    %5 = tpu.matmul %4, %3, %cst {dimension_numbers = #tpu.dot_dimension_numbers<[1], [0], [0], [1], [0, 0, 1, 1], [], []>} : vector<256x128xbf16>, vector<128x384xbf16>, vector<256x384xf32> -> vector<256x384xf32>
    %c0_4 = arith.constant 0 : index
    %c0_5 = arith.constant 0 : index
    %6 = vector.load %arg3[%c0_4, %c0_5] : memref<1x384xf32, #tpu.memory_space<vmem>>, vector<1x384xf32>
    %7 = vector.shape_cast %6 : vector<1x384xf32> to vector<384xf32>
    %8 = vector.shape_cast %7 : vector<384xf32> to vector<1x384xf32>
    %9 = vector.broadcast %8 : vector<1x384xf32> to vector<256x384xf32>
    %10 = arith.addf %5, %9 : vector<256x384xf32>
    %11 = vector.extract_strided_slice %10 {offsets = [0, 0], sizes = [256, 128], strides = [1, 1]} : vector<256x384xf32> to vector<256x128xf32>
    %cst_6 = arith.constant 0.176776692 : f32
    %12 = vector.broadcast %cst_6 : f32 to vector<256x128xf32>
    %13 = arith.mulf %11, %12 : vector<256x128xf32>
    %14 = vector.extract_strided_slice %10 {offsets = [0, 128], sizes = [256, 128], strides = [1, 1]} : vector<256x384xf32> to vector<256x128xf32>
    %15 = vector.extract_strided_slice %10 {offsets = [0, 256], sizes = [256, 128], strides = [1, 1]} : vector<256x384xf32> to vector<256x128xf32>
    %16 = tpu.iota {dimensions = array<i32: 0>} : vector<128x128xi32>
    %17 = tpu.iota {dimensions = array<i32: 1>} : vector<128x128xi32>
    %18 = arith.cmpi sle, %17, %16 : vector<128x128xi32>
    %cst_7 = arith.constant 0.000000e+00 : f32
    %cst_8 = arith.constant -1.000000e+30 : f32
    %19 = vector.broadcast %cst_7 : f32 to vector<128x128xf32>
    %20 = vector.broadcast %cst_8 : f32 to vector<128x128xf32>
    %21 = arith.select %18, %19, %20 : vector<128x128xi1>, vector<128x128xf32>
    %c0_9 = arith.constant 0 : index
    %c0_10 = arith.constant 0 : index
    %22 = vector.load %arg4[%c0_9, %c0_10] : memref<128x128xf32, #tpu.memory_space<vmem>>, vector<128x128xf32>
    %23 = arith.truncf %22 : vector<128x128xf32> to vector<128x128xbf16>
    %c0_11 = arith.constant 0 : index
    %c0_12 = arith.constant 0 : index
    %24 = vector.load %arg5[%c0_11, %c0_12] : memref<1x128xf32, #tpu.memory_space<vmem>>, vector<1x128xf32>
    %25 = vector.shape_cast %24 : vector<1x128xf32> to vector<128xf32>
    %26 = vector.shape_cast %25 : vector<128xf32> to vector<1x128xf32>
    %cst_13 = arith.constant 0.000000e+00 : f32
    %27 = vector.broadcast %cst_13 : f32 to vector<128x128xf32>
    %28 = vector.extract_strided_slice %13 {offsets = [0, 0], sizes = [128, 32], strides = [1, 1]} : vector<256x128xf32> to vector<128x32xf32>
    %29 = arith.truncf %28 : vector<128x32xf32> to vector<128x32xbf16>
    %30 = vector.extract_strided_slice %14 {offsets = [0, 0], sizes = [128, 32], strides = [1, 1]} : vector<256x128xf32> to vector<128x32xf32>
    %31 = arith.truncf %30 : vector<128x32xf32> to vector<128x32xbf16>
    %32 = vector.extract_strided_slice %15 {offsets = [0, 0], sizes = [128, 32], strides = [1, 1]} : vector<256x128xf32> to vector<128x32xf32>
    %33 = arith.truncf %32 : vector<128x32xf32> to vector<128x32xbf16>
    %cst_14 = arith.constant dense<0.000000e+00> : vector<128x128xf32>
    %34 = tpu.matmul %29, %31, %cst_14 {dimension_numbers = #tpu.dot_dimension_numbers<[1], [1], [0], [0], [0, 0, 1, 0], [], []>} : vector<128x32xbf16>, vector<128x32xbf16>, vector<128x128xf32> -> vector<128x128xf32>
    %35 = arith.addf %34, %21 : vector<128x128xf32>
    %cst_15 = arith.constant dense<0xFF800000> : vector<128xf32>
    %36 = vector.multi_reduction <maximumf>, %35, %cst_15 [1] : vector<128x128xf32> to vector<128xf32>
    %37 = vector.shape_cast %36 : vector<128xf32> to vector<128x1xf32>
    %38 = vector.broadcast %37 : vector<128x1xf32> to vector<128x128xf32>
    %39 = arith.subf %35, %38 : vector<128x128xf32>
    %40 = math.exp %39 : vector<128x128xf32>
    %cst_16 = arith.constant dense<0.000000e+00> : vector<128xf32>
    %41 = vector.multi_reduction <add>, %40, %cst_16 [1] : vector<128x128xf32> to vector<128xf32>
    %42 = vector.shape_cast %41 : vector<128xf32> to vector<128x1xf32>
    %43 = tpu.reciprocal %42 {approx = true} : vector<128x1xf32> -> vector<128x1xf32>
    %44 = vector.broadcast %43 : vector<128x1xf32> to vector<128x128xf32>
    %45 = arith.mulf %40, %44 : vector<128x128xf32>
    %46 = arith.truncf %45 : vector<128x128xf32> to vector<128x128xbf16>
    %cst_17 = arith.constant dense<0.000000e+00> : vector<128x32xf32>
    %47 = tpu.matmul %46, %33, %cst_17 {dimension_numbers = #tpu.dot_dimension_numbers<[1], [0], [0], [1], [0, 0, 1, 1], [], []>} : vector<128x128xbf16>, vector<128x32xbf16>, vector<128x32xf32> -> vector<128x32xf32>
    %48 = arith.truncf %47 : vector<128x32xf32> to vector<128x32xbf16>
    %49 = vector.extract_strided_slice %23 {offsets = [0, 0], sizes = [32, 128], strides = [1, 1]} : vector<128x128xbf16> to vector<32x128xbf16>
    %cst_18 = arith.constant dense<0.000000e+00> : vector<128x128xf32>
    %50 = tpu.matmul %48, %49, %cst_18 {dimension_numbers = #tpu.dot_dimension_numbers<[1], [0], [0], [1], [0, 0, 1, 1], [], []>} : vector<128x32xbf16>, vector<32x128xbf16>, vector<128x128xf32> -> vector<128x128xf32>
    %51 = arith.addf %27, %50 : vector<128x128xf32>
    %52 = vector.extract_strided_slice %13 {offsets = [0, 32], sizes = [128, 32], strides = [1, 1]} : vector<256x128xf32> to vector<128x32xf32>
    %53 = arith.truncf %52 : vector<128x32xf32> to vector<128x32xbf16>
    %54 = vector.extract_strided_slice %14 {offsets = [0, 32], sizes = [128, 32], strides = [1, 1]} : vector<256x128xf32> to vector<128x32xf32>
    %55 = arith.truncf %54 : vector<128x32xf32> to vector<128x32xbf16>
    %56 = vector.extract_strided_slice %15 {offsets = [0, 32], sizes = [128, 32], strides = [1, 1]} : vector<256x128xf32> to vector<128x32xf32>
    %57 = arith.truncf %56 : vector<128x32xf32> to vector<128x32xbf16>
    %cst_19 = arith.constant dense<0.000000e+00> : vector<128x128xf32>
    %58 = tpu.matmul %53, %55, %cst_19 {dimension_numbers = #tpu.dot_dimension_numbers<[1], [1], [0], [0], [0, 0, 1, 0], [], []>} : vector<128x32xbf16>, vector<128x32xbf16>, vector<128x128xf32> -> vector<128x128xf32>
    %59 = arith.addf %58, %21 : vector<128x128xf32>
    %cst_20 = arith.constant dense<0xFF800000> : vector<128xf32>
    %60 = vector.multi_reduction <maximumf>, %59, %cst_20 [1] : vector<128x128xf32> to vector<128xf32>
    %61 = vector.shape_cast %60 : vector<128xf32> to vector<128x1xf32>
    %62 = vector.broadcast %61 : vector<128x1xf32> to vector<128x128xf32>
    %63 = arith.subf %59, %62 : vector<128x128xf32>
    %64 = math.exp %63 : vector<128x128xf32>
    %cst_21 = arith.constant dense<0.000000e+00> : vector<128xf32>
    %65 = vector.multi_reduction <add>, %64, %cst_21 [1] : vector<128x128xf32> to vector<128xf32>
    %66 = vector.shape_cast %65 : vector<128xf32> to vector<128x1xf32>
    %67 = tpu.reciprocal %66 {approx = true} : vector<128x1xf32> -> vector<128x1xf32>
    %68 = vector.broadcast %67 : vector<128x1xf32> to vector<128x128xf32>
    %69 = arith.mulf %64, %68 : vector<128x128xf32>
    %70 = arith.truncf %69 : vector<128x128xf32> to vector<128x128xbf16>
    %cst_22 = arith.constant dense<0.000000e+00> : vector<128x32xf32>
    %71 = tpu.matmul %70, %57, %cst_22 {dimension_numbers = #tpu.dot_dimension_numbers<[1], [0], [0], [1], [0, 0, 1, 1], [], []>} : vector<128x128xbf16>, vector<128x32xbf16>, vector<128x32xf32> -> vector<128x32xf32>
    %72 = arith.truncf %71 : vector<128x32xf32> to vector<128x32xbf16>
    %73 = vector.extract_strided_slice %23 {offsets = [32, 0], sizes = [32, 128], strides = [1, 1]} : vector<128x128xbf16> to vector<32x128xbf16>
    %cst_23 = arith.constant dense<0.000000e+00> : vector<128x128xf32>
    %74 = tpu.matmul %72, %73, %cst_23 {dimension_numbers = #tpu.dot_dimension_numbers<[1], [0], [0], [1], [0, 0, 1, 1], [], []>} : vector<128x32xbf16>, vector<32x128xbf16>, vector<128x128xf32> -> vector<128x128xf32>
    %75 = arith.addf %51, %74 : vector<128x128xf32>
    %76 = vector.extract_strided_slice %13 {offsets = [0, 64], sizes = [128, 32], strides = [1, 1]} : vector<256x128xf32> to vector<128x32xf32>
    %77 = arith.truncf %76 : vector<128x32xf32> to vector<128x32xbf16>
    %78 = vector.extract_strided_slice %14 {offsets = [0, 64], sizes = [128, 32], strides = [1, 1]} : vector<256x128xf32> to vector<128x32xf32>
    %79 = arith.truncf %78 : vector<128x32xf32> to vector<128x32xbf16>
    %80 = vector.extract_strided_slice %15 {offsets = [0, 64], sizes = [128, 32], strides = [1, 1]} : vector<256x128xf32> to vector<128x32xf32>
    %81 = arith.truncf %80 : vector<128x32xf32> to vector<128x32xbf16>
    %cst_24 = arith.constant dense<0.000000e+00> : vector<128x128xf32>
    %82 = tpu.matmul %77, %79, %cst_24 {dimension_numbers = #tpu.dot_dimension_numbers<[1], [1], [0], [0], [0, 0, 1, 0], [], []>} : vector<128x32xbf16>, vector<128x32xbf16>, vector<128x128xf32> -> vector<128x128xf32>
    %83 = arith.addf %82, %21 : vector<128x128xf32>
    %cst_25 = arith.constant dense<0xFF800000> : vector<128xf32>
    %84 = vector.multi_reduction <maximumf>, %83, %cst_25 [1] : vector<128x128xf32> to vector<128xf32>
    %85 = vector.shape_cast %84 : vector<128xf32> to vector<128x1xf32>
    %86 = vector.broadcast %85 : vector<128x1xf32> to vector<128x128xf32>
    %87 = arith.subf %83, %86 : vector<128x128xf32>
    %88 = math.exp %87 : vector<128x128xf32>
    %cst_26 = arith.constant dense<0.000000e+00> : vector<128xf32>
    %89 = vector.multi_reduction <add>, %88, %cst_26 [1] : vector<128x128xf32> to vector<128xf32>
    %90 = vector.shape_cast %89 : vector<128xf32> to vector<128x1xf32>
    %91 = tpu.reciprocal %90 {approx = true} : vector<128x1xf32> -> vector<128x1xf32>
    %92 = vector.broadcast %91 : vector<128x1xf32> to vector<128x128xf32>
    %93 = arith.mulf %88, %92 : vector<128x128xf32>
    %94 = arith.truncf %93 : vector<128x128xf32> to vector<128x128xbf16>
    %cst_27 = arith.constant dense<0.000000e+00> : vector<128x32xf32>
    %95 = tpu.matmul %94, %81, %cst_27 {dimension_numbers = #tpu.dot_dimension_numbers<[1], [0], [0], [1], [0, 0, 1, 1], [], []>} : vector<128x128xbf16>, vector<128x32xbf16>, vector<128x32xf32> -> vector<128x32xf32>
    %96 = arith.truncf %95 : vector<128x32xf32> to vector<128x32xbf16>
    %97 = vector.extract_strided_slice %23 {offsets = [64, 0], sizes = [32, 128], strides = [1, 1]} : vector<128x128xbf16> to vector<32x128xbf16>
    %cst_28 = arith.constant dense<0.000000e+00> : vector<128x128xf32>
    %98 = tpu.matmul %96, %97, %cst_28 {dimension_numbers = #tpu.dot_dimension_numbers<[1], [0], [0], [1], [0, 0, 1, 1], [], []>} : vector<128x32xbf16>, vector<32x128xbf16>, vector<128x128xf32> -> vector<128x128xf32>
    %99 = arith.addf %75, %98 : vector<128x128xf32>
    %100 = vector.extract_strided_slice %13 {offsets = [0, 96], sizes = [128, 32], strides = [1, 1]} : vector<256x128xf32> to vector<128x32xf32>
    %101 = arith.truncf %100 : vector<128x32xf32> to vector<128x32xbf16>
    %102 = vector.extract_strided_slice %14 {offsets = [0, 96], sizes = [128, 32], strides = [1, 1]} : vector<256x128xf32> to vector<128x32xf32>
    %103 = arith.truncf %102 : vector<128x32xf32> to vector<128x32xbf16>
    %104 = vector.extract_strided_slice %15 {offsets = [0, 96], sizes = [128, 32], strides = [1, 1]} : vector<256x128xf32> to vector<128x32xf32>
    %105 = arith.truncf %104 : vector<128x32xf32> to vector<128x32xbf16>
    %cst_29 = arith.constant dense<0.000000e+00> : vector<128x128xf32>
    %106 = tpu.matmul %101, %103, %cst_29 {dimension_numbers = #tpu.dot_dimension_numbers<[1], [1], [0], [0], [0, 0, 1, 0], [], []>} : vector<128x32xbf16>, vector<128x32xbf16>, vector<128x128xf32> -> vector<128x128xf32>
    %107 = arith.addf %106, %21 : vector<128x128xf32>
    %cst_30 = arith.constant dense<0xFF800000> : vector<128xf32>
    %108 = vector.multi_reduction <maximumf>, %107, %cst_30 [1] : vector<128x128xf32> to vector<128xf32>
    %109 = vector.shape_cast %108 : vector<128xf32> to vector<128x1xf32>
    %110 = vector.broadcast %109 : vector<128x1xf32> to vector<128x128xf32>
    %111 = arith.subf %107, %110 : vector<128x128xf32>
    %112 = math.exp %111 : vector<128x128xf32>
    %cst_31 = arith.constant dense<0.000000e+00> : vector<128xf32>
    %113 = vector.multi_reduction <add>, %112, %cst_31 [1] : vector<128x128xf32> to vector<128xf32>
    %114 = vector.shape_cast %113 : vector<128xf32> to vector<128x1xf32>
    %115 = tpu.reciprocal %114 {approx = true} : vector<128x1xf32> -> vector<128x1xf32>
    %116 = vector.broadcast %115 : vector<128x1xf32> to vector<128x128xf32>
    %117 = arith.mulf %112, %116 : vector<128x128xf32>
    %118 = arith.truncf %117 : vector<128x128xf32> to vector<128x128xbf16>
    %cst_32 = arith.constant dense<0.000000e+00> : vector<128x32xf32>
    %119 = tpu.matmul %118, %105, %cst_32 {dimension_numbers = #tpu.dot_dimension_numbers<[1], [0], [0], [1], [0, 0, 1, 1], [], []>} : vector<128x128xbf16>, vector<128x32xbf16>, vector<128x32xf32> -> vector<128x32xf32>
    %120 = arith.truncf %119 : vector<128x32xf32> to vector<128x32xbf16>
    %121 = vector.extract_strided_slice %23 {offsets = [96, 0], sizes = [32, 128], strides = [1, 1]} : vector<128x128xbf16> to vector<32x128xbf16>
    %cst_33 = arith.constant dense<0.000000e+00> : vector<128x128xf32>
    %122 = tpu.matmul %120, %121, %cst_33 {dimension_numbers = #tpu.dot_dimension_numbers<[1], [0], [0], [1], [0, 0, 1, 1], [], []>} : vector<128x32xbf16>, vector<32x128xbf16>, vector<128x128xf32> -> vector<128x128xf32>
    %123 = arith.addf %99, %122 : vector<128x128xf32>
    %124 = vector.broadcast %26 : vector<1x128xf32> to vector<128x128xf32>
    %125 = arith.addf %123, %124 : vector<128x128xf32>
    %c0_34 = arith.constant 0 : index
    %c0_35 = arith.constant 0 : index
    %c0_36 = arith.constant 0 : index
    %126 = vector.load %arg6[%c0_34, %c0_35, %c0_36] : memref<2x128x128xf32, #tpu.memory_space<vmem>>, vector<1x128x128xf32>
    %127 = vector.shape_cast %126 : vector<1x128x128xf32> to vector<128x128xf32>
    %128 = vector.shape_cast %125 : vector<128x128xf32> to vector<1x128x128xf32>
    tpu.vector_store %arg6[%c0_34, %c0_35, %c0_36], %128 {strides = array<i32>} : memref<2x128x128xf32, #tpu.memory_space<vmem>>, vector<1x128x128xf32>,
    %cst_37 = arith.constant 0.000000e+00 : f32
    %129 = vector.broadcast %cst_37 : f32 to vector<128x128xf32>
    %130 = vector.extract_strided_slice %13 {offsets = [128, 0], sizes = [128, 32], strides = [1, 1]} : vector<256x128xf32> to vector<128x32xf32>
    %131 = arith.truncf %130 : vector<128x32xf32> to vector<128x32xbf16>
    %132 = vector.extract_strided_slice %14 {offsets = [128, 0], sizes = [128, 32], strides = [1, 1]} : vector<256x128xf32> to vector<128x32xf32>
    %133 = arith.truncf %132 : vector<128x32xf32> to vector<128x32xbf16>
    %134 = vector.extract_strided_slice %15 {offsets = [128, 0], sizes = [128, 32], strides = [1, 1]} : vector<256x128xf32> to vector<128x32xf32>
    %135 = arith.truncf %134 : vector<128x32xf32> to vector<128x32xbf16>
    %cst_38 = arith.constant dense<0.000000e+00> : vector<128x128xf32>
    %136 = tpu.matmul %131, %133, %cst_38 {dimension_numbers = #tpu.dot_dimension_numbers<[1], [1], [0], [0], [0, 0, 1, 0], [], []>} : vector<128x32xbf16>, vector<128x32xbf16>, vector<128x128xf32> -> vector<128x128xf32>
    %137 = arith.addf %136, %21 : vector<128x128xf32>
    %cst_39 = arith.constant dense<0xFF800000> : vector<128xf32>
    %138 = vector.multi_reduction <maximumf>, %137, %cst_39 [1] : vector<128x128xf32> to vector<128xf32>
    %139 = vector.shape_cast %138 : vector<128xf32> to vector<128x1xf32>
    %140 = vector.broadcast %139 : vector<128x1xf32> to vector<128x128xf32>
    %141 = arith.subf %137, %140 : vector<128x128xf32>
    %142 = math.exp %141 : vector<128x128xf32>
    %cst_40 = arith.constant dense<0.000000e+00> : vector<128xf32>
    %143 = vector.multi_reduction <add>, %142, %cst_40 [1] : vector<128x128xf32> to vector<128xf32>
    %144 = vector.shape_cast %143 : vector<128xf32> to vector<128x1xf32>
    %145 = tpu.reciprocal %144 {approx = true} : vector<128x1xf32> -> vector<128x1xf32>
    %146 = vector.broadcast %145 : vector<128x1xf32> to vector<128x128xf32>
    %147 = arith.mulf %142, %146 : vector<128x128xf32>
    %148 = arith.truncf %147 : vector<128x128xf32> to vector<128x128xbf16>
    %cst_41 = arith.constant dense<0.000000e+00> : vector<128x32xf32>
    %149 = tpu.matmul %148, %135, %cst_41 {dimension_numbers = #tpu.dot_dimension_numbers<[1], [0], [0], [1], [0, 0, 1, 1], [], []>} : vector<128x128xbf16>, vector<128x32xbf16>, vector<128x32xf32> -> vector<128x32xf32>
    %150 = arith.truncf %149 : vector<128x32xf32> to vector<128x32xbf16>
    %151 = vector.extract_strided_slice %23 {offsets = [0, 0], sizes = [32, 128], strides = [1, 1]} : vector<128x128xbf16> to vector<32x128xbf16>
    %cst_42 = arith.constant dense<0.000000e+00> : vector<128x128xf32>
    %152 = tpu.matmul %150, %151, %cst_42 {dimension_numbers = #tpu.dot_dimension_numbers<[1], [0], [0], [1], [0, 0, 1, 1], [], []>} : vector<128x32xbf16>, vector<32x128xbf16>, vector<128x128xf32> -> vector<128x128xf32>
    %153 = arith.addf %129, %152 : vector<128x128xf32>
    %154 = vector.extract_strided_slice %13 {offsets = [128, 32], sizes = [128, 32], strides = [1, 1]} : vector<256x128xf32> to vector<128x32xf32>
    %155 = arith.truncf %154 : vector<128x32xf32> to vector<128x32xbf16>
    %156 = vector.extract_strided_slice %14 {offsets = [128, 32], sizes = [128, 32], strides = [1, 1]} : vector<256x128xf32> to vector<128x32xf32>
    %157 = arith.truncf %156 : vector<128x32xf32> to vector<128x32xbf16>
    %158 = vector.extract_strided_slice %15 {offsets = [128, 32], sizes = [128, 32], strides = [1, 1]} : vector<256x128xf32> to vector<128x32xf32>
    %159 = arith.truncf %158 : vector<128x32xf32> to vector<128x32xbf16>
    %cst_43 = arith.constant dense<0.000000e+00> : vector<128x128xf32>
    %160 = tpu.matmul %155, %157, %cst_43 {dimension_numbers = #tpu.dot_dimension_numbers<[1], [1], [0], [0], [0, 0, 1, 0], [], []>} : vector<128x32xbf16>, vector<128x32xbf16>, vector<128x128xf32> -> vector<128x128xf32>
    %161 = arith.addf %160, %21 : vector<128x128xf32>
    %cst_44 = arith.constant dense<0xFF800000> : vector<128xf32>
    %162 = vector.multi_reduction <maximumf>, %161, %cst_44 [1] : vector<128x128xf32> to vector<128xf32>
    %163 = vector.shape_cast %162 : vector<128xf32> to vector<128x1xf32>
    %164 = vector.broadcast %163 : vector<128x1xf32> to vector<128x128xf32>
    %165 = arith.subf %161, %164 : vector<128x128xf32>
    %166 = math.exp %165 : vector<128x128xf32>
    %cst_45 = arith.constant dense<0.000000e+00> : vector<128xf32>
    %167 = vector.multi_reduction <add>, %166, %cst_45 [1] : vector<128x128xf32> to vector<128xf32>
    %168 = vector.shape_cast %167 : vector<128xf32> to vector<128x1xf32>
    %169 = tpu.reciprocal %168 {approx = true} : vector<128x1xf32> -> vector<128x1xf32>
    %170 = vector.broadcast %169 : vector<128x1xf32> to vector<128x128xf32>
    %171 = arith.mulf %166, %170 : vector<128x128xf32>
    %172 = arith.truncf %171 : vector<128x128xf32> to vector<128x128xbf16>
    %cst_46 = arith.constant dense<0.000000e+00> : vector<128x32xf32>
    %173 = tpu.matmul %172, %159, %cst_46 {dimension_numbers = #tpu.dot_dimension_numbers<[1], [0], [0], [1], [0, 0, 1, 1], [], []>} : vector<128x128xbf16>, vector<128x32xbf16>, vector<128x32xf32> -> vector<128x32xf32>
    %174 = arith.truncf %173 : vector<128x32xf32> to vector<128x32xbf16>
    %175 = vector.extract_strided_slice %23 {offsets = [32, 0], sizes = [32, 128], strides = [1, 1]} : vector<128x128xbf16> to vector<32x128xbf16>
    %cst_47 = arith.constant dense<0.000000e+00> : vector<128x128xf32>
    %176 = tpu.matmul %174, %175, %cst_47 {dimension_numbers = #tpu.dot_dimension_numbers<[1], [0], [0], [1], [0, 0, 1, 1], [], []>} : vector<128x32xbf16>, vector<32x128xbf16>, vector<128x128xf32> -> vector<128x128xf32>
    %177 = arith.addf %153, %176 : vector<128x128xf32>
    %178 = vector.extract_strided_slice %13 {offsets = [128, 64], sizes = [128, 32], strides = [1, 1]} : vector<256x128xf32> to vector<128x32xf32>
    %179 = arith.truncf %178 : vector<128x32xf32> to vector<128x32xbf16>
    %180 = vector.extract_strided_slice %14 {offsets = [128, 64], sizes = [128, 32], strides = [1, 1]} : vector<256x128xf32> to vector<128x32xf32>
    %181 = arith.truncf %180 : vector<128x32xf32> to vector<128x32xbf16>
    %182 = vector.extract_strided_slice %15 {offsets = [128, 64], sizes = [128, 32], strides = [1, 1]} : vector<256x128xf32> to vector<128x32xf32>
    %183 = arith.truncf %182 : vector<128x32xf32> to vector<128x32xbf16>
    %cst_48 = arith.constant dense<0.000000e+00> : vector<128x128xf32>
    %184 = tpu.matmul %179, %181, %cst_48 {dimension_numbers = #tpu.dot_dimension_numbers<[1], [1], [0], [0], [0, 0, 1, 0], [], []>} : vector<128x32xbf16>, vector<128x32xbf16>, vector<128x128xf32> -> vector<128x128xf32>
    %185 = arith.addf %184, %21 : vector<128x128xf32>
    %cst_49 = arith.constant dense<0xFF800000> : vector<128xf32>
    %186 = vector.multi_reduction <maximumf>, %185, %cst_49 [1] : vector<128x128xf32> to vector<128xf32>
    %187 = vector.shape_cast %186 : vector<128xf32> to vector<128x1xf32>
    %188 = vector.broadcast %187 : vector<128x1xf32> to vector<128x128xf32>
    %189 = arith.subf %185, %188 : vector<128x128xf32>
    %190 = math.exp %189 : vector<128x128xf32>
    %cst_50 = arith.constant dense<0.000000e+00> : vector<128xf32>
    %191 = vector.multi_reduction <add>, %190, %cst_50 [1] : vector<128x128xf32> to vector<128xf32>
    %192 = vector.shape_cast %191 : vector<128xf32> to vector<128x1xf32>
    %193 = tpu.reciprocal %192 {approx = true} : vector<128x1xf32> -> vector<128x1xf32>
    %194 = vector.broadcast %193 : vector<128x1xf32> to vector<128x128xf32>
    %195 = arith.mulf %190, %194 : vector<128x128xf32>
    %196 = arith.truncf %195 : vector<128x128xf32> to vector<128x128xbf16>
    %cst_51 = arith.constant dense<0.000000e+00> : vector<128x32xf32>
    %197 = tpu.matmul %196, %183, %cst_51 {dimension_numbers = #tpu.dot_dimension_numbers<[1], [0], [0], [1], [0, 0, 1, 1], [], []>} : vector<128x128xbf16>, vector<128x32xbf16>, vector<128x32xf32> -> vector<128x32xf32>
    %198 = arith.truncf %197 : vector<128x32xf32> to vector<128x32xbf16>
    %199 = vector.extract_strided_slice %23 {offsets = [64, 0], sizes = [32, 128], strides = [1, 1]} : vector<128x128xbf16> to vector<32x128xbf16>
    %cst_52 = arith.constant dense<0.000000e+00> : vector<128x128xf32>
    %200 = tpu.matmul %198, %199, %cst_52 {dimension_numbers = #tpu.dot_dimension_numbers<[1], [0], [0], [1], [0, 0, 1, 1], [], []>} : vector<128x32xbf16>, vector<32x128xbf16>, vector<128x128xf32> -> vector<128x128xf32>
    %201 = arith.addf %177, %200 : vector<128x128xf32>
    %202 = vector.extract_strided_slice %13 {offsets = [128, 96], sizes = [128, 32], strides = [1, 1]} : vector<256x128xf32> to vector<128x32xf32>
    %203 = arith.truncf %202 : vector<128x32xf32> to vector<128x32xbf16>
    %204 = vector.extract_strided_slice %14 {offsets = [128, 96], sizes = [128, 32], strides = [1, 1]} : vector<256x128xf32> to vector<128x32xf32>
    %205 = arith.truncf %204 : vector<128x32xf32> to vector<128x32xbf16>
    %206 = vector.extract_strided_slice %15 {offsets = [128, 96], sizes = [128, 32], strides = [1, 1]} : vector<256x128xf32> to vector<128x32xf32>
    %207 = arith.truncf %206 : vector<128x32xf32> to vector<128x32xbf16>
    %cst_53 = arith.constant dense<0.000000e+00> : vector<128x128xf32>
    %208 = tpu.matmul %203, %205, %cst_53 {dimension_numbers = #tpu.dot_dimension_numbers<[1], [1], [0], [0], [0, 0, 1, 0], [], []>} : vector<128x32xbf16>, vector<128x32xbf16>, vector<128x128xf32> -> vector<128x128xf32>
    %209 = arith.addf %208, %21 : vector<128x128xf32>
    %cst_54 = arith.constant dense<0xFF800000> : vector<128xf32>
    %210 = vector.multi_reduction <maximumf>, %209, %cst_54 [1] : vector<128x128xf32> to vector<128xf32>
    %211 = vector.shape_cast %210 : vector<128xf32> to vector<128x1xf32>
    %212 = vector.broadcast %211 : vector<128x1xf32> to vector<128x128xf32>
    %213 = arith.subf %209, %212 : vector<128x128xf32>
    %214 = math.exp %213 : vector<128x128xf32>
    %cst_55 = arith.constant dense<0.000000e+00> : vector<128xf32>
    %215 = vector.multi_reduction <add>, %214, %cst_55 [1] : vector<128x128xf32> to vector<128xf32>
    %216 = vector.shape_cast %215 : vector<128xf32> to vector<128x1xf32>
    %217 = tpu.reciprocal %216 {approx = true} : vector<128x1xf32> -> vector<128x1xf32>
    %218 = vector.broadcast %217 : vector<128x1xf32> to vector<128x128xf32>
    %219 = arith.mulf %214, %218 : vector<128x128xf32>
    %220 = arith.truncf %219 : vector<128x128xf32> to vector<128x128xbf16>
    %cst_56 = arith.constant dense<0.000000e+00> : vector<128x32xf32>
    %221 = tpu.matmul %220, %207, %cst_56 {dimension_numbers = #tpu.dot_dimension_numbers<[1], [0], [0], [1], [0, 0, 1, 1], [], []>} : vector<128x128xbf16>, vector<128x32xbf16>, vector<128x32xf32> -> vector<128x32xf32>
    %222 = arith.truncf %221 : vector<128x32xf32> to vector<128x32xbf16>
    %223 = vector.extract_strided_slice %23 {offsets = [96, 0], sizes = [32, 128], strides = [1, 1]} : vector<128x128xbf16> to vector<32x128xbf16>
    %cst_57 = arith.constant dense<0.000000e+00> : vector<128x128xf32>
    %224 = tpu.matmul %222, %223, %cst_57 {dimension_numbers = #tpu.dot_dimension_numbers<[1], [0], [0], [1], [0, 0, 1, 1], [], []>} : vector<128x32xbf16>, vector<32x128xbf16>, vector<128x128xf32> -> vector<128x128xf32>
    %225 = arith.addf %201, %224 : vector<128x128xf32>
    %226 = vector.broadcast %26 : vector<1x128xf32> to vector<128x128xf32>
    %227 = arith.addf %225, %226 : vector<128x128xf32>
    %c1 = arith.constant 1 : index
    %c0_58 = arith.constant 0 : index
    %c0_59 = arith.constant 0 : index
    %228 = vector.load %arg6[%c1, %c0_58, %c0_59] : memref<2x128x128xf32, #tpu.memory_space<vmem>>, vector<1x128x128xf32>
    %229 = vector.shape_cast %228 : vector<1x128x128xf32> to vector<128x128xf32>
    %230 = vector.shape_cast %227 : vector<128x128xf32> to vector<1x128x128xf32>
    tpu.vector_store %arg6[%c1, %c0_58, %c0_59], %230 {strides = array<i32>} : memref<2x128x128xf32, #tpu.memory_space<vmem>>, vector<1x128x128xf32>,
    return
  }
  func.func @transform_0(%arg0: i32) -> (i32, i32, i32) {
    %c0_i32 = arith.constant 0 : i32
    %c0_i32_0 = arith.constant 0 : i32
    %c0_i32_1 = arith.constant 0 : i32
    return %arg0, %c0_i32, %c0_i32_0 : i32, i32, i32
  }
  func.func @transform_1(%arg0: i32) -> (i32, i32) {
    %c0_i32 = arith.constant 0 : i32
    %c0_i32_0 = arith.constant 0 : i32
    %c0_i32_1 = arith.constant 0 : i32
    return %c0_i32, %c0_i32_0 : i32, i32
  }
  func.func @transform_2(%arg0: i32) -> (i32, i32) {
    %c0_i32 = arith.constant 0 : i32
    %c0_i32_0 = arith.constant 0 : i32
    %c0_i32_1 = arith.constant 0 : i32
    return %c0_i32, %c0_i32_0 : i32, i32
  }
  func.func @transform_3(%arg0: i32) -> (i32, i32) {
    %c0_i32 = arith.constant 0 : i32
    %c0_i32_0 = arith.constant 0 : i32
    %c0_i32_1 = arith.constant 0 : i32
    return %c0_i32, %c0_i32_0 : i32, i32
  }
  func.func @transform_4(%arg0: i32) -> (i32, i32) {
    %c0_i32 = arith.constant 0 : i32
    %c0_i32_0 = arith.constant 0 : i32
    %c0_i32_1 = arith.constant 0 : i32
    return %c0_i32, %c0_i32_0 : i32, i32
  }
  func.func @transform_5(%arg0: i32) -> (i32, i32, i32) {
    %c0_i32 = arith.constant 0 : i32
    %c0_i32_0 = arith.constant 0 : i32
    %c0_i32_1 = arith.constant 0 : i32
    return %arg0, %c0_i32, %c0_i32_0 : i32, i32, i32
  }
}

</mosaic_0001>

<bundles_post_ra>
// kernel: tpu_custom_call.1
= control target key start
LH: loop header
LB: loop body
LE: loop exit
PB: predicated region body
PF: predicated region fallthrough
CT: control target
= control target key end

     0   :  { %10 = vsyncpa [#allocation3], 0  ;;  %s10061_s0 = inlined_call_operand.hbm [shape: f32[2,128,128], index: 0, kind: input, shape index: {}]   ;;  %s10062_s1 = inlined_call_operand.hbm [shape: f32[128,384], index: 1, kind: input, shape index: {}]   ;;  %s10063_s2 = inlined_call_operand.vmem [shape: f32[1,384], index: 2, kind: input, shape index: {}]   ;;  %s10064_s3 = inlined_call_operand.hbm [shape: f32[128,128], index: 3, kind: input, shape index: {}]   ;;  %s10065_s4 = inlined_call_operand.vmem [shape: f32[1,128], index: 4, kind: input, shape index: {}]   ;;  %s10066_s5 = inlined_call_operand.hbm [shape: f32[2,128,128], index: 5, kind: output, shape index: {}]  }
   0x1   :  { %11 = vsyncpa [#allocation6], 0 }
   0x2   :  { %12 = vsyncpa [#allocation4], 0  ;;  %s7317_s18 = smov [#allocation5]  }
   0x3   :  { %s30_s19 = sshll.u32 %s7317_s18, 4  ;;  %s31_s19 = int_to_ptr.vmem [resolvable:$true] %s30_s19 }
   0x4   :  { %s7239_s20 = scalar_lea.vmem %s31_s19, 6144  ;;  %p7244_p1 = scmp.lt.s32.totalorder %s31_s19, %s31_s19 }
   0x5   :  { %p7240_p0 = scmp.ne.s32.totalorder %s31_s19, %s7239_s20  ;;  %p7245_p2 = scmp.lt.s32.totalorder %s7239_s20, %s7239_s20 }
   0x7   :  { %p7246_p3 = por %p7245_p2, %p7244_p1 }
   0x9   :  { %p7247_p4 = pnand %p7246_p3, %p7240_p0 }
   0xb   :  { %7250 = shalt.err (!%p7247_p4)
}
   0xc   :  { %s7318_s21 = smov 384   ;;  %s7319_s22 = smov 24  }
   0xd   :  { %36 = dma.hbm_to_vmem [thread:$0]  %s10062_s1, 6144, %s31_s19, [#allocation6], %s7318_s21, %s7318_s21, %s7319_s22  }
   0xe   :  { %s7320_s25 = smov [#allocation2]  }
   0xf   :  { %s18_s26 = sshll.u32 %s7320_s25, 4  ;;  %s19_s26 = int_to_ptr.vmem [resolvable:$true] %s18_s26 }
  0x10   :  { %s7259_s27 = scalar_lea.vmem %s19_s26, 4096  ;;  %p7264_p6 = scmp.lt.s32.totalorder %s19_s26, %s19_s26 }
  0x11   :  { %p7260_p5 = scmp.ne.s32.totalorder %s19_s26, %s7259_s27  ;;  %p7265_p7 = scmp.lt.s32.totalorder %s7259_s27, %s7259_s27 }
  0x13   :  { %p7266_p8 = por %p7265_p7, %p7264_p6 }
  0x15   :  { %p7267_p9 = pnand %p7266_p8, %p7260_p5 }
  0x17   :  { %7270 = shalt.err (!%p7267_p9)
}
  0x18   :  { %s7321_s28 = smov 128   ;;  %s7322_s29 = smov 8  }
  0x19   :  { %24 = dma.hbm_to_vmem [thread:$0]  %s10061_s0, 4096, %s19_s26, [#allocation3], %s7321_s28, %s7321_s28, %s7322_s29  }
  0x1a   :  { %s7323_s1 = smov [#allocation7]  }
  0x1b   :  { %s44_s7 = sshll.u32 %s7323_s1, 4  ;;  %s45_s7 = int_to_ptr.vmem [resolvable:$true] %s44_s7 }
  0x1c   :  { %s7279_s8 = scalar_lea.vmem %s45_s7, 2048  ;;  %p7284_p11 = scmp.lt.s32.totalorder %s45_s7, %s45_s7 }
  0x1d   :  { %p7280_p10 = scmp.ne.s32.totalorder %s45_s7, %s7279_s8  ;;  %p7285_p12 = scmp.lt.s32.totalorder %s7279_s8, %s7279_s8 }
  0x1f   :  { %p7286_p13 = por %p7285_p12, %p7284_p11 }
  0x21   :  { %p7287_p0 = pnand %p7286_p13, %p7280_p10 }
  0x23   :  { %7290 = shalt.err (!%p7287_p0)
}
  0x24   :  { %50 = dma.hbm_to_vmem [thread:$0]  %s10064_s3, 2048, %s45_s7, [#allocation6], %s7321_s28, %s7321_s28, %s7322_s29  }
  0x25   :  { %7311 = dma.done.wait [#allocation3], 4096  }
  0x26   :  { %7312 = vsyncadd [#allocation3], 4294963200 }
  0x27   :  { %7313 = dma.done.wait [#allocation6], 8192  }
  0x28   :  { %7314 = vsyncadd [#allocation6], 4294959104  ;;  %v7324_v0 = vmov 0   ;;  %v138_v1 = vld [vmem:[#allocation5 + $0x158] sm:$0xff]  ;;  %v141_v2 = vld [vmem:[#allocation5 + $0x170] sm:$0xff]  ;;  %vm686_vm0 = vcmask 261120  }
  0x29   :  { %232 = vmatprep.mubr.bf16.mxu0 %v7324_v0  ;;  %v137_v3 = vld [vmem:[#allocation5 + $0x150] sm:$0xff]  ;;  %v165_v4 = vpack.c.bf16 %v141_v2, %v138_v1  ;;  %v140_v5 = vld [vmem:[#allocation5 + $0x168] sm:$0xff]  ;;  %v135_v7 = vld [vmem:[#allocation5 + $0x140] sm:$0xff]  ;;  %s7327_s11 = smov 64   ;;  %s7328_s12 = smov 32  }
  0x2a   :  { %v132_v6 = vld [vmem:[#allocation5 + $0x128] sm:$0xff]  ;;  %v164_v8 = vpack.c.bf16 %v140_v5, %v137_v3  ;;  %v131_v10 = vld [vmem:[#allocation5 + $0x120] sm:$0xff]  ;;  %v134_v11 = vld [vmem:[#allocation5 + $0x138] sm:$0xff] }
  0x2b   :  { %v162_v9 = vpack.c.bf16 %v135_v7, %v132_v6  ;;  %v126_v12 = vld [vmem:[#allocation5 + $0xf8] sm:$0xff]  ;;  %200 = vmatprep.subr.bf16.mxu0 %v165_v4  ;;  %v129_v13 = vld [vmem:[#allocation5 + $0x110] sm:$0xff]  ;;  %v161_v14 = vpack.c.bf16 %v134_v11, %v131_v10  ;;  %v128_v17 = vld [vmem:[#allocation5 + $0x108] sm:$0xff] }
  0x2c   :  { %201 = vmatpush1.bf16.msra.mxu0 %v164_v8  ;;  %v159_v15 = vpack.c.bf16 %v129_v13, %v126_v12  ;;  %v125_v16 = vld [vmem:[#allocation5 + $0xf0] sm:$0xff]  ;;  %v120_v18 = vld [vmem:[#allocation5 + $0xc8] sm:$0xff]  ;;  %v123_v19 = vld [vmem:[#allocation5 + $0xe0] sm:$0xff] }
  0x2d   :  { %202 = vmatprep.subr.bf16.mxu0 %v162_v9  ;;  %v158_v20 = vpack.c.bf16 %v128_v17, %v125_v16  ;;  %v156_v21 = vpack.c.bf16 %v123_v19, %v120_v18  ;;  %v119_v22 = vld [vmem:[#allocation5 + $0xc0] sm:$0xff]  ;;  %v122_v23 = vld [vmem:[#allocation5 + $0xd8] sm:$0xff]  ;;  %v117_v25 = vld [vmem:[#allocation5 + $0xb0] sm:$0xff] }
  0x2e   :  { %v114_v24 = vld [vmem:[#allocation5 + $0x98] sm:$0xff]  ;;  %v63_v26 = vld [vmem:[#allocation2] sm:$0xff]  ;;  %v64_v27 = vld [vmem:[#allocation2 + $0x8] sm:$0xff]  ;;  %v155_v28 = vpack.c.bf16 %v122_v23, %v119_v22 }
  0x2f   :  { %v167_v29 = vpack.c.bf16 %v64_v27, %v63_v26  ;;  %v153_v30 = vpack.c.bf16 %v117_v25, %v114_v24  ;;  %v113_v31 = vld [vmem:[#allocation5 + $0x90] sm:$0xff]  ;;  %v116_v32 = vld [vmem:[#allocation5 + $0xa8] sm:$0xff]  ;;  %v111_v34 = vld [vmem:[#allocation5 + $0x80] sm:$0xff] }
  0x30   :  { %203 = vmatpush1.bf16.msra.mxu0 %v161_v14  ;;  %v108_v33 = vld [vmem:[#allocation5 + $0x68] sm:$0xff]  ;;  %v107_v35 = vld [vmem:[#allocation5 + $0x60] sm:$0xff]  ;;  %v152_v36 = vpack.c.bf16 %v116_v32, %v113_v31  ;;  %v142_v38 = vld [vmem:[#allocation5 + $0x178] sm:$0xff] }
  0x31   :  { %204 = vmatprep.subr.bf16.mxu0 %v159_v15  ;;  %5937 = vmatprep.mubr.bf16.mxu1 %v167_v29  ;;  %v139_v37 = vld [vmem:[#allocation5 + $0x160] sm:$0xff]  ;;  %v133_v39 = vld [vmem:[#allocation5 + $0x130] sm:$0xff]  ;;  %v150_v40 = vpack.c.bf16 %v111_v34, %v108_v33  ;;  %v110_v41 = vld [vmem:[#allocation5 + $0x78] sm:$0xff] }
  0x32   :  { %v102_v42 = vld [vmem:[#allocation5 + $0x38] sm:$0xff]  ;;  %v166_v43 = vpack.c.bf16 %v142_v38, %v139_v37  ;;  %v136_v44 = vld [vmem:[#allocation5 + $0x148] sm:$0xff]  ;;  %v105_v45 = vld [vmem:[#allocation5 + $0x50] sm:$0xff]  ;;  %v149_v49 = vpack.c.bf16 %v110_v41, %v107_v35 }
  0x33   :  { %v163_v46 = vpack.c.bf16 %v136_v44, %v133_v39  ;;  %v127_v47 = vld [vmem:[#allocation5 + $0x100] sm:$0xff]  ;;  %v130_v48 = vld [vmem:[#allocation5 + $0x118] sm:$0xff]  ;;  %v147_v50 = vpack.c.bf16 %v105_v45, %v102_v42  ;;  %v101_v51 = vld [vmem:[#allocation5 + $0x30] sm:$0xff] }
  0x34   :  { %205 = vmatpush1.bf16.msra.mxu0 %v158_v20  ;;  %5921 = vmatprep.subr.bf16.mxu1 %v166_v43  ;;  %v104_v52 = vld [vmem:[#allocation5 + $0x48] sm:$0xff]  ;;  %v160_v54 = vpack.c.bf16 %v130_v48, %v127_v47  ;;  %v99_v55 = vld [vmem:[#allocation5 + $0x20] sm:$0xff]  ;;  %v121_v56 = vld [vmem:[#allocation5 + $0xd0] sm:$0xff] }
  0x35   :  { %206 = vmatprep.subr.bf16.mxu0 %v156_v21  ;;  %5922 = vmatpush3.bf16.msra.mxu1 %v166_v43  ;;  %v96_v53 = vld [vmem:[#allocation5 + $0x8] sm:$0xff]  ;;  %v146_v58 = vpack.c.bf16 %v104_v52, %v101_v51  ;;  %v95_v60 = vld [vmem:[#allocation5] sm:$0xff]  ;;  %v98_v61 = vld [vmem:[#allocation5 + $0x18] sm:$0xff] }
  0x36   :  { %5923 = vmatprep.subr.bf16.mxu1 %v163_v46  ;;  %v124_v57 = vld [vmem:[#allocation5 + $0xe8] sm:$0xff]  ;;  %v144_v59 = vpack.c.bf16 %v99_v55, %v96_v53  ;;  %v115_v63 = vld [vmem:[#allocation5 + $0xa0] sm:$0xff]  ;;  %v118_v1 = vld [vmem:[#allocation5 + $0xb8] sm:$0xff]  ;;  %v143_v2 = vpack.c.bf16 %v98_v61, %v95_v60 }
  0x37   :  { %v157_v62 = vpack.c.bf16 %v124_v57, %v121_v56  ;;  %v154_v3 = vpack.c.bf16 %v118_v1, %v115_v63  ;;  %v109_v4 = vld [vmem:[#allocation5 + $0x70] sm:$0xff]  ;;  %v112_v5 = vld [vmem:[#allocation5 + $0x88] sm:$0xff]  ;;  %v103_v7 = vld [vmem:[#allocation5 + $0x40] sm:$0xff] }
  0x38   :  { %207 = vmatpush1.bf16.msra.mxu0 %v155_v28  ;;  %v151_v6 = vpack.c.bf16 %v112_v5, %v109_v4  ;;  %v106_v8 = vld [vmem:[#allocation5 + $0x58] sm:$0xff]  ;;  %v65_v9 = vld [vmem:[#allocation2 + $0x10] sm:$0xff]  ;;  %v100_v13 = vld [vmem:[#allocation5 + $0x28] sm:$0xff] }
  0x39   :  { %208 = vmatprep.subr.bf16.mxu0 %v153_v30  ;;  %5924 = vmatpush3.bf16.msra.mxu1 %v163_v46  ;;  %v66_v10 = vld [vmem:[#allocation2 + $0x18] sm:$0xff]  ;;  %v148_v11 = vpack.c.bf16 %v106_v8, %v103_v7  ;;  %v97_v12 = vld [vmem:[#allocation5 + $0x10] sm:$0xff]  ;;  %v67_v16 = vld [vmem:[#allocation2 + $0x20] sm:$0xff] }
  0x3a   :  { %5925 = vmatprep.subr.bf16.mxu1 %v160_v54  ;;  %v168_v14 = vpack.c.bf16 %v66_v10, %v65_v9  ;;  %v145_v15 = vpack.c.bf16 %v100_v13, %v97_v12  ;;  %v68_v17 = vld [vmem:[#allocation2 + $0x28] sm:$0xff]  ;;  %v69_v19 = vld [vmem:[#allocation2 + $0x30] sm:$0xff]  ;;  %v70_v20 = vld [vmem:[#allocation2 + $0x38] sm:$0xff] }
  0x3b   :  { %v169_v18 = vpack.c.bf16 %v68_v17, %v67_v16  ;;  %v170_v21 = vpack.c.bf16 %v70_v20, %v69_v19  ;;  %v71_v22 = vld [vmem:[#allocation2 + $0x40] sm:$0xff]  ;;  %v72_v23 = vld [vmem:[#allocation2 + $0x48] sm:$0xff]  ;;  %v73_v25 = vld [vmem:[#allocation2 + $0x50] sm:$0xff] }
  0x3c   :  { %209 = vmatpush1.bf16.msra.mxu0 %v152_v36  ;;  %v171_v24 = vpack.c.bf16 %v72_v23, %v71_v22  ;;  %v74_v26 = vld [vmem:[#allocation2 + $0x58] sm:$0xff]  ;;  %v75_v27 = vld [vmem:[#allocation2 + $0x60] sm:$0xff]  ;;  %v76_v28 = vld [vmem:[#allocation2 + $0x68] sm:$0xff] }
  0x3d   :  { %210 = vmatprep.subr.bf16.mxu0 %v150_v40  ;;  %5926 = vmatpush3.bf16.msra.mxu1 %v160_v54  ;;  %v173_v30 = vpack.c.bf16 %v76_v28, %v75_v27  ;;  %v79_v31 = vld [vmem:[#allocation2 + $0x80] sm:$0xff]  ;;  %v80_v32 = vld [vmem:[#allocation2 + $0x88] sm:$0xff]  ;;  %v77_v33 = vld [vmem:[#allocation2 + $0x70] sm:$0xff] }
  0x3e   :  { %5927 = vmatprep.subr.bf16.mxu1 %v157_v62  ;;  %v78_v34 = vld [vmem:[#allocation2 + $0x78] sm:$0xff]  ;;  %v175_v35 = vpack.c.bf16 %v80_v32, %v79_v31  ;;  %v81_v37 = vld [vmem:[#allocation2 + $0x90] sm:$0xff]  ;;  %v83_v39 = vld [vmem:[#allocation2 + $0xa0] sm:$0xff] }
  0x3f   :  { %v174_v36 = vpack.c.bf16 %v78_v34, %v77_v33  ;;  %v82_v38 = vld [vmem:[#allocation2 + $0x98] sm:$0xff]  ;;  %v84_v40 = vld [vmem:[#allocation2 + $0xa8] sm:$0xff]  ;;  %v85_v43 = vld [vmem:[#allocation2 + $0xb0] sm:$0xff] }
  0x40   :  { %211 = vmatpush1.bf16.msra.mxu0 %v149_v49  ;;  %v176_v41 = vpack.c.bf16 %v82_v38, %v81_v37  ;;  %v177_v42 = vpack.c.bf16 %v84_v40, %v83_v39  ;;  %v86_v44 = vld [vmem:[#allocation2 + $0xb8] sm:$0xff]  ;;  %v87_v46 = vld [vmem:[#allocation2 + $0xc0] sm:$0xff]  ;;  %v88_v47 = vld [vmem:[#allocation2 + $0xc8] sm:$0xff] }
  0x41   :  { %212 = vmatprep.subr.bf16.mxu0 %v147_v50  ;;  %5928 = vmatpush3.bf16.msra.mxu1 %v157_v62  ;;  %v178_v45 = vpack.c.bf16 %v86_v44, %v85_v43  ;;  %v179_v48 = vpack.c.bf16 %v88_v47, %v87_v46  ;;  %v89_v49 = vld [vmem:[#allocation2 + $0xd0] sm:$0xff]  ;;  %v90_v50 = vld [vmem:[#allocation2 + $0xd8] sm:$0xff]  ;;  %v91_v52 = vld [vmem:[#allocation2 + $0xe0] sm:$0xff] }
  0x42   :  { %5929 = vmatprep.subr.bf16.mxu1 %v154_v3  ;;  %v180_v51 = vpack.c.bf16 %v90_v50, %v89_v49  ;;  %v92_v53 = vld [vmem:[#allocation2 + $0xe8] sm:$0xff]  ;;  %v93_v55 = vld [vmem:[#allocation2 + $0xf0] sm:$0xff]  ;;  %v94_v56 = vld [vmem:[#allocation2 + $0xf8] sm:$0xff] }
  0x43   :  { %v181_v54 = vpack.c.bf16 %v92_v53, %v91_v52  ;;  %v182_v57 = vpack.c.bf16 %v94_v56, %v93_v55  ;;  %v7398_v61 = vld [vmem:[%s10063_s2] sm:$0x7]  ;;  %s7325_s2 = smov 96  }
  0x44   :  { %213 = vmatpush1.bf16.msra.mxu0 %v146_v58  ;;  %v10067_v58 = vlaneseq }
  0x45   :  { %214 = vmatprep.subr.bf16.mxu0 %v144_v59  ;;  %5930 = vmatpush3.bf16.msra.mxu1 %v154_v3 }
  0x46   :  { %5931 = vmatprep.subr.bf16.mxu1 %v151_v6  ;;  %v7392_v59 = vshrl.u32 %v10067_v58, 7 }
  0x48   :  { %215 = vmatpush1.bf16.msra.mxu0 %v143_v2  ;;  %v187_v60 = vsub.s32 0, %v7392_v59 }
  0x49   :  { %5932 = vmatpush3.bf16.msra.mxu1 %v151_v6 }
  0x4a   :  { %5933 = vmatprep.subr.bf16.mxu1 %v148_v11  ;;  %v7401_v62 = vrot.slane %v7398_v61, %v187_v60 }
  0x4b   :  { %233 = vmatmul.mubr.bf16.vlgmr.msra.gmra.mxu0 %v167_v29  ;;  %v172_v29 = vpack.c.bf16 %v74_v26, %v73_v25  ;;  %v191_v25 = vsub.s32 1, %v7392_v59 }
  0x4c   :  { %242 = vmatprep.mubr.bf16.mxu0 %v7324_v0 }
  0x4d   :  { %5934 = vmatpush3.bf16.msra.mxu1 %v148_v11  ;;  %v7425_v28 = vrot.slane %v7398_v61, %v191_v25 }
  0x4e   :  { %5935 = vmatprep.subr.bf16.mxu1 %v145_v15 }
  0x4f   :  { %10202 = vst [vmem:[#allocation13_spill] sm:$0xff] %v7425_v28 }
  0x51   :  { %5936 = vmatpush3.bf16.msra.mxu1 %v145_v15 }
  0x53   :  { %243 = vmatmul.mubr.bf16.gmra.mxu0 %v168_v14 }
  0x54   :  { %252 = vmatprep.mubr.bf16.mxu0 %v7324_v0  ;;  %5938 = vmatmul.mubr.bf16.vlgmr.msra.gmra.mxu1 %v168_v14 }
  0x55   :  { %5941 = vmatprep.mubr.bf16.mxu1 %v169_v18 }
  0x5b   :  { %253 = vmatmul.mubr.bf16.gmra.mxu0 %v169_v18 }
  0x5c   :  { %262 = vmatprep.mubr.bf16.mxu0 %v7324_v0  ;;  %5942 = vmatmul.mubr.bf16.gmra.mxu1 %v170_v21 }
  0x5d   :  { %5945 = vmatprep.mubr.bf16.mxu1 %v171_v24 }
  0x63   :  { %263 = vmatmul.mubr.bf16.gmra.mxu0 %v170_v21 }
  0x64   :  { %272 = vmatprep.mubr.bf16.mxu0 %v7324_v0  ;;  %5946 = vmatmul.mubr.bf16.gmra.mxu1 %v172_v29 }
  0x65   :  { %5949 = vmatprep.mubr.bf16.mxu1 %v173_v30 }
  0x6b   :  { %273 = vmatmul.mubr.bf16.gmra.mxu0 %v171_v24 }
  0x6c   :  { %282 = vmatprep.mubr.bf16.mxu0 %v7324_v0  ;;  %5950 = vmatmul.mubr.bf16.gmra.mxu1 %v174_v36 }
  0x6d   :  { %5953 = vmatprep.mubr.bf16.mxu1 %v175_v35 }
  0x73   :  { %283 = vmatmul.mubr.bf16.gmra.mxu0 %v172_v29 }
  0x74   :  { %292 = vmatprep.mubr.bf16.mxu0 %v7324_v0  ;;  %5954 = vmatmul.mubr.bf16.gmra.mxu1 %v176_v41 }
  0x75   :  { %5957 = vmatprep.mubr.bf16.mxu1 %v177_v42 }
  0x7b   :  { %293 = vmatmul.mubr.bf16.gmra.mxu0 %v173_v30 }
  0x7c   :  { %302 = vmatprep.mubr.bf16.mxu0 %v7324_v0  ;;  %5958 = vmatmul.mubr.bf16.gmra.mxu1 %v178_v45 }
  0x7d   :  { %5961 = vmatprep.mubr.bf16.mxu1 %v179_v48 }
  0x83   :  { %303 = vmatmul.mubr.bf16.gmra.mxu0 %v174_v36 }
  0x84   :  { %312 = vmatprep.mubr.bf16.mxu0 %v7324_v0  ;;  %5962 = vmatmul.mubr.bf16.gmra.mxu1 %v180_v51 }
  0x85   :  { %5965 = vmatprep.mubr.bf16.mxu1 %v181_v54 }
  0x8b   :  { %313 = vmatmul.mubr.bf16.gmra.mxu0 %v175_v35 }
  0x8c   :  { %322 = vmatprep.mubr.bf16.mxu0 %v7324_v0  ;;  %5966 = vmatmul.mubr.bf16.gmra.mxu1 %v182_v57 }
  0x93   :  { %323 = vmatmul.mubr.bf16.gmra.mxu0 %v176_v41 }
  0x94   :  { %332 = vmatprep.mubr.bf16.mxu0 %v7324_v0 }
  0x9b   :  { %333 = vmatmul.mubr.bf16.gmra.mxu0 %v177_v42 }
  0x9c   :  { %342 = vmatprep.mubr.bf16.mxu0 %v7324_v0 }
  0xa3   :  { %343 = vmatmul.mubr.bf16.gmra.mxu0 %v178_v45 }
  0xa4   :  { %352 = vmatprep.mubr.bf16.mxu0 %v7324_v0 }
  0xab   :  { %353 = vmatmul.mubr.bf16.gmra.mxu0 %v179_v48 }
  0xac   :  { %362 = vmatprep.mubr.bf16.mxu0 %v7324_v0 }
  0xb3   :  { %363 = vmatmul.mubr.bf16.gmra.mxu0 %v180_v51 }
  0xb4   :  { %372 = vmatprep.mubr.bf16.mxu0 %v7324_v0 }
  0xbb   :  { %373 = vmatmul.mubr.bf16.gmra.mxu0 %v181_v54 }
  0xbc   :  { %382 = vmatprep.mubr.bf16.mxu0 %v7324_v0 }
  0xc3   :  { %383 = vmatmul.mubr.bf16.gmra.mxu0 %v182_v57 }
 0x10b   :  { %v234_v63 = vpop.f32.mrf.mxu0 }
 0x10c   :  { %v235_v2 = vadd.f32 %v234_v63, %v7401_v62 }
 0x10d   :  { %v236_v1 = vpop.f32.mrf.mxu0 }
 0x10e   :  { %v554_v5 = vmul.f32 0.17677669, %v235_v2  ;;  %v237_v47 = vadd.f32 %v236_v1, %v7425_v28 }
 0x10f   :  { %v238_v0 = vpop.f32.mrf.mxu0 }
 0x110   :  { %v239_v3 = vadd.f32 %v238_v0, %v7401_v62 }
 0x111   :  { %v240_v4 = vpop.f32.mrf.mxu0 }
 0x112   :  { %v555_v6 = vmul.f32 0.17677669, %v239_v3  ;;  %v241_v43 = vadd.f32 %v240_v4, %v7425_v28 }
 0x113   :  { %v244_v7 = vpop.f32.mrf.mxu0 }
 0x114   :  { %v7405_v8 = vpack.c.bf16 %v555_v6, %v554_v5  ;;  %v245_v48 = vadd.f32 %v244_v7, %v7401_v62  ;;  %v7453_v50 = vpack.c.bf16 %v241_v43, %v237_v47 }
 0x115   :  { %v7407_v9 = vpop.f32.mrf.mxu0 }
 0x116   :  { %10201 = vst [vmem:[#allocation12_spill] sm:$0xff] %v7405_v8  ;;  %5985 = vmatprep.mubr.msk.bf16.mxu1 %vm686_vm0, %v7405_v8  ;;  %10204 = vst [vmem:[#allocation15_spill] sm:$0xff] %v7453_v50  ;;  %v556_v57 = vmul.f32 0.17677669, %v245_v48 }
 0x117   :  { %v248_v10 = vpop.f32.mrf.mxu0 }
 0x118   :  { %v249_v45 = vadd.f32 %v248_v10, %v7401_v62 }
 0x119   :  { %v7411_v11 = vpop.f32.mrf.mxu0 }
 0x11a   :  { %v557_v51 = vmul.f32 0.17677669, %v249_v45 }
 0x11b   :  { %v7413_v12 = vpop.f32.mrf.mxu0 }
 0x11c   :  { %v7465_v2 = vpack.c.bf16 %v557_v51, %v556_v57  ;;  %v7564_v51 = vpop.f32.mrf.mxu1 }
 0x11d   :  { %v256_v13 = vpop.f32.mrf.mxu0 }
 0x11e   :  { %v257_v41 = vadd.f32 %v256_v13, %v7425_v28  ;;  %10205 = vst [vmem:[#allocation16_spill] sm:$0xff] %v7465_v2 }
 0x11f   :  { %v7415_v14 = vpop.f32.mrf.mxu0 }
 0x121   :  { %v260_v15 = vpop.f32.mrf.mxu0 }
 0x122   :  { %v261_v38 = vadd.f32 %v260_v15, %v7425_v28 }
 0x123   :  { %v264_v16 = vpop.f32.mrf.mxu0 }
 0x124   :  { %v7446_v44 = vpack.c.bf16 %v261_v38, %v257_v41  ;;  %v265_v60 = vadd.f32 %v264_v16, %v7401_v62 }
 0x125   :  { %v7417_v17 = vpop.f32.mrf.mxu0 }
 0x126   :  { %10203 = vst [vmem:[#allocation14_spill] sm:$0xff] %v7446_v44  ;;  %v560_v6 = vmul.f32 0.17677669, %v265_v60  ;;  %v718_v47 = vsel %vm686_vm0, %v7446_v44, 0 }
 0x127   :  { %v268_v18 = vpop.f32.mrf.mxu0 }
 0x128   :  { %v269_v52 = vadd.f32 %v268_v18, %v7401_v62  ;;  %v267_v18 = vadd.f32 %v7417_v17, %v7425_v28  ;;  %v247_v17 = vadd.f32 %v7407_v9, %v7425_v28 }
 0x129   :  { %v270_v19 = vpop.f32.mrf.mxu0 }
 0x12a   :  { %v561_v0 = vmul.f32 0.17677669, %v269_v52  ;;  %v271_v10 = vadd.f32 %v270_v19, %v7425_v28  ;;  %v251_v19 = vadd.f32 %v7411_v11, %v7425_v28  ;;  %v7566_v52 = vpop.f32.mrf.mxu1 }
 0x12b   :  { %v7419_v20 = vpop.f32.mrf.mxu0 }
 0x12c   :  { %v7482_v13 = vpack.c.bf16 %v561_v0, %v560_v6  ;;  %v7506_v11 = vpack.c.bf16 %v251_v19, %v247_v17 }
 0x12d   :  { %v276_v21 = vpop.f32.mrf.mxu0 }
 0x12e   :  { %v277_v36 = vadd.f32 %v276_v21, %v7425_v28  ;;  %10207 = vst [vmem:[#allocation18_spill] sm:$0xff] %v7482_v13  ;;  %10210 = vst [vmem:[#allocation21_spill] sm:$0xff] %v7506_v11  ;;  %v715_v48 = vsel %vm686_vm0, %v7506_v11, 0 }
 0x12f   :  { %v7421_v22 = vpop.f32.mrf.mxu0 }
 0x131   :  { %v280_v23 = vpop.f32.mrf.mxu0 }
 0x132   :  { %v281_v33 = vadd.f32 %v280_v23, %v7425_v28 }
 0x133   :  { %v284_v24 = vpop.f32.mrf.mxu0 }
 0x134   :  { %v7440_v39 = vpack.c.bf16 %v281_v33, %v277_v36  ;;  %v285_v7 = vadd.f32 %v284_v24, %v7401_v62  ;;  %v7494_v24 = vpack.c.bf16 %v271_v10, %v267_v18 }
 0x135   :  { %v286_v26 = vpop.f32.mrf.mxu0 }
 0x136   :  { %v287_v30 = vadd.f32 %v286_v26, %v7425_v28  ;;  %v564_v21 = vmul.f32 0.17677669, %v285_v7  ;;  %10208 = vst [vmem:[#allocation19_spill] sm:$0xff] %v7494_v24 }
 0x137   :  { %v288_v27 = vpop.f32.mrf.mxu0 }
 0x138   :  { %v289_v3 = vadd.f32 %v288_v27, %v7401_v62 }
 0x139   :  { %v290_v29 = vpop.f32.mrf.mxu0 }
 0x13a   :  { %v291_v31 = vadd.f32 %v290_v29, %v7425_v28  ;;  %v565_v15 = vmul.f32 0.17677669, %v289_v3  ;;  %v195_v3 = vsub.s32 2, %v7392_v59 }
 0x13b   :  { %v7429_v32 = vpop.f32.mrf.mxu0 }
 0x13c   :  { %v7432_v34 = vpack.c.bf16 %v291_v31, %v287_v30  ;;  %v7496_v25 = vpack.c.bf16 %v565_v15, %v564_v21  ;;  %v259_v30 = vadd.f32 %v7415_v14, %v7401_v62  ;;  %v255_v31 = vadd.f32 %v7413_v12, %v7401_v62 }
 0x13d   :  { %v296_v35 = vpop.f32.mrf.mxu0  ;;  %v275_v14 = vadd.f32 %v7419_v20, %v7401_v62  ;;  %v295_v20 = vadd.f32 %v7429_v32, %v7401_v62  ;;  %v721_v32 = vsel %vm686_vm0, %v7494_v24, 0  ;;  %v7586_v7 = vrot.slane %v7398_v61, %v195_v3 }
 0x13e   :  { %1131 = vrot.lane.b32.xlu1 %v7432_v34, %s7325_s2  ;;  %v297_v63 = vadd.f32 %v296_v35, %v7425_v28  ;;  %10209 = vst [vmem:[#allocation20_spill] sm:$0xff] %v7496_v25  ;;  %v559_v33 = vmul.f32 0.17677669, %v259_v30  ;;  %v279_v35 = vadd.f32 %v7421_v22, %v7401_v62  ;;  %v558_v36 = vmul.f32 0.17677669, %v255_v31 }
 0x13f   :  { %v7437_v37 = vpop.f32.mrf.mxu0  ;;  %v727_v12 = vsel %vm686_vm0, %v7432_v34, 0  ;;  %v562_v22 = vmul.f32 0.17677669, %v275_v14  ;;  %v566_v45 = vmul.f32 0.17677669, %v295_v20 }
 0x140   :  { %v7528_v38 = vpack.c.bf16 %v559_v33, %v558_v36  ;;  %v299_v41 = vadd.f32 %v7437_v37, %v7401_v62  ;;  %v724_v37 = vsel %vm686_vm0, %v7440_v39, 0 }
 0x141   :  { %v300_v40 = vpop.f32.mrf.mxu0 }
 0x142   :  { %1129 = vrot.lane.b32.xlu1 %v7440_v39, %s7325_s2  ;;  %v301_v54 = vadd.f32 %v300_v40, %v7425_v28  ;;  %10212 = vst [vmem:[#allocation23_spill] sm:$0xff] %v7528_v38  ;;  %v563_v40 = vmul.f32 0.17677669, %v279_v35  ;;  %v567_v43 = vmul.f32 0.17677669, %v299_v41 }
 0x143   :  { %v304_v42 = vpop.f32.mrf.mxu0 }
 0x144   :  { %v7468_v4 = vpack.c.bf16 %v301_v54, %v297_v63  ;;  %v305_v23 = vadd.f32 %v304_v42, %v7401_v62  ;;  %v7538_v42 = vpack.c.bf16 %v563_v40, %v562_v22 }
 0x145   :  { %v306_v46 = vpop.f32.mrf.mxu0 }
 0x146   :  { %1125 = vrot.lane.b32.xlu1 %v7446_v44, %s7325_s2  ;;  %v307_v55 = vadd.f32 %v306_v46, %v7425_v28  ;;  %10206 = vst [vmem:[#allocation17_spill] sm:$0xff] %v7468_v4  ;;  %v730_v27 = vsel %vm686_vm0, %v7468_v4, 0  ;;  %v568_v29 = vmul.f32 0.17677669, %v305_v23  ;;  %10213 = vst [vmem:[#allocation24_spill] sm:$0xff] %v7538_v42  ;;  %v7544_v46 = vpack.c.bf16 %v567_v43, %v566_v45 }
 0x147   :  { %v308_v49 = vpop.f32.mrf.mxu0 }
 0x148   :  { %v309_v16 = vadd.f32 %v308_v49, %v7401_v62  ;;  %10214 = vst [vmem:[#allocation25_spill] sm:$0xff] %v7544_v46  ;;  %v712_v49 = vsel %vm686_vm0, %v7453_v50, 0 }
 0x149   :  { %v310_v53 = vpop.f32.mrf.mxu0 }
 0x14a   :  { %v311_v56 = vadd.f32 %v310_v53, %v7425_v28  ;;  %1121 = vrot.lane.b32.xlu1 %v7453_v50, %s7325_s2  ;;  %v569_v26 = vmul.f32 0.17677669, %v309_v16  ;;  %v7572_v53 = vpop.f32.mrf.mxu1 }
 0x14c   :  { %v7463_v1 = vpack.c.bf16 %v311_v56, %v307_v55  ;;  %v7512_v9 = vpack.c.bf16 %v569_v26, %v568_v29  ;;  %v7574_v54 = vpop.f32.mrf.mxu1 }
 0x14e   :  { %1135 = vrot.lane.b32.xlu0 %v7463_v1, %s7325_s2  ;;  %6641 = vmatprep.subr.msk.bf16.mxu1 %vm686_vm0, %v7463_v1  ;;  %v733_v5 = vsel %vm686_vm0, %v7463_v1, 0  ;;  %10211 = vst [vmem:[#allocation22_spill] sm:$0xff] %v7512_v9  ;;  %v5943_v55 = vpop.f32.mrf.mxu1 }
 0x14f   :  { %1099 = vrot.lane.b32.xlu1 %v7465_v2, %s7325_s2  ;;  %5970 = vmatpush3.bf16.xpose.msra.mxu1 %v733_v5  ;;  %v452_v22 = vadd.f32 %v5943_v55, %v7586_v7 }
 0x150   :  { %6642 = vmatprep.subr.msk.bf16.mxu1 %vm686_vm0, %v7468_v4  ;;  %v443_v56 = vpop.f32.mrf.mxu1 }
 0x151   :  { %v444_v55 = vadd.f32 %v443_v56, %v7586_v7  ;;  %v439_v56 = vadd.f32 %v7572_v53, %v7586_v7  ;;  %v428_v53 = vadd.f32 %v7566_v52, %v7586_v7 }
 0x152   :  { %1133 = vrot.lane.b32.xlu0 %v7468_v4, %s7325_s2  ;;  %v5944_v57 = vpop.f32.mrf.mxu1 }
 0x153   :  { %1103 = vrot.lane.b32.xlu1 %v7482_v13, %s7325_s2  ;;  %v455_v43 = vadd.f32 %v5944_v57, %v7586_v7 }
 0x154   :  { %v446_v60 = vpop.f32.mrf.mxu1 }
 0x155   :  { %v447_v57 = vadd.f32 %v446_v60, %v7586_v7 }
 0x156   :  { %1127 = vrot.lane.b32.xlu0 %v7494_v24, %s7325_s2  ;;  %v5947_v63 = vpop.f32.mrf.mxu1 }
 0x157   :  { %1107 = vrot.lane.b32.xlu1 %v7496_v25, %s7325_s2  ;;  %5972 = vmatpush3.bf16.xpose.msra.mxu1 %v730_v27  ;;  %v468_v26 = vadd.f32 %v5947_v63, %v7586_v7 }
 0x158   :  { %6643 = vmatprep.subr.msk.bf16.mxu1 %vm686_vm0, %v7432_v34  ;;  %v459_v0 = vpop.f32.mrf.mxu1 }
 0x159   :  { %v460_v35 = vadd.f32 %v459_v0, %v7586_v7  ;;  %v7626_v0 = vpack.c.bf16 %v455_v43, %v452_v22 }
 0x15a   :  { %1123 = vrot.lane.b32.xlu0 %v7506_v11, %s7325_s2  ;;  %v5948_v5 = vpop.f32.mrf.mxu1 }
 0x15b   :  { %1111 = vrot.lane.b32.xlu1 %v7512_v9, %s7325_s2  ;;  %v471_v17 = vadd.f32 %v5948_v5, %v7586_v7  ;;  %10220 = vst [vmem:[#allocation31_spill] sm:$0xff] %v7626_v0 }
 0x15c   :  { %v462_v6 = vpop.f32.mrf.mxu1 }
 0x15d   :  { %v7606_v36 = vpack.c.bf16 %v471_v17, %v468_v26  ;;  %v463_v14 = vadd.f32 %v462_v6, %v7586_v7 }
 0x15e   :  { %1097 = vrot.lane.b32.xlu0 %v7405_v8, %s7325_s2  ;;  %v5951_v10 = vpop.f32.mrf.mxu1 }
 0x15f   :  { %5974 = vmatpush3.bf16.xpose.msra.mxu1 %v727_v12  ;;  %v484_v16 = vadd.f32 %v5951_v10, %v7586_v7  ;;  %v7615_v45 = vpack.c.bf16 %v463_v14, %v460_v35  ;;  %v436_v10 = vadd.f32 %v7564_v51, %v7586_v7 }
 0x160   :  { %6644 = vmatprep.subr.msk.bf16.mxu1 %vm686_vm0, %v7440_v39  ;;  %v475_v15 = vpop.f32.mrf.mxu1 }
 0x161   :  { %v476_v21 = vadd.f32 %v475_v15, %v7586_v7  ;;  %10217 = vst [vmem:[#allocation28_spill] sm:$0xff] %v7615_v45  ;;  %v7649_v17 = vpack.c.bf16 %v439_v56, %v436_v10 }
 0x162   :  { %1101 = vrot.lane.b32.xlu0 %v7528_v38, %s7325_s2  ;;  %v5952_v18 = vpop.f32.mrf.mxu1 }
 0x163   :  { %v487_v23 = vadd.f32 %v5952_v18, %v7586_v7  ;;  %10224 = vst [vmem:[#allocation35_spill] sm:$0xff] %v7649_v17 }
 0x164   :  { %v478_v19 = vpop.f32.mrf.mxu1 }
 0x165   :  { %v7595_v27 = vpack.c.bf16 %v487_v23, %v484_v16  ;;  %v479_v61 = vadd.f32 %v478_v19, %v7586_v7  ;;  %v7637_v16 = vpack.c.bf16 %v447_v57, %v444_v55 }
 0x166   :  { %1105 = vrot.lane.b32.xlu0 %v7538_v42, %s7325_s2  ;;  %v5955_v29 = vpop.f32.mrf.mxu1 }
 0x167   :  { %5976 = vmatpush3.bf16.xpose.msra.mxu1 %v724_v37  ;;  %10215 = vst [vmem:[#allocation26_spill] sm:$0xff] %v7595_v27  ;;  %v7598_v30 = vpack.c.bf16 %v479_v61, %v476_v21  ;;  %v500_v31 = vadd.f32 %v5955_v29, %v7586_v7  ;;  %1456 = vrot.lane.b32.xlu1 %v7595_v27, %s7325_s2  ;;  %10221 = vst [vmem:[#allocation32_spill] sm:$0xff] %v7637_v16 }
 0x168   :  { %6645 = vmatprep.subr.msk.bf16.mxu1 %vm686_vm0, %v7494_v24  ;;  %v491_v33 = vpop.f32.mrf.mxu1  ;;  %v431_v61 = vadd.f32 %v7574_v54, %v7586_v7 }
 0x169   :  { %10216 = vst [vmem:[#allocation27_spill] sm:$0xff] %v7598_v30  ;;  %v492_v12 = vadd.f32 %v491_v33, %v7586_v7 }
 0x16a   :  { %1109 = vrot.lane.b32.xlu0 %v7544_v46, %s7325_s2  ;;  %v5956_v40 = vpop.f32.mrf.mxu1 }
 0x16b   :  { %v503_v41 = vadd.f32 %v5956_v40, %v7586_v7 }
 0x16c   :  { %v494_v20 = vpop.f32.mrf.mxu1 }
 0x16d   :  { %v7617_v37 = vpack.c.bf16 %v503_v41, %v500_v31 }
 0x16f   :  { %5978 = vmatpush3.bf16.xpose.msra.mxu1 %v721_v32  ;;  %10218 = vst [vmem:[#allocation29_spill] sm:$0xff] %v7617_v37  ;;  %v495_v32 = vadd.f32 %v494_v20, %v7586_v7 }
 0x170   :  { %6646 = vmatprep.subr.msk.bf16.mxu1 %vm686_vm0, %v7446_v44 }
 0x177   :  { %5980 = vmatpush3.bf16.xpose.msra.mxu1 %v718_v47  ;;  %v5959_v47 = vpop.f32.mrf.mxu1 }
 0x178   :  { %6647 = vmatprep.subr.msk.bf16.mxu1 %vm686_vm0, %v7506_v11 }
 0x179   :  { %v507_v63 = vpop.f32.mrf.mxu1 }
 0x17a   :  { %v508_v3 = vadd.f32 %v507_v63, %v7586_v7 }
 0x17b   :  { %v5960_v5 = vpop.f32.mrf.mxu1 }
 0x17c   :  { %v519_v6 = vadd.f32 %v5960_v5, %v7586_v7 }
 0x17d   :  { %v510_v15 = vpop.f32.mrf.mxu1 }
 0x17e   :  { %v511_v60 = vadd.f32 %v510_v15, %v7586_v7 }
 0x17f   :  { %5982 = vmatpush3.bf16.xpose.msra.mxu1 %v715_v48  ;;  %v7621_v48 = vpack.c.bf16 %v495_v32, %v492_v12  ;;  %v5963_v21 = vpop.f32.mrf.mxu1  ;;  %v7659_v12 = vpack.c.bf16 %v431_v61, %v428_v53  ;;  %v314_v61 = vpop.f32.mrf.mxu0 }
 0x180   :  { %6648 = vmatprep.subr.msk.bf16.mxu1 %vm686_vm0, %v7453_v50  ;;  %v7643_v23 = vpack.c.bf16 %v511_v60, %v508_v3  ;;  %v532_v19 = vadd.f32 %v5963_v21, %v7586_v7 }
 0x181   :  { %10219 = vst [vmem:[#allocation30_spill] sm:$0xff] %v7621_v48  ;;  %v523_v51 = vpop.f32.mrf.mxu1  ;;  %10225 = vst [vmem:[#allocation36_spill] sm:$0xff] %v7659_v12 }
 0x182   :  { %10223 = vst [vmem:[#allocation34_spill] sm:$0xff] %v7643_v23  ;;  %v524_v29 = vadd.f32 %v523_v51, %v7586_v7 }
 0x183   :  { %v5964_v33 = vpop.f32.mrf.mxu1 }
 0x184   :  { %v535_v35 = vadd.f32 %v5964_v33, %v7586_v7  ;;  %v7693_v33 = vpop.f32.mrf.mxu0 }
 0x185   :  { %v526_v14 = vpop.f32.mrf.mxu1  ;;  %10230 = vst [vmem:[#allocation41_spill] sm:$0xff] %v7693_v33 }
 0x186   :  { %v7661_v40 = vpack.c.bf16 %v535_v35, %v532_v19  ;;  %v527_v54 = vadd.f32 %v526_v14, %v7586_v7  ;;  %v318_v35 = vpop.f32.mrf.mxu0 }
 0x187   :  { %5984 = vmatpush3.bf16.xpose.msra.mxu1 %v712_v49  ;;  %v516_v49 = vadd.f32 %v5959_v47, %v7586_v7  ;;  %v5967_v41 = vpop.f32.mrf.mxu1 }
 0x188   :  { %6001 = vmatprep.subr.bf16.mxu1 %v7595_v27  ;;  %10226 = vst [vmem:[#allocation37_spill] sm:$0xff] %v7661_v40  ;;  %v7666_v22 = vpack.c.bf16 %v527_v54, %v524_v29  ;;  %v548_v20 = vadd.f32 %v5967_v41, %v7586_v7  ;;  %v7696_v54 = vpop.f32.mrf.mxu0 }
 0x189   :  { %v7639_v18 = vpack.c.bf16 %v519_v6, %v516_v49  ;;  %v539_v43 = vpop.f32.mrf.mxu1  ;;  %10231 = vst [vmem:[#allocation42_spill] sm:$0xff] %v7696_v54 }
 0x18a   :  { %10227 = vst [vmem:[#allocation38_spill] sm:$0xff] %v7666_v22  ;;  %v540_v47 = vadd.f32 %v539_v43, %v7586_v7  ;;  %v324_v43 = vpop.f32.mrf.mxu0 }
 0x18b   :  { %10222 = vst [vmem:[#allocation33_spill] sm:$0xff] %v7639_v18  ;;  %v5968_v63 = vpop.f32.mrf.mxu1 }
 0x18c   :  { %v551_v57 = vadd.f32 %v5968_v63, %v7586_v7 }
 0x18d   :  { %v542_v3 = vpop.f32.mrf.mxu1 }
 0x18e   :  { %5986 = vmatmul.mubr.msk.bf16.vlgmr.msra.gmra.mxu1 %vm686_vm0, %v7465_v2  ;;  %v7676_v6 = vpack.c.bf16 %v551_v57, %v548_v20  ;;  %v543_v10 = vadd.f32 %v542_v3, %v7586_v7 }
 0x18f   :  { %5989 = vmatprep.mubr.msk.bf16.mxu1 %vm686_vm0, %v7528_v38  ;;  %6002 = vmatpush3.bf16.msra.mxu1 %v7595_v27 }
 0x190   :  { %6003 = vmatprep.subr.bf16.mxu1 %v7598_v30  ;;  %10228 = vst [vmem:[#allocation39_spill] sm:$0xff] %v7676_v6  ;;  %v7679_v15 = vpack.c.bf16 %v543_v10, %v540_v47  ;;  %v325_v47 = vadd.f32 %v324_v43, %v7401_v62 }
 0x192   :  { %10229 = vst [vmem:[#allocation40_spill] sm:$0xff] %v7679_v15 }
 0x193   :  { %6004 = vmatpush3.bf16.msra.mxu1 %v7598_v30 }
 0x194   :  { %6005 = vmatprep.subr.bf16.mxu1 %v7606_v36 }
 0x196   :  { %5990 = vmatmul.mubr.msk.bf16.gmra.mxu1 %vm686_vm0, %v7482_v13 }
 0x197   :  { %5993 = vmatprep.mubr.msk.bf16.mxu1 %vm686_vm0, %v7538_v42  ;;  %6006 = vmatpush3.bf16.msra.mxu1 %v7606_v36 }
 0x198   :  { %6007 = vmatprep.subr.bf16.mxu1 %v7615_v45 }
 0x19b   :  { %6008 = vmatpush3.bf16.msra.mxu1 %v7615_v45 }
 0x19c   :  { %6009 = vmatprep.subr.bf16.mxu1 %v7626_v0 }
 0x19e   :  { %5994 = vmatmul.mubr.msk.bf16.gmra.mxu1 %vm686_vm0, %v7496_v25 }
 0x19f   :  { %5997 = vmatprep.mubr.msk.bf16.mxu1 %vm686_vm0, %v7544_v46  ;;  %6010 = vmatpush3.bf16.msra.mxu1 %v7626_v0 }
 0x1a0   :  { %6011 = vmatprep.subr.bf16.mxu1 %v7637_v16 }
 0x1a3   :  { %6012 = vmatpush3.bf16.msra.mxu1 %v7637_v16 }
 0x1a4   :  { %6013 = vmatprep.subr.bf16.mxu1 %v7649_v17 }
 0x1a6   :  { %5998 = vmatmul.mubr.msk.bf16.gmra.mxu1 %vm686_vm0, %v7512_v9 }
 0x1a7   :  { %6014 = vmatpush3.bf16.msra.mxu1 %v7649_v17 }
 0x1a8   :  { %6015 = vmatprep.subr.bf16.mxu1 %v7659_v12 }
 0x1ab   :  { %6016 = vmatpush3.bf16.msra.mxu1 %v7659_v12 }
 0x1b0   :  { %v1132_v55 = vpop.permute.xlu1 %1131 }
 0x1b1   :  { %v1177_v60 = vsel %vm686_vm0, %v1132_v55, 0 }
 0x1b4   :  { %v1130_v21 = vpop.permute.xlu1 %1129 }
 0x1b5   :  { %v1174_v19 = vsel %vm686_vm0, %v1130_v21, 0 }
 0x1c0   :  { %v1136_v26 = vpop.permute.xlu0 %1135 }
 0x1c1   :  { %6649 = vmatprep.subr.msk.bf16.mxu0 %vm686_vm0, %v1136_v26  ;;  %v1183_v31 = vsel %vm686_vm0, %v1136_v26, 0  ;;  %v1126_v26 = vpop.permute.xlu1 %1125 }
 0x1c2   :  { %6034 = vmatpush3.bf16.xpose.msra.mxu0 %v1183_v31  ;;  %v1168_v7 = vsel %vm686_vm0, %v1126_v26, 0  ;;  %v315_v31 = vadd.f32 %v314_v61, %v7401_v62 }
 0x1c4   :  { %v1134_v52 = vpop.permute.xlu0 %1133  ;;  %v570_v14 = vmul.f32 0.17677669, %v315_v31 }
 0x1c5   :  { %6650 = vmatprep.subr.msk.bf16.mxu0 %vm686_vm0, %v1134_v52  ;;  %v1180_v49 = vsel %vm686_vm0, %v1134_v52, 0  ;;  %v1122_v29 = vpop.permute.xlu1 %1121  ;;  %v319_v52 = vadd.f32 %v318_v35, %v7401_v62 }
 0x1c6   :  { %v1162_v20 = vsel %vm686_vm0, %v1122_v29, 0 }
 0x1c7   :  { %v571_v41 = vmul.f32 0.17677669, %v319_v52 }
 0x1c8   :  { %v1128_v32 = vpop.permute.xlu0 %1127 }
 0x1c9   :  { %v1171_v51 = vsel %vm686_vm0, %v1128_v32, 0 }
 0x1ca   :  { %6036 = vmatpush3.bf16.xpose.msra.mxu0 %v1180_v49  ;;  %v7702_v49 = vpop.f32.mrf.mxu0 }
 0x1cb   :  { %6651 = vmatprep.subr.msk.bf16.mxu0 %vm686_vm0, %v1132_v55  ;;  %10233 = vst [vmem:[#allocation44_spill] sm:$0xff] %v7702_v49  ;;  %v572_v55 = vmul.f32 0.17677669, %v325_v47  ;;  %v601_v49 = vadd.s32 112, %v7392_v59 }
 0x1cc   :  { %v1124_v5 = vpop.permute.xlu0 %1123  ;;  %v328_v63 = vpop.f32.mrf.mxu0 }
 0x1cd   :  { %v1165_v53 = vsel %vm686_vm0, %v1124_v5, 0  ;;  %v329_v57 = vadd.f32 %v328_v63, %v7401_v62 }
 0x1ce   :  { %v7705_v3 = vpop.f32.mrf.mxu0 }
 0x1cf   :  { %10234 = vst [vmem:[#allocation45_spill] sm:$0xff] %v7705_v3  ;;  %v573_v10 = vmul.f32 0.17677669, %v329_v57 }
 0x1d0   :  { %v1098_v56 = vpop.permute.xlu0 %1097 }
 0x1d1   :  { %6049 = vmatprep.mubr.msk.bf16.mxu0 %vm686_vm0, %v1098_v56 }
 0x1d2   :  { %6038 = vmatpush3.bf16.xpose.msra.mxu0 %v1177_v60  ;;  %v334_v60 = vpop.f32.mrf.mxu0 }
 0x1d3   :  { %6652 = vmatprep.subr.msk.bf16.mxu0 %vm686_vm0, %v1130_v21  ;;  %v7709_v21 = vpack.c.bf16 %v573_v10, %v572_v55 }
 0x1d4   :  { %v1102_v56 = vpop.permute.xlu0 %1101 }
 0x1d5   :  { %10235 = vst [vmem:[#allocation46_spill] sm:$0xff] %v7709_v21 }
 0x1d8   :  { %v1106_v35 = vpop.permute.xlu0 %1105 }
 0x1da   :  { %6040 = vmatpush3.bf16.xpose.msra.mxu0 %v1174_v19  ;;  %v335_v19 = vadd.f32 %v334_v60, %v7401_v62 }
 0x1db   :  { %6653 = vmatprep.subr.msk.bf16.mxu0 %vm686_vm0, %v1128_v32  ;;  %v7699_v32 = vpack.c.bf16 %v571_v41, %v570_v14 }
 0x1dc   :  { %v1110_v10 = vpop.permute.xlu0 %1109 }
 0x1dd   :  { %10232 = vst [vmem:[#allocation43_spill] sm:$0xff] %v7699_v32  ;;  %v602_v32 = vadd.s32 120, %v7392_v59 }
 0x1e2   :  { %6042 = vmatpush3.bf16.xpose.msra.mxu0 %v1171_v51  ;;  %v7712_v51 = vpop.f32.mrf.mxu0 }
 0x1e3   :  { %6654 = vmatprep.subr.msk.bf16.mxu0 %vm686_vm0, %v1126_v26  ;;  %10236 = vst [vmem:[#allocation47_spill] sm:$0xff] %v7712_v51 }
 0x1e4   :  { %v338_v26 = vpop.f32.mrf.mxu0 }
 0x1e6   :  { %v7715_v61 = vpop.f32.mrf.mxu0 }
 0x1e7   :  { %10237 = vst [vmem:[#allocation48_spill] sm:$0xff] %v7715_v61 }
 0x1e8   :  { %v344_v14 = vpop.f32.mrf.mxu0 }
 0x1e9   :  { %v345_v41 = vadd.f32 %v344_v14, %v7401_v62 }
 0x1ea   :  { %6044 = vmatpush3.bf16.xpose.msra.mxu0 %v1168_v7  ;;  %v574_v7 = vmul.f32 0.17677669, %v335_v19 }
 0x1eb   :  { %6655 = vmatprep.subr.msk.bf16.mxu0 %vm686_vm0, %v1124_v5  ;;  %v1100_v5 = vpop.permute.xlu1 %1099  ;;  %v576_v47 = vmul.f32 0.17677669, %v345_v41 }
 0x1f2   :  { %6046 = vmatpush3.bf16.xpose.msra.mxu0 %v1165_v53  ;;  %v339_v53 = vadd.f32 %v338_v26, %v7401_v62 }
 0x1f3   :  { %6656 = vmatprep.subr.msk.bf16.mxu0 %vm686_vm0, %v1122_v29  ;;  %v1104_v29 = vpop.permute.xlu1 %1103 }
 0x1f4   :  { %v575_v31 = vmul.f32 0.17677669, %v339_v53 }
 0x1f6   :  { %v7719_v52 = vpack.c.bf16 %v575_v31, %v574_v7 }
 0x1f7   :  { %v1108_v57 = vpop.permute.xlu1 %1107 }
 0x1f8   :  { %10238 = vst [vmem:[#allocation49_spill] sm:$0xff] %v7719_v52 }
 0x1fa   :  { %6048 = vmatpush3.bf16.xpose.msra.mxu0 %v1162_v20  ;;  %v7722_v20 = vpop.f32.mrf.mxu0 }
 0x1fb   :  { %10239 = vst [vmem:[#allocation50_spill] sm:$0xff] %v7722_v20 }
 0x1fc   :  { %v348_v43 = vpop.f32.mrf.mxu0 }
 0x1fd   :  { %v349_v63 = vadd.f32 %v348_v43, %v7401_v62 }
 0x1fe   :  { %v7725_v55 = vpop.f32.mrf.mxu0 }
 0x1ff   :  { %10240 = vst [vmem:[#allocation51_spill] sm:$0xff] %v7725_v55 }
 0x201   :  { %6050 = vmatmul.mubr.msk.bf16.vlgmr.msra.gmra.mxu0 %vm686_vm0, %v1100_v5  ;;  %v577_v5 = vmul.f32 0.17677669, %v349_v63 }
 0x202   :  { %6053 = vmatprep.mubr.msk.bf16.mxu0 %vm686_vm0, %v1102_v56  ;;  %v354_v56 = vpop.f32.mrf.mxu0 }
 0x203   :  { %v7729_v60 = vpack.c.bf16 %v577_v5, %v576_v47  ;;  %v355_v19 = vadd.f32 %v354_v56, %v7401_v62 }
 0x204   :  { %v7732_v26 = vpop.f32.mrf.mxu0 }
 0x205   :  { %10241 = vst [vmem:[#allocation52_spill] sm:$0xff] %v7729_v60  ;;  %10242 = vst [vmem:[#allocation53_spill] sm:$0xff] %v7732_v26  ;;  %v578_v53 = vmul.f32 0.17677669, %v355_v19 }
 0x206   :  { %v358_v7 = vpop.f32.mrf.mxu0 }
 0x208   :  { %v7735_v31 = vpop.f32.mrf.mxu0 }
 0x209   :  { %6054 = vmatmul.mubr.msk.bf16.gmra.mxu0 %vm686_vm0, %v1104_v29  ;;  %v359_v29 = vadd.f32 %v358_v7, %v7401_v62  ;;  %10243 = vst [vmem:[#allocation54_spill] sm:$0xff] %v7735_v31 }
 0x20a   :  { %6057 = vmatprep.mubr.msk.bf16.mxu0 %vm686_vm0, %v1106_v35  ;;  %v1112_v35 = vpop.permute.xlu1 %1111  ;;  %v364_v41 = vpop.f32.mrf.mxu0 }
 0x20b   :  { %v579_v14 = vmul.f32 0.17677669, %v359_v29  ;;  %v365_v47 = vadd.f32 %v364_v41, %v7401_v62 }
 0x20c   :  { %v7741_v63 = vpop.f32.mrf.mxu0 }
 0x20d   :  { %v7738_v43 = vpack.c.bf16 %v579_v14, %v578_v53  ;;  %10245 = vst [vmem:[#allocation56_spill] sm:$0xff] %v7741_v63  ;;  %v580_v5 = vmul.f32 0.17677669, %v365_v47 }
 0x20e   :  { %v7838_v33 = vpop.permute.xlu1 %1456 }
 0x20f   :  { %10244 = vst [vmem:[#allocation55_spill] sm:$0xff] %v7738_v43  ;;  %6065 = vmatprep.subr.bf16.mxu1 %v7838_v33 }
 0x211   :  { %6058 = vmatmul.mubr.msk.bf16.gmra.mxu0 %vm686_vm0, %v1108_v57  ;;  %v368_v57 = vpop.f32.mrf.mxu0 }
 0x212   :  { %6061 = vmatprep.mubr.msk.bf16.mxu0 %vm686_vm0, %v1110_v10  ;;  %v369_v10 = vadd.f32 %v368_v57, %v7401_v62 }
 0x213   :  { %v7744_v56 = vpop.f32.mrf.mxu0 }
 0x214   :  { %10246 = vst [vmem:[#allocation57_spill] sm:$0xff] %v7744_v56  ;;  %v581_v19 = vmul.f32 0.17677669, %v369_v10 }
 0x215   :  { %v374_v7 = vpop.f32.mrf.mxu0 }
 0x216   :  { %v7746_v58 = vpack.c.bf16 %v581_v19, %v580_v5  ;;  %v375_v29 = vadd.f32 %v374_v7, %v7401_v62 }
 0x218   :  { %10247 = vst [vmem:[#allocation58_spill] sm:$0xff] %v7746_v58  ;;  %v582_v14 = vmul.f32 0.17677669, %v375_v29  ;;  %v589_v29 = vadd.s32 16, %v7392_v59  ;;  %v597_v58 = vadd.s32 80, %v7392_v59 }
 0x219   :  { %6062 = vmatmul.mubr.msk.bf16.gmra.mxu0 %vm686_vm0, %v1112_v35  ;;  %v7749_v35 = vpop.f32.mrf.mxu0 }
 0x21a   :  { %10248 = vst [vmem:[#allocation59_spill] sm:$0xff] %v7749_v35 }
 0x21b   :  { %v378_v53 = vpop.f32.mrf.mxu0 }
 0x21c   :  { %v379_v41 = vadd.f32 %v378_v53, %v7401_v62  ;;  %v10253_v53 = vlaneseq }
 0x21d   :  { %v7752_v48 = vpop.f32.mrf.mxu0 }
 0x21e   :  { %10249 = vst [vmem:[#allocation60_spill] sm:$0xff] %v7752_v48  ;;  %v583_v37 = vmul.f32 0.17677669, %v379_v41  ;;  %v7764_v40 = vand.u32 127, %v10253_v53 }
 0x21f   :  { %v384_v47 = vpop.f32.mrf.mxu0 }
 0x220   :  { %v7754_v23 = vpack.c.bf16 %v583_v37, %v582_v14  ;;  %v385_v57 = vadd.f32 %v384_v47, %v7401_v62  ;;  %vm607_vm1 = vcmp.le.s32.totalorder %v7764_v40, %v589_v29  ;;  %v588_v37 = vadd.s32 8, %v7392_v59 }
 0x221   :  { %v7757_v10 = vpop.f32.mrf.mxu0  ;;  %v7326_v14 = vmov -1e+30   ;;  %vm605_vm2 = vcmp.le.s32.totalorder %v7764_v40, %v7392_v59  ;;  %vm615_vm9 = vcmp.le.s32.totalorder %v7764_v40, %v597_v58  ;;  %vm619_vm13 = vcmp.le.s32.totalorder %v7764_v40, %v601_v49 }
 0x222   :  { %10250 = vst [vmem:[#allocation61_spill] sm:$0xff] %v7754_v23  ;;  %10251 = vst [vmem:[#allocation62_spill] sm:$0xff] %v7757_v10  ;;  %v584_v19 = vmul.f32 0.17677669, %v385_v57  ;;  %v7769_v41 = vsel %vm607_vm1, 0.0, %v7326_v14  ;;  %v593_v57 = vadd.s32 48, %v7392_v59  ;;  %vm606_vm3 = vcmp.le.s32.totalorder %v7764_v40, %v588_v37 }
 0x223   :  { %v388_v5 = vpop.f32.mrf.mxu0  ;;  %10254 = vst [vmem:[#allocation64_spill] sm:$0xff] %v7769_v41  ;;  %v7786_v53 = vsel %vm606_vm3, 0.0, %v7326_v14  ;;  %v591_v37 = vadd.s32 32, %v7392_v59  ;;  %v7841_v3 = vsel %vm615_vm9, 0.0, %v7326_v14  ;;  %vm620_vm14 = vcmp.le.s32.totalorder %v7764_v40, %v602_v32 }
 0x224   :  { %v389_v7 = vadd.f32 %v388_v5, %v7401_v62  ;;  %v590_v62 = vadd.s32 24, %v7392_v59  ;;  %v7780_v5 = vsel %vm605_vm2, 0.0, %v7326_v14  ;;  %10256 = vst [vmem:[#allocation66_spill] sm:$0xff] %v7786_v53  ;;  %vm611_vm5 = vcmp.le.s32.totalorder %v7764_v40, %v593_v57  ;;  %10262 = vst [vmem:[#allocation72_spill] sm:$0xff] %v7841_v3 }
 0x225   :  { %10255 = vst [vmem:[#allocation65_spill] sm:$0xff] %v7780_v5  ;;  %vm609_vm7 = vcmp.le.s32.totalorder %v7764_v40, %v591_v37  ;;  %v7878_v26 = vsel %vm619_vm13, 0.0, %v7326_v14 }
 0x226   :  { %v585_v18 = vmul.f32 0.17677669, %v389_v7  ;;  %vm608_vm4 = vcmp.le.s32.totalorder %v7764_v40, %v590_v62  ;;  %v594_v7 = vadd.s32 56, %v7392_v59  ;;  %v7821_v60 = vsel %vm609_vm7, 0.0, %v7326_v14  ;;  %10266 = vst [vmem:[#allocation76_spill] sm:$0xff] %v7878_v26 }
 0x227   :  { %v7794_v15 = vsel %vm608_vm4, 0.0, %v7326_v14  ;;  %10260 = vst [vmem:[#allocation70_spill] sm:$0xff] %v7821_v60 }
 0x228   :  { %v7760_v22 = vpack.c.bf16 %v585_v18, %v584_v19  ;;  %10257 = vst [vmem:[#allocation67_spill] sm:$0xff] %v7794_v15  ;;  %vm612_vm6 = vcmp.le.s32.totalorder %v7764_v40, %v594_v7 }
 0x22a   :  { %10252 = vst [vmem:[#allocation63_spill] sm:$0xff] %v7760_v22  ;;  %v592_v22 = vadd.s32 40, %v7392_v59 }
 0x22c   :  { %vm610_vm8 = vcmp.le.s32.totalorder %v7764_v40, %v592_v22 }
 0x22d   :  { %v7830_v54 = vsel %vm610_vm8, 0.0, %v7326_v14 }
 0x22e   :  { %10261 = vst [vmem:[#allocation71_spill] sm:$0xff] %v7830_v54 }
 0x24e   :  { %v5987_v18 = vpop.f32.mrf.mxu1 }
 0x24f   :  { %v7775_v47 = vadd.f32 %v5987_v18, %v7769_v41 }
 0x250   :  { %v769_v19 = vpop.f32.mrf.mxu1 }
 0x251   :  { %836 = vmax.xlane.f32.xlu0 %v7775_v47  ;;  %v7789_v18 = vadd.f32 %v769_v19, %v7780_v5  ;;  %v7803_v19 = vsel %vm611_vm5, 0.0, %v7326_v14 }
 0x252   :  { %v5988_v29 = vpop.f32.mrf.mxu1  ;;  %10258 = vst [vmem:[#allocation68_spill] sm:$0xff] %v7803_v19 }
 0x253   :  { %v7806_v57 = vadd.f32 %v5988_v29, %v7794_v15  ;;  %v598_v29 = vadd.s32 88, %v7392_v59 }
 0x254   :  { %v772_v6 = vpop.f32.mrf.mxu1 }
 0x255   :  { %832 = vmax.xlane.f32.xlu0 %v7789_v18  ;;  %v7798_v62 = vadd.f32 %v772_v6, %v7786_v53  ;;  %v7812_v6 = vsel %vm612_vm6, 0.0, %v7326_v14  ;;  %vm616_vm10 = vcmp.le.s32.totalorder %v7764_v40, %v598_v29 }
 0x256   :  { %v5991_v23 = vpop.f32.mrf.mxu1  ;;  %10259 = vst [vmem:[#allocation69_spill] sm:$0xff] %v7812_v6  ;;  %v7851_v61 = vsel %vm616_vm10, 0.0, %v7326_v14 }
 0x257   :  { %834 = vmax.xlane.f32.xlu1 %v7798_v62  ;;  %v7815_v7 = vadd.f32 %v5991_v23, %v7803_v19  ;;  %v595_v23 = vadd.s32 64, %v7392_v59  ;;  %10263 = vst [vmem:[#allocation73_spill] sm:$0xff] %v7851_v61 }
 0x258   :  { %v785_v43 = vpop.f32.mrf.mxu1 }
 0x259   :  { %838 = vmax.xlane.f32.xlu0 %v7806_v57  ;;  %v7833_v22 = vadd.f32 %v785_v43, %v7821_v60  ;;  %vm613_vm11 = vcmp.le.s32.totalorder %v7764_v40, %v595_v23 }
 0x25a   :  { %v5992_v52 = vpop.f32.mrf.mxu1  ;;  %v7860_v23 = vsel %vm613_vm11, 0.0, %v7326_v14 }
 0x25b   :  { %v7824_v37 = vadd.f32 %v5992_v52, %v7812_v6  ;;  %844 = vmax.xlane.f32.xlu1 %v7815_v7  ;;  %v596_v52 = vadd.s32 72, %v7392_v59  ;;  %10264 = vst [vmem:[#allocation74_spill] sm:$0xff] %v7860_v23 }
 0x25c   :  { %v788_v21 = vpop.f32.mrf.mxu1 }
 0x25d   :  { %846 = vmax.xlane.f32.xlu0 %v7824_v37  ;;  %v7847_v43 = vadd.f32 %v788_v21, %v7830_v54  ;;  %vm614_vm12 = vcmp.le.s32.totalorder %v7764_v40, %v596_v52 }
 0x25e   :  { %v5995_v58 = vpop.f32.mrf.mxu1  ;;  %v7869_v31 = vsel %vm614_vm12, 0.0, %v7326_v14 }
 0x25f   :  { %840 = vmax.xlane.f32.xlu1 %v7833_v22  ;;  %v7854_v51 = vadd.f32 %v5995_v58, %v7841_v3  ;;  %v599_v58 = vadd.s32 96, %v7392_v59  ;;  %10265 = vst [vmem:[#allocation75_spill] sm:$0xff] %v7869_v31 }
 0x260   :  { %v801_v29 = vpop.f32.mrf.mxu1 }
 0x261   :  { %842 = vmax.xlane.f32.xlu0 %v7847_v43  ;;  %v7872_v52 = vadd.f32 %v801_v29, %v7860_v23  ;;  %vm617_vm15 = vcmp.le.s32.totalorder %v7764_v40, %v599_v58  ;;  %v7886_v29 = vsel %vm620_vm14, 0.0, %v7326_v14 }
 0x262   :  { %v5996_v21 = vpop.f32.mrf.mxu1  ;;  %10267 = vst [vmem:[#allocation77_spill] sm:$0xff] %v7886_v29 }
 0x263   :  { %v7863_v55 = vadd.f32 %v5996_v21, %v7851_v61  ;;  %852 = vmax.xlane.f32.xlu1 %v7854_v51  ;;  %v600_v21 = vadd.s32 104, %v7392_v59  ;;  %v7894_v59 = vsel %vm617_vm15, 0.0, %v7326_v14 }
 0x264   :  { %v804_v20 = vpop.f32.mrf.mxu1  ;;  %10268 = vst [vmem:[#allocation78_spill] sm:$0xff] %v7894_v59 }
 0x265   :  { %854 = vmax.xlane.f32.xlu0 %v7863_v55  ;;  %v7883_v49 = vadd.f32 %v804_v20, %v7869_v31  ;;  %vm618_vm1 = vcmp.le.s32.totalorder %v7764_v40, %v600_v21  ;;  %v7912_v21 = vpop.f32.mrf.mxu0 }
 0x266   :  { %v5999_v56 = vpop.f32.mrf.mxu1  ;;  %v7901_v35 = vsel %vm618_vm1, 0.0, %v7326_v14  ;;  %10270 = vst [vmem:[#allocation80_spill] sm:$0xff] %v7912_v21 }
 0x267   :  { %848 = vmax.xlane.f32.xlu1 %v7872_v52  ;;  %v7889_v48 = vadd.f32 %v5999_v56, %v7878_v26  ;;  %10269 = vst [vmem:[#allocation79_spill] sm:$0xff] %v7901_v35 }
 0x268   :  { %v817_v63 = vpop.f32.mrf.mxu1 }
 0x269   :  { %850 = vmax.xlane.f32.xlu0 %v7883_v49  ;;  %v7904_v56 = vadd.f32 %v817_v63, %v7894_v59 }
 0x26a   :  { %v6000_v32 = vpop.f32.mrf.mxu1 }
 0x26b   :  { %v7897_v58 = vadd.f32 %v6000_v32, %v7886_v29  ;;  %860 = vmax.xlane.f32.xlu1 %v7889_v48 }
 0x26c   :  { %v820_v20 = vpop.f32.mrf.mxu1 }
 0x26d   :  { %862 = vmax.xlane.f32.xlu0 %v7897_v58  ;;  %v7909_v40 = vadd.f32 %v820_v20, %v7901_v35 }
 0x26f   :  { %856 = vmax.xlane.f32.xlu1 %v7904_v56 }
 0x271   :  { %858 = vmax.xlane.f32.xlu0 %v7909_v40 }
 0x2c1   :  { %v6051_v32 = vpop.f32.mrf.mxu0 }
 0x2c2   :  { %v7915_v10 = vadd.f32 %v6051_v32, %v7769_v41 }
 0x2c3   :  { %v1219_v14 = vpop.f32.mrf.mxu0 }
 0x2c4   :  { %1286 = vmax.xlane.f32.xlu1 %v7915_v10  ;;  %v7919_v28 = vadd.f32 %v1219_v14, %v7780_v5 }
 0x2c5   :  { %v6052_v63 = vpop.f32.mrf.mxu0 }
 0x2c6   :  { %v7922_v27 = vadd.f32 %v6052_v63, %v7794_v15 }
 0x2c7   :  { %v1222_v20 = vpop.f32.mrf.mxu0 }
 0x2c8   :  { %1282 = vmax.xlane.f32.xlu1 %v7919_v28  ;;  %1288 = vmax.xlane.f32.xlu0 %v7922_v27  ;;  %v7927_v46 = vadd.f32 %v1222_v20, %v7786_v53 }
 0x2c9   :  { %v6055_v21 = vpop.f32.mrf.mxu0 }
 0x2cb   :  { %v7929_v32 = vpop.f32.mrf.mxu0 }
 0x2cc   :  { %1284 = vmax.xlane.f32.xlu0 %v7927_v46 }
 0x2cd   :  { %v6056_v41 = vpop.f32.mrf.mxu0 }
 0x2ce   :  { %v7933_v14 = vadd.f32 %v6056_v41, %v7812_v6 }
 0x2cf   :  { %v1238_v5 = vpop.f32.mrf.mxu0 }
 0x2d0   :  { %1296 = vmax.xlane.f32.xlu0 %v7933_v14  ;;  %v7939_v15 = vadd.f32 %v1238_v5, %v7830_v54 }
 0x2d1   :  { %v7936_v63 = vpop.f32.mrf.mxu0 }
 0x2d3   :  { %v7941_v42 = vpop.f32.mrf.mxu0 }
 0x2d4   :  { %1292 = vmax.xlane.f32.xlu0 %v7939_v15 }
 0x2d5   :  { %v6060_v20 = vpop.f32.mrf.mxu0 }
 0x2d6   :  { %v7945_v53 = vadd.f32 %v6060_v20, %v7851_v61 }
 0x2d7   :  { %v1254_v9 = vpop.f32.mrf.mxu0 }
 0x2d8   :  { %1304 = vmax.xlane.f32.xlu0 %v7945_v53  ;;  %v7953_v5 = vadd.f32 %v1254_v9, %v7869_v31 }
 0x2d9   :  { %v7948_v41 = vpop.f32.mrf.mxu0  ;;  %1454 = vrot.lane.b32.xlu1 %v7598_v30, %s7325_s2 }
 0x2da   :  { %v837_v6 = vpop.xlane.xlu0 %836 }
 0x2db   :  { %v7955_v54 = vpop.f32.mrf.mxu0 }
 0x2dc   :  { %1300 = vmax.xlane.f32.xlu0 %v7953_v5 }
 0x2dd   :  { %v6064_v38 = vpop.f32.mrf.mxu0 }
 0x2de   :  { %v7959_v20 = vadd.f32 %v6064_v38, %v7886_v29  ;;  %v833_v61 = vpop.xlane.xlu0 %832 }
 0x2df   :  { %v1270_v25 = vpop.f32.mrf.mxu0 }
 0x2e0   :  { %v835_v8 = vpop.xlane.xlu1 %834  ;;  %1312 = vmax.xlane.f32.xlu0 %v7959_v20  ;;  %v7963_v30 = vadd.f32 %v1270_v25, %v7901_v35 }
 0x2e1   :  { %v865_v9 = vsub.f32 %v7798_v62, %v835_v8 }
 0x2e2   :  { %v839_v13 = vpop.xlane.xlu0 %838 }
 0x2e3   :  { %v867_v31 = vsub.f32 %v7806_v57, %v839_v13  ;;  %v882_v24 = vmul.f32 1.442695, %v865_v9 }
 0x2e4   :  { %1308 = vmax.xlane.f32.xlu0 %v7963_v30 }
 0x2e5   :  { %v886_v11 = vmul.f32 1.442695, %v867_v31 }
 0x2e6   :  { %v847_v2 = vpop.xlane.xlu0 %846 }
 0x2e7   :  { %6718 = vpow2.f32 %v886_v11  ;;  %v871_v38 = vsub.f32 %v7824_v37, %v847_v2 }
 0x2e8   :  { %6720 = vpow2.f32 %v882_v24 }
 0x2e9   :  { %v894_v50 = vmul.f32 1.442695, %v871_v38 }
 0x2ea   :  { %v843_v29 = vpop.xlane.xlu0 %842 }
 0x2eb   :  { %v869_v4 = vsub.f32 %v7847_v43, %v843_v29  ;;  %6722 = vpow2.f32 %v894_v50  ;;  %v845_v50 = vpop.xlane.xlu1 %844  ;;  %v7989_v29 = vadd.f32 %v7929_v32, %v7821_v60 }
 0x2ed   :  { %v890_v25 = vmul.f32 1.442695, %v869_v4  ;;  %v7980_v4 = vadd.f32 %v6055_v21, %v7803_v19 }
 0x2ee   :  { %v855_v44 = vpop.xlane.xlu0 %854 }
 0x2ef   :  { %v875_v8 = vsub.f32 %v7863_v55, %v855_v44  ;;  %6724 = vpow2.f32 %v890_v25  ;;  %v841_v38 = vpop.xlane.xlu1 %840 }
 0x2f1   :  { %v902_v13 = vmul.f32 1.442695, %v875_v8  ;;  %v864_v8 = vsub.f32 %v7789_v18, %v833_v61  ;;  %v8016_v61 = vadd.f32 %v7948_v41, %v7878_v26 }
 0x2f2   :  { %v851_v62 = vpop.xlane.xlu0 %850 }
 0x2f3   :  { %v873_v31 = vsub.f32 %v7883_v49, %v851_v62  ;;  %6726 = vpow2.f32 %v902_v13  ;;  %v880_v62 = vmul.f32 1.442695, %v864_v8 }
 0x2f4   :  { %v7972_v57 = vpop.eup %6718 }
 0x2f5   :  { %918 = vadd.xlane.f32.xlu0 %v7972_v57  ;;  %v898_v24 = vmul.f32 1.442695, %v873_v31  ;;  %v7976_v37 = vpop.eup %6720  ;;  %v868_v31 = vsub.f32 %v7833_v22, %v841_v38 }
 0x2f6   :  { %v863_v2 = vpop.xlane.xlu0 %862 }
 0x2f7   :  { %v879_v11 = vsub.f32 %v7897_v58, %v863_v2  ;;  %6728 = vpow2.f32 %v898_v24  ;;  %v866_v58 = vsub.f32 %v7775_v47, %v837_v6  ;;  %v853_v47 = vpop.xlane.xlu1 %852  ;;  %v8007_v6 = vadd.f32 %v7941_v42, %v7860_v23 }
 0x2f8   :  { %v7983_v49 = vpop.eup %6722  ;;  %v888_v24 = vmul.f32 1.442695, %v868_v31  ;;  %v874_v41 = vsub.f32 %v7854_v51, %v853_v47 }
 0x2f9   :  { %914 = vadd.xlane.f32.xlu0 %v7976_v37  ;;  %v910_v55 = vmul.f32 1.442695, %v879_v11  ;;  %v884_v25 = vmul.f32 1.442695, %v866_v58 }
 0x2fa   :  { %v859_v44 = vpop.xlane.xlu0 %858 }
 0x2fb   :  { %v877_v43 = vsub.f32 %v7909_v40, %v859_v44  ;;  %6730 = vpow2.f32 %v910_v55  ;;  %v7998_v40 = vadd.f32 %v7936_v63, %v7841_v3  ;;  %v870_v63 = vsub.f32 %v7815_v7, %v845_v50  ;;  %v849_v2 = vpop.xlane.xlu1 %848 }
 0x2fc   :  { %v7992_v21 = vpop.eup %6724  ;;  %v8025_v7 = vadd.f32 %v7955_v54, %v7894_v59  ;;  %v900_v50 = vmul.f32 1.442695, %v874_v41  ;;  %v872_v44 = vsub.f32 %v7872_v52, %v849_v2 }
 0x2fd   :  { %1294 = vmax.xlane.f32.xlu1 %v7980_v4  ;;  %926 = vadd.xlane.f32.xlu0 %v7983_v49  ;;  %v906_v9 = vmul.f32 1.442695, %v877_v43  ;;  %v892_v18 = vmul.f32 1.442695, %v870_v63 }
 0x2fe   :  { %v896_v54 = vmul.f32 1.442695, %v872_v44 }
 0x2ff   :  { %6732 = vpow2.f32 %v906_v9  ;;  %v861_v22 = vpop.xlane.xlu1 %860 }
 0x300   :  { %v8001_v32 = vpop.eup %6726  ;;  %6734 = vpow2.f32 %v884_v25  ;;  %v878_v43 = vsub.f32 %v7889_v48, %v861_v22 }
 0x301   :  { %1290 = vmax.xlane.f32.xlu1 %v7989_v29  ;;  %922 = vadd.xlane.f32.xlu0 %v7992_v21  ;;  %6736 = vpow2.f32 %v880_v62 }
 0x302   :  { %6738 = vpow2.f32 %v892_v18  ;;  %v908_v9 = vmul.f32 1.442695, %v878_v43 }
 0x303   :  { %6740 = vpow2.f32 %v888_v24  ;;  %v857_v58 = vpop.xlane.xlu1 %856 }
 0x304   :  { %v8010_v13 = vpop.eup %6728  ;;  %6742 = vpow2.f32 %v900_v50  ;;  %v876_v38 = vsub.f32 %v7904_v56, %v857_v58 }
 0x305   :  { %1302 = vmax.xlane.f32.xlu1 %v7998_v40  ;;  %934 = vadd.xlane.f32.xlu0 %v8001_v32  ;;  %6744 = vpow2.f32 %v896_v54 }
 0x306   :  { %6746 = vpow2.f32 %v908_v9  ;;  %v904_v52 = vmul.f32 1.442695, %v876_v38 }
 0x308   :  { %v8019_v42 = vpop.eup %6730  ;;  %6748 = vpow2.f32 %v904_v52 }
 0x309   :  { %1298 = vmax.xlane.f32.xlu1 %v8007_v6  ;;  %930 = vadd.xlane.f32.xlu0 %v8010_v13 }
 0x30c   :  { %v8028_v11 = vpop.eup %6732 }
 0x30d   :  { %1310 = vmax.xlane.f32.xlu1 %v8016_v61  ;;  %942 = vadd.xlane.f32.xlu0 %v8019_v42  ;;  %v8033_v55 = vpop.eup %6734 }
 0x30e   :  { %v8037_v51 = vpop.eup %6736 }
 0x30f   :  { %v8041_v25 = vpop.eup %6738 }
 0x310   :  { %v8044_v8 = vpop.eup %6740 }
 0x311   :  { %1306 = vmax.xlane.f32.xlu1 %v8025_v7  ;;  %938 = vadd.xlane.f32.xlu0 %v8028_v11  ;;  %v8047_v48 = vpop.eup %6742 }
 0x312   :  { %v8050_v47 = vpop.eup %6744 }
 0x313   :  { %v8053_v56 = vpop.eup %6746 }
 0x315   :  { %916 = vadd.xlane.f32.xlu1 %v8033_v55  ;;  %v8056_v62 = vpop.eup %6748 }
 0x319   :  { %912 = vadd.xlane.f32.xlu1 %v8037_v51 }
 0x31d   :  { %924 = vadd.xlane.f32.xlu1 %v8041_v25 }
 0x321   :  { %920 = vadd.xlane.f32.xlu1 %v8044_v8 }
 0x325   :  { %932 = vadd.xlane.f32.xlu1 %v8047_v48 }
 0x329   :  { %928 = vadd.xlane.f32.xlu1 %v8050_v47 }
 0x32d   :  { %940 = vadd.xlane.f32.xlu1 %v8053_v56 }
 0x331   :  { %936 = vadd.xlane.f32.xlu1 %v8056_v62 }
 0x342   :  { %1450 = vrot.lane.b32.xlu1 %v7615_v45, %s7325_s2 }
 0x346   :  { %1448 = vrot.lane.b32.xlu1 %v7626_v0, %s7325_s2 }
 0x34a   :  { %1446 = vrot.lane.b32.xlu1 %v7637_v16, %s7325_s2 }
 0x34d   :  { %v1287_v63 = vpop.xlane.xlu1 %1286 }
 0x34e   :  { %v1316_v18 = vsub.f32 %v7915_v10, %v1287_v63  ;;  %1444 = vrot.lane.b32.xlu1 %v7649_v17, %s7325_s2 }
 0x350   :  { %v1334_v31 = vmul.f32 1.442695, %v1316_v18 }
 0x351   :  { %v1283_v2 = vpop.xlane.xlu1 %1282  ;;  %v1289_v24 = vpop.xlane.xlu0 %1288 }
 0x352   :  { %6750 = vpow2.f32 %v1334_v31  ;;  %v1314_v41 = vsub.f32 %v7919_v28, %v1283_v2  ;;  %v1317_v22 = vsub.f32 %v7922_v27, %v1289_v24  ;;  %1442 = vrot.lane.b32.xlu1 %v7659_v12, %s7325_s2 }
 0x354   :  { %v1330_v50 = vmul.f32 1.442695, %v1314_v41  ;;  %v1336_v54 = vmul.f32 1.442695, %v1317_v22 }
 0x355   :  { %v1285_v44 = vpop.xlane.xlu0 %1284  ;;  %v8089_v2 = vpop.permute.xlu1 %1454 }
 0x356   :  { %6752 = vpow2.f32 %v1330_v50  ;;  %v1315_v10 = vsub.f32 %v7927_v46, %v1285_v44 }
 0x357   :  { %6754 = vpow2.f32 %v1336_v54 }
 0x358   :  { %v1332_v58 = vmul.f32 1.442695, %v1315_v10 }
 0x359   :  { %v1297_v43 = vpop.xlane.xlu0 %1296 }
 0x35a   :  { %6756 = vpow2.f32 %v1332_v58 }
 0x35d   :  { %v1293_v9 = vpop.xlane.xlu0 %1292 }
 0x35e   :  { %v1319_v28 = vsub.f32 %v7939_v15, %v1293_v9 }
 0x35f   :  { %v8073_v38 = vpop.eup %6750 }
 0x360   :  { %1366 = vadd.xlane.f32.xlu0 %v8073_v38  ;;  %v1340_v52 = vmul.f32 1.442695, %v1319_v28  ;;  %v1321_v28 = vsub.f32 %v7933_v14, %v1297_v43 }
 0x361   :  { %v1305_v31 = vpop.xlane.xlu0 %1304 }
 0x362   :  { %6758 = vpow2.f32 %v1340_v52  ;;  %v1325_v45 = vsub.f32 %v7945_v53, %v1305_v31 }
 0x363   :  { %v8077_v27 = vpop.eup %6752 }
 0x364   :  { %1362 = vadd.xlane.f32.xlu0 %v8077_v27  ;;  %v8080_v63 = vpop.eup %6754 }
 0x365   :  { %v1301_v15 = vpop.xlane.xlu0 %1300 }
 0x366   :  { %v1323_v0 = vsub.f32 %v7953_v5, %v1301_v15 }
 0x367   :  { %v8083_v46 = vpop.eup %6756 }
 0x368   :  { %1368 = vadd.xlane.f32.xlu0 %v8080_v63  ;;  %v1348_v43 = vmul.f32 1.442695, %v1323_v0 }
 0x369   :  { %v1313_v24 = vpop.xlane.xlu0 %1312 }
 0x36c   :  { %1364 = vadd.xlane.f32.xlu0 %v8083_v46 }
 0x36d   :  { %v1309_v22 = vpop.xlane.xlu0 %1308 }
 0x36f   :  { %v8086_v18 = vpop.eup %6758 }
 0x376   :  { %1372 = vadd.xlane.f32.xlu1 %v8086_v18 }
 0x37e   :  { %v919_v54 = vpop.xlane.xlu0 %918 }
 0x382   :  { %1452 = vrot.lane.b32.xlu0 %v7606_v36, %s7325_s2  ;;  %v915_v52 = vpop.xlane.xlu0 %914 }
 0x386   :  { %v1295_v41 = vpop.xlane.xlu1 %1294  ;;  %v927_v14 = vpop.xlane.xlu0 %926 }
 0x387   :  { %v1320_v10 = vsub.f32 %v7980_v4, %v1295_v41 }
 0x389   :  { %v1342_v12 = vmul.f32 1.442695, %v1320_v10 }
 0x38a   :  { %v1291_v50 = vpop.xlane.xlu1 %1290 }
 0x38b   :  { %v1318_v44 = vsub.f32 %v7989_v29, %v1291_v50  ;;  %v1344_v50 = vmul.f32 1.442695, %v1321_v28 }
 0x38d   :  { %v1338_v9 = vmul.f32 1.442695, %v1318_v44  ;;  %v1352_v44 = vmul.f32 1.442695, %v1325_v45  ;;  %v1327_v45 = vsub.f32 %v7963_v30, %v1309_v22 }
 0x38e   :  { %v1303_v58 = vpop.xlane.xlu1 %1302 }
 0x38f   :  { %6760 = vpow2.f32 %v1338_v9  ;;  %v1324_v35 = vsub.f32 %v7998_v40, %v1303_v58 }
 0x390   :  { %6762 = vpow2.f32 %v1342_v12  ;;  %v923_v12 = vpop.xlane.xlu0 %922 }
 0x391   :  { %v1350_v41 = vmul.f32 1.442695, %v1324_v35 }
 0x392   :  { %v1299_v16 = vpop.xlane.xlu1 %1298 }
 0x393   :  { %v1322_v17 = vsub.f32 %v8007_v6, %v1299_v16 }
 0x394   :  { %v935_v31 = vpop.xlane.xlu0 %934 }
 0x395   :  { %v1346_v29 = vmul.f32 1.442695, %v1322_v17  ;;  %v1329_v17 = vsub.f32 %v7959_v20, %v1313_v24 }
 0x396   :  { %v1311_v4 = vpop.xlane.xlu1 %1310 }
 0x397   :  { %6764 = vpow2.f32 %v1346_v29  ;;  %v1328_v10 = vsub.f32 %v8016_v61, %v1311_v4  ;;  %v1360_v40 = vmul.f32 1.442695, %v1329_v17 }
 0x398   :  { %6766 = vpow2.f32 %v1344_v50  ;;  %v931_v58 = vpop.xlane.xlu0 %930 }
 0x399   :  { %6768 = vpow2.f32 %v1350_v41  ;;  %v1358_v5 = vmul.f32 1.442695, %v1328_v10 }
 0x39a   :  { %v1307_v9 = vpop.xlane.xlu1 %1306  ;;  %6770 = vpow2.f32 %v1352_v44 }
 0x39b   :  { %v1326_v16 = vsub.f32 %v8025_v7, %v1307_v9  ;;  %6772 = vpow2.f32 %v1348_v43  ;;  %v1356_v7 = vmul.f32 1.442695, %v1327_v45 }
 0x39c   :  { %6774 = vrcp.f32 %v919_v54  ;;  %v8104_v0 = vpop.eup %6760  ;;  %v943_v10 = vpop.xlane.xlu0 %942 }
 0x39d   :  { %v1354_v53 = vmul.f32 1.442695, %v1326_v16  ;;  %v8107_v61 = vpop.eup %6762 }
 0x39e   :  { %v917_v35 = vpop.xlane.xlu1 %916 }
 0x39f   :  { %6776 = vpow2.f32 %v1354_v53 }
 0x3a0   :  { %6778 = vrcp.f32 %v917_v35 }
 0x3a1   :  { %6780 = vrcp.f32 %v915_v52  ;;  %1370 = vadd.xlane.f32.xlu0 %v8104_v0 }
 0x3a2   :  { %6782 = vpow2.f32 %v1358_v5  ;;  %v913_v6 = vpop.xlane.xlu1 %912 }
 0x3a3   :  { %6784 = vrcp.f32 %v913_v6  ;;  %v939_v6 = vpop.xlane.xlu0 %938 }
 0x3a4   :  { %v8109_v20 = vpop.eup %6764  ;;  %6786 = vpow2.f32 %v1360_v40 }
 0x3a5   :  { %1374 = vadd.xlane.f32.xlu0 %v8107_v61  ;;  %1378 = vadd.xlane.f32.xlu1 %v8109_v20  ;;  %v8113_v15 = vpop.eup %6766  ;;  %6788 = vpow2.f32 %v1356_v7  ;;  %v643_v7 = vld [vmem:[#allocation7 + $0x30] sm:$0xff] }
 0x3a6   :  { %v925_v30 = vpop.xlane.xlu1 %924  ;;  %v8115_v24 = vpop.eup %6768 }
 0x3a7   :  { %6790 = vrcp.f32 %v925_v30  ;;  %v8117_v22 = vpop.eup %6770 }
 0x3a8   :  { %6792 = vrcp.f32 %v923_v12  ;;  %v8121_v54 = vpop.eup %6772 }
 0x3a9   :  { %1376 = vadd.xlane.f32.xlu0 %v8113_v15  ;;  %1382 = vadd.xlane.f32.xlu1 %v8115_v24  ;;  %6794 = vrcp.f32 %v927_v14  ;;  %v6775_v52 = vpop.eup %6774 }
 0x3aa   :  { %v921_v28 = vpop.xlane.xlu1 %920  ;;  %v963_v17 = vmul.f32 %v6775_v52, %v7972_v57  ;;  %v644_v57 = vld [vmem:[#allocation7 + $0x38] sm:$0xff] }
 0x3ab   :  { %6796 = vrcp.f32 %v921_v28 }
 0x3ac   :  { %v8123_v29 = vpop.eup %6776 }
 0x3ad   :  { %v6779_v50 = vpop.eup %6778  ;;  %1386 = vadd.xlane.f32.xlu1 %v8123_v29  ;;  %1380 = vadd.xlane.f32.xlu0 %v8121_v54 }
 0x3ae   :  { %v6781_v4 = vpop.eup %6780  ;;  %v933_v41 = vpop.xlane.xlu1 %932  ;;  %v962_v14 = vmul.f32 %v6779_v50, %v8033_v55 }
 0x3af   :  { %v8127_v44 = vpop.eup %6782  ;;  %6798 = vrcp.f32 %v933_v41  ;;  %v961_v16 = vmul.f32 %v6781_v4, %v7976_v37  ;;  %v642_v41 = vld [vmem:[#allocation7 + $0x28] sm:$0xff] }
 0x3b0   :  { %v6785_v43 = vpop.eup %6784  ;;  %6800 = vrcp.f32 %v931_v58  ;;  %v977_v55 = vpack.c.bf16 %v963_v17, %v962_v14  ;;  %v8143_v58 = vpack.c.bf16 %v644_v57, %v643_v7  ;;  %v10273_v7 = vld [vmem:[#allocation14_spill] sm:$0xff]  ;;  %v10274_v57 = vld [vmem:[#allocation17_spill] sm:$0xff] }
 0x3b1   :  { %1390 = vadd.xlane.f32.xlu1 %v8127_v44  ;;  %1384 = vadd.xlane.f32.xlu0 %v8117_v22  ;;  %v960_v9 = vmul.f32 %v6785_v43, %v8037_v51  ;;  %6802 = vrcp.f32 %v935_v31  ;;  %v8135_v12 = vpop.eup %6786 }
 0x3b2   :  { %v929_v53 = vpop.xlane.xlu1 %928  ;;  %v8137_v35 = vpop.eup %6788  ;;  %10271 = vst [vmem:[#allocation81_spill] sm:$0xff] %v8143_v58  ;;  %6097 = vmatprep.subr.bf16.mxu0 %v8143_v58 }
 0x3b3   :  { %6804 = vrcp.f32 %v929_v53  ;;  %v976_v5 = vpack.c.bf16 %v961_v16, %v960_v9  ;;  %6098 = vmatpush3.bf16.msra.mxu0 %v8143_v58 }
 0x3b4   :  { %v6791_v45 = vpop.eup %6790 }
 0x3b5   :  { %1388 = vadd.xlane.f32.xlu0 %v8137_v35  ;;  %6017 = vmatprep.mubr.bf16.mxu1 %v976_v5  ;;  %v6793_v40 = vpop.eup %6792  ;;  %v966_v30 = vmul.f32 %v6791_v45, %v8041_v25  ;;  %v641_v25 = vld [vmem:[#allocation7 + $0x20] sm:$0xff] }
 0x3b6   :  { %v941_v51 = vpop.xlane.xlu1 %940  ;;  %6018 = vmatmul.mubr.bf16.vlgmr.msra.gmra.mxu1 %v977_v55  ;;  %v6795_v37 = vpop.eup %6794  ;;  %v965_v52 = vmul.f32 %v6793_v40, %v7992_v21  ;;  %v8152_v14 = vpack.c.bf16 %v642_v41, %v641_v25 }
 0x3b7   :  { %6066 = vmatpush3.bf16.msra.mxu1 %v7838_v33  ;;  %6806 = vrcp.f32 %v941_v51  ;;  %v967_v33 = vmul.f32 %v6795_v37, %v7983_v49 }
 0x3b8   :  { %v6797_v31 = vpop.eup %6796  ;;  %6067 = vmatprep.subr.bf16.mxu1 %v8089_v2  ;;  %6808 = vrcp.f32 %v939_v6  ;;  %10272 = vst [vmem:[#allocation82_spill] sm:$0xff] %v8152_v14  ;;  %6099 = vmatprep.subr.bf16.mxu0 %v8152_v14 }
 0x3b9   :  { %1392 = vadd.xlane.f32.xlu0 %v8135_v12  ;;  %v964_v28 = vmul.f32 %v6797_v31, %v8044_v8  ;;  %6810 = vrcp.f32 %v943_v10  ;;  %v979_v43 = vpack.c.bf16 %v967_v33, %v966_v30  ;;  %6100 = vmatpush3.bf16.msra.mxu0 %v8152_v14  ;;  %v10279_v31 = vld [vmem:[#allocation18_spill] sm:$0xff]  ;;  %v10280_v30 = vld [vmem:[#allocation12_spill] sm:$0xff] }
 0x3ba   :  { %v937_v50 = vpop.xlane.xlu1 %936  ;;  %v10284_v33 = vld [vmem:[#allocation24_spill] sm:$0xff] }
 0x3bb   :  { %6812 = vrcp.f32 %v937_v50  ;;  %6068 = vmatpush3.bf16.msra.mxu1 %v8089_v2  ;;  %v978_v4 = vpack.c.bf16 %v965_v52, %v964_v28  ;;  %v10281_v28 = vld [vmem:[#allocation20_spill] sm:$0xff]  ;;  %v10282_v52 = vld [vmem:[#allocation23_spill] sm:$0xff]  ;;  %v10283_v50 = vld [vmem:[#allocation22_spill] sm:$0xff] }
 0x3bc   :  { %v6799_v8 = vpop.eup %6798 }
 0x3bd   :  { %6021 = vmatprep.mubr.bf16.mxu1 %v978_v4  ;;  %v6801_v21 = vpop.eup %6800  ;;  %v970_v2 = vmul.f32 %v6799_v8, %v8047_v48  ;;  %v10285_v4 = vld [vmem:[#allocation25_spill] sm:$0xff] }
 0x3be   :  { %6022 = vmatmul.mubr.bf16.gmra.mxu1 %v979_v43  ;;  %v6803_v49 = vpop.eup %6802  ;;  %v969_v16 = vmul.f32 %v6801_v21, %v8010_v13  ;;  %v1451_v8 = vpop.permute.xlu1 %1450 }
 0x3bf   :  { %v971_v53 = vmul.f32 %v6803_v49, %v8001_v32 }
 0x3c0   :  { %v6805_v10 = vpop.eup %6804 }
 0x3c1   :  { %v968_v9 = vmul.f32 %v6805_v10, %v8050_v47  ;;  %v981_v5 = vpack.c.bf16 %v971_v53, %v970_v2  ;;  %v10286_v53 = vld [vmem:[#allocation26_spill] sm:$0xff] }
 0x3c2   :  { %1843 = vrot.lane.b32.xlu1 %v7463_v1, %s7327_s11 }
 0x3c3   :  { %v980_v17 = vpack.c.bf16 %v969_v16, %v968_v9 }
 0x3c4   :  { %v6807_v55 = vpop.eup %6806 }
 0x3c5   :  { %6025 = vmatprep.mubr.bf16.mxu1 %v980_v17  ;;  %v6809_v45 = vpop.eup %6808  ;;  %v974_v47 = vmul.f32 %v6807_v55, %v8053_v56  ;;  %v10275_v56 = vld [vmem:[#allocation15_spill] sm:$0xff]  ;;  %v639_v55 = vld [vmem:[#allocation7 + $0x10] sm:$0xff] }
 0x3c6   :  { %1839 = vrot.lane.b32.xlu1 %v7432_v34, %s7327_s11  ;;  %6026 = vmatmul.mubr.bf16.gmra.mxu1 %v981_v5  ;;  %v6811_v48 = vpop.eup %6810  ;;  %v973_v6 = vmul.f32 %v6809_v45, %v8028_v11  ;;  %v10276_v11 = vld [vmem:[#allocation19_spill] sm:$0xff] }
 0x3c7   :  { %v975_v32 = vmul.f32 %v6811_v48, %v8019_v42  ;;  %v10278_v42 = vld [vmem:[#allocation21_spill] sm:$0xff]  ;;  %v640_v45 = vld [vmem:[#allocation7 + $0x18] sm:$0xff] }
 0x3c8   :  { %v6813_v40 = vpop.eup %6812 }
 0x3c9   :  { %v972_v13 = vmul.f32 %v6813_v40, %v8056_v62  ;;  %v983_v37 = vpack.c.bf16 %v975_v32, %v974_v47  ;;  %v10277_v62 = vld [vmem:[#allocation16_spill] sm:$0xff] }
 0x3ca   :  { %1837 = vrot.lane.b32.xlu1 %v7440_v39, %s7327_s11  ;;  %v637_v47 = vld [vmem:[#allocation7] sm:$0xff] }
 0x3cb   :  { %v982_v51 = vpack.c.bf16 %v973_v6, %v972_v13  ;;  %v638_v13 = vld [vmem:[#allocation7 + $0x8] sm:$0xff] }
 0x3cd   :  { %6029 = vmatprep.mubr.bf16.mxu1 %v982_v51  ;;  %v8237_v51 = vpack.c.bf16 %v638_v13, %v637_v47 }
 0x3ce   :  { %1833 = vrot.lane.b32.xlu1 %v10273_v7, %s7327_s11  ;;  %6030 = vmatmul.mubr.bf16.gmra.mxu1 %v983_v37 }
 0x3cf   :  { %1841 = vrot.lane.b32.xlu0 %v10274_v57, %s7327_s11  ;;  %10288 = vst [vmem:[#allocation17_spill] sm:$0xff] %v8237_v51 }
 0x3d2   :  { %1829 = vrot.lane.b32.xlu1 %v10275_v56, %s7327_s11 }
 0x3d3   :  { %1835 = vrot.lane.b32.xlu0 %v10276_v11, %s7327_s11 }
 0x3d6   :  { %1815 = vrot.lane.b32.xlu1 %v10277_v62, %s7327_s11 }
 0x3d7   :  { %1831 = vrot.lane.b32.xlu0 %v10278_v42, %s7327_s11 }
 0x3da   :  { %1819 = vrot.lane.b32.xlu1 %v10279_v31, %s7327_s11 }
 0x3db   :  { %1813 = vrot.lane.b32.xlu0 %v10280_v30, %s7327_s11 }
 0x3de   :  { %1823 = vrot.lane.b32.xlu1 %v10281_v28, %s7327_s11 }
 0x3df   :  { %1817 = vrot.lane.b32.xlu0 %v10282_v52, %s7327_s11 }
 0x3e2   :  { %1827 = vrot.lane.b32.xlu1 %v10283_v50, %s7327_s11 }
 0x3e3   :  { %1821 = vrot.lane.b32.xlu0 %v10284_v33, %s7327_s11 }
 0x3e6   :  { %2436 = vrot.lane.b32.xlu1 %v10274_v57, %s7328_s12 }
 0x3e7   :  { %1825 = vrot.lane.b32.xlu0 %v10285_v4, %s7327_s11 }
 0x3e9   :  { %v1367_v25 = vpop.xlane.xlu0 %1366 }
 0x3ea   :  { %2432 = vrot.lane.b32.xlu1 %v7440_v39, %s7328_s12 }
 0x3eb   :  { %2438 = vrot.lane.b32.xlu0 %v7463_v1, %s7328_s12  ;;  %v1449_v1 = vpop.permute.xlu1 %1448 }
 0x3ed   :  { %v1363_v41 = vpop.xlane.xlu0 %1362 }
 0x3ee   :  { %2428 = vrot.lane.b32.xlu1 %v10273_v7, %s7328_s12  ;;  %6814 = vrcp.f32 %v1363_v41 }
 0x3ef   :  { %2434 = vrot.lane.b32.xlu0 %v7432_v34, %s7328_s12  ;;  %v1447_v34 = vpop.permute.xlu1 %1446 }
 0x3f1   :  { %v1369_v43 = vpop.xlane.xlu0 %1368 }
 0x3f2   :  { %2424 = vrot.lane.b32.xlu1 %v10275_v56, %s7328_s12 }
 0x3f3   :  { %2430 = vrot.lane.b32.xlu0 %v10276_v11, %s7328_s12  ;;  %v1445_v16 = vpop.permute.xlu1 %1444 }
 0x3f5   :  { %v1365_v39 = vpop.xlane.xlu0 %1364 }
 0x3f6   :  { %6816 = vrcp.f32 %v1365_v39  ;;  %2410 = vrot.lane.b32.xlu1 %v10277_v62, %s7328_s12 }
 0x3f7   :  { %2426 = vrot.lane.b32.xlu0 %v10278_v42, %s7328_s12  ;;  %6818 = vrcp.f32 %v1369_v43  ;;  %v1443_v40 = vpop.permute.xlu1 %1442 }
 0x3f8   :  { %6820 = vrcp.f32 %v1367_v25 }
 0x3f9   :  { %v1453_v21 = vpop.permute.xlu0 %1452 }
 0x3fa   :  { %2414 = vrot.lane.b32.xlu1 %v10279_v31, %s7328_s12  ;;  %6069 = vmatprep.subr.bf16.mxu1 %v1453_v21 }
 0x3fb   :  { %2408 = vrot.lane.b32.xlu0 %v10280_v30, %s7328_s12  ;;  %6070 = vmatpush3.bf16.msra.mxu1 %v1453_v21  ;;  %v6815_v49 = vpop.eup %6814 }
 0x3fc   :  { %6071 = vmatprep.subr.bf16.mxu1 %v1451_v8  ;;  %v1410_v2 = vmul.f32 %v6815_v49, %v8077_v27 }
 0x3fe   :  { %2418 = vrot.lane.b32.xlu1 %v10281_v28, %s7328_s12 }
 0x3ff   :  { %2412 = vrot.lane.b32.xlu0 %v10282_v52, %s7328_s12  ;;  %6072 = vmatpush3.bf16.msra.mxu1 %v1451_v8 }
 0x400   :  { %6073 = vmatprep.subr.bf16.mxu1 %v1449_v1 }
 0x402   :  { %2422 = vrot.lane.b32.xlu1 %v10283_v50, %s7328_s12 }
 0x403   :  { %v6817_v10 = vpop.eup %6816  ;;  %2416 = vrot.lane.b32.xlu0 %v10284_v33, %s7328_s12  ;;  %6074 = vmatpush3.bf16.msra.mxu1 %v1449_v1 }
 0x404   :  { %6075 = vmatprep.subr.bf16.mxu1 %v1447_v34  ;;  %v1411_v9 = vmul.f32 %v6817_v10, %v8083_v46  ;;  %v6819_v5 = vpop.eup %6818  ;;  %v8233_v46 = vpack.c.bf16 %v640_v45, %v639_v55 }
 0x405   :  { %v6821_v48 = vpop.eup %6820  ;;  %v1413_v27 = vmul.f32 %v6819_v5, %v8080_v63  ;;  %v1373_v63 = vpop.xlane.xlu1 %1372 }
 0x406   :  { %2156 = vrot.lane.b32.xlu1 %v10286_v53, %s7327_s11  ;;  %v1426_v17 = vpack.c.bf16 %v1411_v9, %v1410_v2  ;;  %10287 = vst [vmem:[#allocation14_spill] sm:$0xff] %v8233_v46  ;;  %v1412_v6 = vmul.f32 %v6821_v48, %v8073_v38  ;;  %6822 = vrcp.f32 %v1373_v63 }
 0x407   :  { %2420 = vrot.lane.b32.xlu0 %v10285_v4, %s7328_s12  ;;  %6076 = vmatpush3.bf16.msra.mxu1 %v1447_v34 }
 0x408   :  { %6077 = vmatprep.subr.bf16.mxu1 %v1445_v16  ;;  %6081 = vmatprep.mubr.bf16.mxu1 %v1426_v17  ;;  %v1427_v32 = vpack.c.bf16 %v1413_v27, %v1412_v6 }
 0x40b   :  { %6078 = vmatpush3.bf16.msra.mxu1 %v1445_v16 }
 0x40c   :  { %6079 = vmatprep.subr.bf16.mxu1 %v1443_v40 }
 0x40f   :  { %6080 = vmatpush3.bf16.msra.mxu1 %v1443_v40 }
 0x410   :  { %6117 = vmatprep.subr.bf16.mxu1 %v8233_v46 }
 0x412   :  { %6082 = vmatmul.mubr.bf16.vlgmr.msra.gmra.mxu1 %v1427_v32 }
 0x413   :  { %6118 = vmatpush3.bf16.msra.mxu1 %v8233_v46  ;;  %v6823_v11 = vpop.eup %6822 }
 0x414   :  { %6119 = vmatprep.subr.bf16.mxu1 %v8237_v51  ;;  %v1415_v28 = vmul.f32 %v6823_v11, %v8086_v18 }
 0x417   :  { %6120 = vmatpush3.bf16.msra.mxu1 %v8237_v51  ;;  %v10349_v51 = vld [vmem:[#allocation35_spill] sm:$0xff] }
 0x42a   :  { %v1371_v37 = vpop.xlane.xlu0 %1370 }
 0x42b   :  { %6824 = vrcp.f32 %v1371_v37 }
 0x42e   :  { %v1379_v7 = vpop.xlane.xlu1 %1378  ;;  %v1375_v57 = vpop.xlane.xlu0 %1374 }
 0x42f   :  { %6826 = vrcp.f32 %v1375_v57 }
 0x432   :  { %v1383_v38 = vpop.xlane.xlu1 %1382  ;;  %v1377_v56 = vpop.xlane.xlu0 %1376 }
 0x433   :  { %6828 = vrcp.f32 %v1377_v56 }
 0x434   :  { %6830 = vrcp.f32 %v1379_v7 }
 0x436   :  { %v1387_v62 = vpop.xlane.xlu1 %1386  ;;  %v1381_v42 = vpop.xlane.xlu0 %1380 }
 0x437   :  { %6832 = vrcp.f32 %v1381_v42 }
 0x438   :  { %v6825_v31 = vpop.eup %6824  ;;  %6834 = vrcp.f32 %v1383_v38 }
 0x439   :  { %v1414_v30 = vmul.f32 %v6825_v31, %v8104_v0 }
 0x43a   :  { %v1391_v52 = vpop.xlane.xlu1 %1390  ;;  %v1385_v50 = vpop.xlane.xlu0 %1384 }
 0x43b   :  { %v1428_v33 = vpack.c.bf16 %v1415_v28, %v1414_v30  ;;  %6836 = vrcp.f32 %v1385_v50 }
 0x43c   :  { %6838 = vrcp.f32 %v1387_v62  ;;  %v6827_v41 = vpop.eup %6826 }
 0x43d   :  { %6085 = vmatprep.mubr.bf16.mxu1 %v1428_v33  ;;  %v1416_v8 = vmul.f32 %v6827_v41, %v8107_v61 }
 0x43e   :  { %v8244_v4 = vpop.permute.xlu1 %1843  ;;  %v1389_v25 = vpop.xlane.xlu0 %1388 }
 0x43f   :  { %6840 = vrcp.f32 %v1389_v25  ;;  %6657 = vmatprep.subr.msk.bf16.mxu0 %vm686_vm0, %v8244_v4 }
 0x440   :  { %v6829_v43 = vpop.eup %6828  ;;  %6842 = vrcp.f32 %v1391_v52 }
 0x441   :  { %v1417_v39 = vmul.f32 %v6829_v43, %v8113_v15  ;;  %v6831_v1 = vpop.eup %6830 }
 0x442   :  { %v8248_v0 = vpop.permute.xlu1 %1839  ;;  %v1393_v18 = vpop.xlane.xlu0 %1392  ;;  %v1418_v10 = vmul.f32 %v6831_v1, %v8109_v20 }
 0x443   :  { %6844 = vrcp.f32 %v1393_v18  ;;  %v1429_v21 = vpack.c.bf16 %v1417_v39, %v1416_v8 }
 0x444   :  { %v6833_v34 = vpop.eup %6832 }
 0x445   :  { %6086 = vmatmul.mubr.bf16.gmra.mxu1 %v1429_v21  ;;  %v1419_v2 = vmul.f32 %v6833_v34, %v8121_v54  ;;  %v6835_v9 = vpop.eup %6834 }
 0x446   :  { %v8252_v49 = vpop.permute.xlu1 %1837  ;;  %v1420_v61 = vmul.f32 %v6835_v9, %v8115_v24 }
 0x447   :  { %v1430_v16 = vpack.c.bf16 %v1419_v2, %v1418_v10 }
 0x448   :  { %v6837_v17 = vpop.eup %6836 }
 0x449   :  { %v6839_v5 = vpop.eup %6838  ;;  %6089 = vmatprep.mubr.bf16.mxu1 %v1430_v16  ;;  %v1421_v15 = vmul.f32 %v6837_v17, %v8117_v22 }
 0x44a   :  { %v8256_v55 = vpop.permute.xlu1 %1833  ;;  %v1422_v40 = vmul.f32 %v6839_v5, %v8123_v29 }
 0x44b   :  { %v1431_v48 = vpack.c.bf16 %v1421_v15, %v1420_v61 }
 0x44c   :  { %v6841_v45 = vpop.eup %6840 }
 0x44d   :  { %v1423_v27 = vmul.f32 %v6841_v45, %v8137_v35  ;;  %v6843_v20 = vpop.eup %6842  ;;  %6090 = vmatmul.mubr.bf16.gmra.mxu1 %v1431_v48 }
 0x44e   :  { %v8262_v54 = vpop.permute.xlu1 %1829  ;;  %v1424_v6 = vmul.f32 %v6843_v20, %v8127_v44 }
 0x44f   :  { %v1432_v47 = vpack.c.bf16 %v1423_v27, %v1422_v40 }
 0x450   :  { %v6845_v13 = vpop.eup %6844 }
 0x451   :  { %6093 = vmatprep.mubr.bf16.mxu1 %v1432_v47  ;;  %v1425_v32 = vmul.f32 %v6845_v13, %v8135_v12  ;;  %v1891_v13 = vsel %vm686_vm0, %v8244_v4, 0  ;;  %v1882_v4 = vsel %vm686_vm0, %v8252_v49, 0 }
 0x452   :  { %v8266_v24 = vpop.permute.xlu1 %1815 }
 0x453   :  { %v1433_v22 = vpack.c.bf16 %v1425_v32, %v1424_v6  ;;  %v1842_v6 = vpop.permute.xlu0 %1841 }
 0x454   :  { %v1888_v32 = vsel %vm686_vm0, %v1842_v6, 0 }
 0x455   :  { %6094 = vmatmul.mubr.bf16.gmra.mxu1 %v1433_v22  ;;  %v1885_v22 = vsel %vm686_vm0, %v8248_v0, 0 }
 0x456   :  { %v8268_v63 = vpop.permute.xlu1 %1819 }
 0x45a   :  { %v8270_v29 = vpop.permute.xlu1 %1823 }
 0x45e   :  { %v8272_v35 = vpop.permute.xlu1 %1827 }
 0x462   :  { %v8274_v37 = vpop.permute.xlu1 %2436 }
 0x466   :  { %v8276_v7 = vpop.permute.xlu1 %2432 }
 0x46a   :  { %v8278_v57 = vpop.permute.xlu1 %2428 }
 0x46e   :  { %v8280_v38 = vpop.permute.xlu1 %2424 }
 0x472   :  { %v8282_v44 = vpop.permute.xlu1 %2410 }
 0x476   :  { %v8284_v12 = vpop.permute.xlu1 %2414  ;;  %v6019_v56 = vpop.f32.mrf.mxu1 }
 0x478   :  { %v1018_v11 = vpop.f32.mrf.mxu1 }
 0x47a   :  { %v8286_v62 = vpop.permute.xlu1 %2418  ;;  %v6020_v42 = vpop.f32.mrf.mxu1 }
 0x47b   :  { %v1082_v28 = vpack.c.bf16 %v6020_v42, %v6019_v56  ;;  %v1836_v56 = vpop.permute.xlu0 %1835 }
 0x47c   :  { %v1021_v31 = vpop.f32.mrf.mxu1  ;;  %v1879_v42 = vsel %vm686_vm0, %v1836_v56, 0 }
 0x47d   :  { %v1081_v30 = vpack.c.bf16 %v1021_v31, %v1018_v11 }
 0x47e   :  { %v8288_v52 = vpop.permute.xlu1 %2422  ;;  %v6023_v50 = vpop.f32.mrf.mxu1 }
 0x47f   :  { %6121 = vmatprep.mubr.msk.bf16.mxu1 %vm686_vm0, %v1081_v30  ;;  %v1832_v11 = vpop.permute.xlu0 %1831  ;;  %v1876_v30 = vsel %vm686_vm0, %v8256_v55, 0 }
 0x480   :  { %v1034_v33 = vpop.f32.mrf.mxu1  ;;  %6122 = vmatmul.mubr.msk.bf16.vlgmr.msra.gmra.mxu1 %vm686_vm0, %v1082_v28 }
 0x482   :  { %v2157_v25 = vpop.permute.xlu1 %2156  ;;  %v6024_v41 = vpop.f32.mrf.mxu1 }
 0x483   :  { %6169 = vmatprep.subr.bf16.mxu1 %v2157_v25  ;;  %v1084_v8 = vpack.c.bf16 %v6024_v41, %v6023_v50  ;;  %v1814_v31 = vpop.permute.xlu0 %1813  ;;  %v1873_v41 = vsel %vm686_vm0, %v1832_v11, 0 }
 0x484   :  { %v1037_v43 = vpop.f32.mrf.mxu1  ;;  %6170 = vmatpush3.bf16.msra.mxu1 %v2157_v25 }
 0x485   :  { %v1083_v18 = vpack.c.bf16 %v1037_v43, %v1034_v33 }
 0x486   :  { %v6027_v39 = vpop.f32.mrf.mxu1 }
 0x487   :  { %6125 = vmatprep.mubr.msk.bf16.mxu1 %vm686_vm0, %v1083_v18 }
 0x488   :  { %v1050_v1 = vpop.f32.mrf.mxu1  ;;  %6126 = vmatmul.mubr.msk.bf16.gmra.mxu1 %vm686_vm0, %v1084_v8 }
 0x48a   :  { %v6028_v21 = vpop.f32.mrf.mxu1 }
 0x48b   :  { %v1086_v2 = vpack.c.bf16 %v6028_v21, %v6027_v39 }
 0x48c   :  { %v1053_v34 = vpop.f32.mrf.mxu1 }
 0x48d   :  { %v1085_v10 = vpack.c.bf16 %v1053_v34, %v1050_v1  ;;  %v1870_v34 = vsel %vm686_vm0, %v8262_v54, 0 }
 0x48e   :  { %v6031_v9 = vpop.f32.mrf.mxu1 }
 0x48f   :  { %6129 = vmatprep.mubr.msk.bf16.mxu1 %vm686_vm0, %v1085_v10 }
 0x490   :  { %v1066_v16 = vpop.f32.mrf.mxu1  ;;  %6130 = vmatmul.mubr.msk.bf16.gmra.mxu1 %vm686_vm0, %v1086_v2 }
 0x492   :  { %v6032_v17 = vpop.f32.mrf.mxu1 }
 0x493   :  { %v1088_v15 = vpack.c.bf16 %v6032_v17, %v6031_v9 }
 0x494   :  { %v1069_v5 = vpop.f32.mrf.mxu1 }
 0x495   :  { %v1087_v61 = vpack.c.bf16 %v1069_v5, %v1066_v16 }
 0x497   :  { %6133 = vmatprep.mubr.msk.bf16.mxu1 %vm686_vm0, %v1087_v61 }
 0x498   :  { %6134 = vmatmul.mubr.msk.bf16.gmra.mxu1 %vm686_vm0, %v1088_v15 }
 0x4d2   :  { %v6083_v45 = vpop.f32.mrf.mxu1 }
 0x4d4   :  { %v1500_v48 = vpop.f32.mrf.mxu1 }
 0x4d6   :  { %v6084_v40 = vpop.f32.mrf.mxu1 }
 0x4d7   :  { %v1564_v47 = vpack.c.bf16 %v6084_v40, %v6083_v45  ;;  %v2483_v40 = vsel %vm686_vm0, %v8274_v37, 0 }
 0x4d8   :  { %v1503_v27 = vpop.f32.mrf.mxu1 }
 0x4d9   :  { %v1563_v20 = vpack.c.bf16 %v1503_v27, %v1500_v48 }
 0x4db   :  { %6101 = vmatprep.mubr.msk.bf16.mxu0 %vm686_vm0, %v1563_v20 }
 0x4dc   :  { %6102 = vmatmul.mubr.msk.bf16.vlgmr.msra.gmra.mxu0 %vm686_vm0, %v1564_v47  ;;  %v2471_v47 = vsel %vm686_vm0, %v8278_v57, 0 }
 0x4dd   :  { %6138 = vmatpush3.bf16.xpose.msra.mxu0 %v1891_v13  ;;  %v10290_v13 = vld [vmem:[#allocation62_spill] sm:$0xff] }
 0x4de   :  { %6658 = vmatprep.subr.msk.bf16.mxu0 %vm686_vm0, %v1842_v6 }
 0x4e5   :  { %6140 = vmatpush3.bf16.xpose.msra.mxu0 %v1888_v32  ;;  %v10291_v32 = vld [vmem:[#allocation80_spill] sm:$0xff] }
 0x4e6   :  { %6659 = vmatprep.subr.msk.bf16.mxu0 %vm686_vm0, %v8248_v0  ;;  %v1818_v0 = vpop.permute.xlu0 %1817 }
 0x4ea   :  { %v1822_v50 = vpop.permute.xlu0 %1821 }
 0x4ed   :  { %6142 = vmatpush3.bf16.xpose.msra.mxu0 %v1885_v22 }
 0x4ee   :  { %6660 = vmatprep.subr.msk.bf16.mxu0 %vm686_vm0, %v8252_v49  ;;  %v1826_v39 = vpop.permute.xlu0 %1825 }
 0x4f2   :  { %v2439_v10 = vpop.permute.xlu0 %2438 }
 0x4f5   :  { %6144 = vmatpush3.bf16.xpose.msra.mxu0 %v1882_v4  ;;  %v10293_v4 = vld [vmem:[#allocation59_spill] sm:$0xff] }
 0x4f6   :  { %6661 = vmatprep.subr.msk.bf16.mxu0 %vm686_vm0, %v1836_v56  ;;  %v2435_v48 = vpop.permute.xlu0 %2434 }
 0x4f7   :  { %v2480_v27 = vsel %vm686_vm0, %v2435_v48, 0 }
 0x4fd   :  { %6146 = vmatpush3.bf16.xpose.msra.mxu0 %v1879_v42  ;;  %v10294_v42 = vld [vmem:[#allocation60_spill] sm:$0xff] }
 0x4fe   :  { %6662 = vmatprep.subr.msk.bf16.mxu0 %vm686_vm0, %v8256_v55 }
 0x505   :  { %6148 = vmatpush3.bf16.xpose.msra.mxu0 %v1876_v30  ;;  %v6087_v28 = vpop.f32.mrf.mxu1 }
 0x506   :  { %6663 = vmatprep.subr.msk.bf16.mxu0 %vm686_vm0, %v1832_v11 }
 0x507   :  { %v1516_v49 = vpop.f32.mrf.mxu1 }
 0x509   :  { %v6088_v33 = vpop.f32.mrf.mxu1 }
 0x50a   :  { %v1566_v18 = vpack.c.bf16 %v6088_v33, %v6087_v28 }
 0x50b   :  { %v1519_v25 = vpop.f32.mrf.mxu1 }
 0x50c   :  { %v1565_v43 = vpack.c.bf16 %v1519_v25, %v1516_v49 }
 0x50d   :  { %6150 = vmatpush3.bf16.xpose.msra.mxu0 %v1873_v41  ;;  %v6091_v8 = vpop.f32.mrf.mxu1 }
 0x50e   :  { %6664 = vmatprep.subr.msk.bf16.mxu0 %vm686_vm0, %v8262_v54  ;;  %6105 = vmatprep.mubr.msk.bf16.mxu0 %vm686_vm0, %v1565_v43  ;;  %v2486_v54 = vsel %vm686_vm0, %v2439_v10, 0  ;;  %v10299_v43 = vld [vmem:[#allocation53_spill] sm:$0xff] }
 0x50f   :  { %v1532_v55 = vpop.f32.mrf.mxu1  ;;  %6106 = vmatmul.mubr.msk.bf16.gmra.mxu0 %vm686_vm0, %v1566_v18 }
 0x511   :  { %v6092_v1 = vpop.f32.mrf.mxu1 }
 0x512   :  { %v1568_v9 = vpack.c.bf16 %v6092_v1, %v6091_v8  ;;  %v10300_v8 = vld [vmem:[#allocation54_spill] sm:$0xff] }
 0x513   :  { %v1535_v21 = vpop.f32.mrf.mxu1 }
 0x514   :  { %v1567_v2 = vpack.c.bf16 %v1535_v21, %v1532_v55  ;;  %v10302_v21 = vld [vmem:[#allocation50_spill] sm:$0xff] }
 0x515   :  { %6152 = vmatpush3.bf16.xpose.msra.mxu0 %v1870_v34  ;;  %v6095_v16 = vpop.f32.mrf.mxu1 }
 0x516   :  { %6665 = vmatprep.subr.msk.bf16.mxu0 %vm686_vm0, %v2439_v10  ;;  %6109 = vmatprep.mubr.msk.bf16.mxu0 %vm686_vm0, %v1567_v2  ;;  %v10303_v10 = vld [vmem:[#allocation51_spill] sm:$0xff] }
 0x517   :  { %v1548_v17 = vpop.f32.mrf.mxu1  ;;  %6110 = vmatmul.mubr.msk.bf16.gmra.mxu0 %vm686_vm0, %v1568_v9 }
 0x519   :  { %v6096_v5 = vpop.f32.mrf.mxu1 }
 0x51a   :  { %v1570_v45 = vpack.c.bf16 %v6096_v5, %v6095_v16  ;;  %v10305_v16 = vld [vmem:[#allocation43_spill] sm:$0xff] }
 0x51b   :  { %v1551_v61 = vpop.f32.mrf.mxu1 }
 0x51c   :  { %v1569_v15 = vpack.c.bf16 %v1551_v61, %v1548_v17  ;;  %v10306_v17 = vld [vmem:[#allocation47_spill] sm:$0xff]  ;;  %v10307_v61 = vld [vmem:[#allocation48_spill] sm:$0xff] }
 0x51e   :  { %6113 = vmatprep.mubr.msk.bf16.mxu0 %vm686_vm0, %v1569_v15 }
 0x51f   :  { %6114 = vmatmul.mubr.msk.bf16.gmra.mxu0 %vm686_vm0, %v1570_v45 }
 0x520   :  { %6153 = vmatprep.mubr.msk.bf16.mxu0 %vm686_vm0, %v1814_v31 }
 0x527   :  { %6154 = vmatmul.mubr.msk.bf16.vlgmr.msra.gmra.mxu0 %vm686_vm0, %v8266_v24  ;;  %v2431_v24 = vpop.permute.xlu0 %2430 }
 0x528   :  { %6222 = vmatpush3.bf16.xpose.msra.mxu0 %v2486_v54  ;;  %6157 = vmatprep.mubr.msk.bf16.mxu0 %vm686_vm0, %v1818_v0  ;;  %v10309_v54 = vld [vmem:[#allocation44_spill] sm:$0xff] }
 0x529   :  { %6666 = vmatprep.subr.msk.bf16.mxu0 %vm686_vm0, %v8274_v37  ;;  %v2477_v37 = vsel %vm686_vm0, %v8276_v7, 0 }
 0x52b   :  { %v2427_v20 = vpop.permute.xlu0 %2426 }
 0x52f   :  { %6158 = vmatmul.mubr.msk.bf16.gmra.mxu0 %vm686_vm0, %v8268_v63  ;;  %v2409_v63 = vpop.permute.xlu0 %2408 }
 0x530   :  { %6224 = vmatpush3.bf16.xpose.msra.mxu0 %v2483_v40  ;;  %6161 = vmatprep.mubr.msk.bf16.mxu0 %vm686_vm0, %v1822_v50  ;;  %v10297_v50 = vld [vmem:[#allocation57_spill] sm:$0xff] }
 0x531   :  { %6667 = vmatprep.subr.msk.bf16.mxu0 %vm686_vm0, %v2435_v48  ;;  %v10310_v40 = vld [vmem:[#allocation45_spill] sm:$0xff] }
 0x533   :  { %v2413_v30 = vpop.permute.xlu0 %2412 }
 0x537   :  { %6162 = vmatmul.mubr.msk.bf16.gmra.mxu0 %vm686_vm0, %v8270_v29  ;;  %v2474_v29 = vsel %vm686_vm0, %v2431_v24, 0  ;;  %v2417_v41 = vpop.permute.xlu0 %2416 }
 0x538   :  { %6226 = vmatpush3.bf16.xpose.msra.mxu0 %v2480_v27  ;;  %6165 = vmatprep.mubr.msk.bf16.mxu0 %vm686_vm0, %v1826_v39 }
 0x539   :  { %6668 = vmatprep.subr.msk.bf16.mxu0 %vm686_vm0, %v8276_v7  ;;  %v10289_v7 = vld [vmem:[#allocation13_spill] sm:$0xff] }
 0x53a   :  { %v387_v6 = vadd.f32 %v10290_v13, %v10289_v7  ;;  %v391_v22 = vadd.f32 %v10291_v32, %v10289_v7  ;;  %v377_v11 = vadd.f32 %v10293_v4, %v10289_v7  ;;  %v381_v31 = vadd.f32 %v10294_v42, %v10289_v7  ;;  %v10315_v32 = vld [vmem:[#allocation46_spill] sm:$0xff]  ;;  %v10321_v42 = vld [vmem:[#allocation63_spill] sm:$0xff] }
 0x53b   :  { %v371_v33 = vadd.f32 %v10297_v50, %v10289_v7  ;;  %v357_v18 = vadd.f32 %v10299_v43, %v10289_v7  ;;  %v361_v39 = vadd.f32 %v10300_v8, %v10289_v7  ;;  %v2421_v1 = vpop.permute.xlu0 %2420  ;;  %v347_v34 = vadd.f32 %v10302_v21, %v10289_v7  ;;  %v10319_v4 = vld [vmem:[#allocation58_spill] sm:$0xff] }
 0x53c   :  { %v8369_v56 = vpack.c.bf16 %v391_v22, %v387_v6  ;;  %v8379_v0 = vpack.c.bf16 %v381_v31, %v377_v11  ;;  %v351_v2 = vadd.f32 %v10303_v10, %v10289_v7  ;;  %v337_v5 = vadd.f32 %v10306_v17, %v10289_v7  ;;  %v10316_v22 = vld [vmem:[#allocation49_spill] sm:$0xff]  ;;  %v10338_v10 = vld [vmem:[#allocation64_spill] sm:$0xff] }
 0x53d   :  { %v8405_v55 = vpack.c.bf16 %v361_v39, %v357_v18  ;;  %v341_v15 = vadd.f32 %v10307_v61, %v10289_v7  ;;  %v327_v48 = vadd.f32 %v10309_v54, %v10289_v7  ;;  %v10320_v11 = vld [vmem:[#allocation61_spill] sm:$0xff] }
 0x53e   :  { %10292 = vst [vmem:[#allocation15_spill] sm:$0xff] %v8369_v56  ;;  %10295 = vst [vmem:[#allocation19_spill] sm:$0xff] %v8379_v0  ;;  %v3111_v28 = vsel %vm686_vm0, %v8369_v56, 0  ;;  %v8418_v9 = vpack.c.bf16 %v351_v2, %v347_v34 }
 0x53f   :  { %6166 = vmatmul.mubr.msk.bf16.gmra.mxu0 %vm686_vm0, %v8272_v35  ;;  %v2468_v35 = vsel %vm686_vm0, %v2427_v20, 0  ;;  %10301 = vst [vmem:[#allocation21_spill] sm:$0xff] %v8405_v55  ;;  %v8432_v45 = vpack.c.bf16 %v341_v15, %v337_v5  ;;  %v10339_v5 = vld [vmem:[#allocation65_spill] sm:$0xff] }
 0x540   :  { %6228 = vmatpush3.bf16.xpose.msra.mxu0 %v2477_v37  ;;  %6237 = vmatprep.mubr.msk.bf16.mxu0 %vm686_vm0, %v2409_v63  ;;  %10304 = vst [vmem:[#allocation18_spill] sm:$0xff] %v8418_v9  ;;  %v10312_v63 = vld [vmem:[#allocation41_spill] sm:$0xff] }
 0x541   :  { %6669 = vmatprep.subr.msk.bf16.mxu0 %vm686_vm0, %v2431_v24  ;;  %10308 = vst [vmem:[#allocation12_spill] sm:$0xff] %v8432_v45  ;;  %v331_v24 = vadd.f32 %v10310_v40, %v10289_v7  ;;  %v317_v37 = vadd.f32 %v10312_v63, %v10289_v7  ;;  %v10341_v40 = vld [vmem:[#allocation67_spill] sm:$0xff] }
 0x543   :  { %v8442_v27 = vpack.c.bf16 %v331_v24, %v327_v48 }
 0x545   :  { %10311 = vst [vmem:[#allocation20_spill] sm:$0xff] %v8442_v27  ;;  %v3093_v13 = vsel %vm686_vm0, %v8442_v27, 0 }
 0x548   :  { %6230 = vmatpush3.bf16.xpose.msra.mxu0 %v2474_v29  ;;  %v10313_v29 = vld [vmem:[#allocation42_spill] sm:$0xff] }
 0x549   :  { %6670 = vmatprep.subr.msk.bf16.mxu0 %vm686_vm0, %v8278_v57  ;;  %v2465_v57 = vsel %vm686_vm0, %v8280_v38, 0 }
 0x550   :  { %6232 = vmatpush3.bf16.xpose.msra.mxu0 %v2471_v47  ;;  %v321_v47 = vadd.f32 %v10313_v29, %v10289_v7  ;;  %v10342_v29 = vld [vmem:[#allocation69_spill] sm:$0xff] }
 0x551   :  { %6671 = vmatprep.subr.msk.bf16.mxu0 %vm686_vm0, %v2427_v20  ;;  %v3096_v20 = vsel %vm686_vm0, %v8432_v45, 0 }
 0x558   :  { %6234 = vmatpush3.bf16.xpose.msra.mxu0 %v2468_v35  ;;  %v8452_v35 = vpack.c.bf16 %v321_v47, %v317_v37 }
 0x559   :  { %6672 = vmatprep.subr.msk.bf16.mxu0 %vm686_vm0, %v8280_v38  ;;  %v10296_v38 = vld [vmem:[#allocation56_spill] sm:$0xff] }
 0x55a   :  { %v367_v49 = vadd.f32 %v10296_v38, %v10289_v7  ;;  %10314 = vst [vmem:[#allocation23_spill] sm:$0xff] %v8452_v35  ;;  %v3090_v6 = vsel %vm686_vm0, %v8452_v35, 0  ;;  %v10317_v7 = vld [vmem:[#allocation52_spill] sm:$0xff] }
 0x55c   :  { %v8392_v25 = vpack.c.bf16 %v371_v33, %v367_v49 }
 0x55e   :  { %10298 = vst [vmem:[#allocation16_spill] sm:$0xff] %v8392_v25 }
 0x560   :  { %6236 = vmatpush3.bf16.xpose.msra.mxu0 %v2465_v57  ;;  %v10318_v57 = vld [vmem:[#allocation55_spill] sm:$0xff] }
 0x561   :  { %6673 = vmatprep.subr.msk.bf16.mxu0 %vm686_vm0, %v8369_v56 }
 0x567   :  { %6238 = vmatmul.mubr.msk.bf16.vlgmr.msra.gmra.mxu0 %vm686_vm0, %v8282_v44  ;;  %v3108_v44 = vsel %vm686_vm0, %v8379_v0, 0 }
 0x568   :  { %6241 = vmatprep.mubr.msk.bf16.mxu0 %vm686_vm0, %v2413_v30  ;;  %6306 = vmatpush3.bf16.xpose.msra.mxu0 %v3111_v28 }
 0x569   :  { %6674 = vmatprep.subr.msk.bf16.mxu0 %vm686_vm0, %v8379_v0 }
 0x56f   :  { %6242 = vmatmul.mubr.msk.bf16.gmra.mxu0 %vm686_vm0, %v8284_v12  ;;  %v3105_v12 = vsel %vm686_vm0, %v8392_v25, 0 }
 0x570   :  { %6245 = vmatprep.mubr.msk.bf16.mxu0 %vm686_vm0, %v2417_v41  ;;  %6308 = vmatpush3.bf16.xpose.msra.mxu0 %v3108_v44 }
 0x571   :  { %6675 = vmatprep.subr.msk.bf16.mxu0 %vm686_vm0, %v8392_v25 }
 0x577   :  { %6246 = vmatmul.mubr.msk.bf16.gmra.mxu0 %vm686_vm0, %v8286_v62  ;;  %v3102_v62 = vsel %vm686_vm0, %v8405_v55, 0 }
 0x578   :  { %6249 = vmatprep.mubr.msk.bf16.mxu0 %vm686_vm0, %v2421_v1  ;;  %6310 = vmatpush3.bf16.xpose.msra.mxu0 %v3105_v12 }
 0x579   :  { %6676 = vmatprep.subr.msk.bf16.mxu0 %vm686_vm0, %v8405_v55 }
 0x57f   :  { %6250 = vmatmul.mubr.msk.bf16.gmra.mxu0 %vm686_vm0, %v8288_v52  ;;  %v3099_v52 = vsel %vm686_vm0, %v8418_v9, 0 }
 0x580   :  { %6312 = vmatpush3.bf16.xpose.msra.mxu0 %v3102_v62  ;;  %6321 = vmatprep.mubr.msk.bf16.mxu0 %vm686_vm0, %v10305_v16 }
 0x581   :  { %6677 = vmatprep.subr.msk.bf16.mxu0 %vm686_vm0, %v8418_v9 }
 0x588   :  { %6314 = vmatpush3.bf16.xpose.msra.mxu0 %v3099_v52  ;;  %v10340_v52 = vld [vmem:[#allocation66_spill] sm:$0xff] }
 0x589   :  { %6678 = vmatprep.subr.msk.bf16.mxu0 %vm686_vm0, %v8432_v45 }
 0x590   :  { %6316 = vmatpush3.bf16.xpose.msra.mxu0 %v3096_v20 }
 0x591   :  { %6679 = vmatprep.subr.msk.bf16.mxu0 %vm686_vm0, %v8442_v27 }
 0x598   :  { %6318 = vmatpush3.bf16.xpose.msra.mxu0 %v3093_v13 }
 0x599   :  { %6680 = vmatprep.subr.msk.bf16.mxu0 %vm686_vm0, %v8452_v35 }
 0x59c   :  { %v8474_v31 = vpop.f32.mrf.mxu0 }
 0x59d   :  { %10322 = vst [vmem:[#allocation22_spill] sm:$0xff] %v8474_v31 }
 0x59e   :  { %v8476_v30 = vpop.f32.mrf.mxu0 }
 0x59f   :  { %10323 = vst [vmem:[#allocation24_spill] sm:$0xff] %v8476_v30 }
 0x5a0   :  { %6320 = vmatpush3.bf16.xpose.msra.mxu0 %v3090_v6  ;;  %v8478_v28 = vpop.f32.mrf.mxu0 }
 0x5a1   :  { %10324 = vst [vmem:[#allocation25_spill] sm:$0xff] %v8478_v28 }
 0x5a2   :  { %v8480_v38 = vpop.f32.mrf.mxu0 }
 0x5a3   :  { %10325 = vst [vmem:[#allocation26_spill] sm:$0xff] %v8480_v38 }
 0x5a7   :  { %6322 = vmatmul.mubr.msk.bf16.vlgmr.msra.gmra.mxu0 %vm686_vm0, %v10315_v32  ;;  %v10352_v32 = vld [vmem:[#allocation32_spill] sm:$0xff] }
 0x5a8   :  { %6325 = vmatprep.mubr.msk.bf16.mxu0 %vm686_vm0, %v10316_v22 }
 0x5af   :  { %6326 = vmatmul.mubr.msk.bf16.gmra.mxu0 %vm686_vm0, %v10317_v7  ;;  %v10351_v7 = vld [vmem:[#allocation79_spill] sm:$0xff] }
 0x5b0   :  { %6329 = vmatprep.mubr.msk.bf16.mxu0 %vm686_vm0, %v10318_v57 }
 0x5b7   :  { %6330 = vmatmul.mubr.msk.bf16.gmra.mxu0 %vm686_vm0, %v10319_v4 }
 0x5b8   :  { %6333 = vmatprep.mubr.msk.bf16.mxu0 %vm686_vm0, %v10320_v11 }
 0x5bf   :  { %6334 = vmatmul.mubr.msk.bf16.gmra.mxu0 %vm686_vm0, %v10321_v42 }
 0x5cf   :  { %v8482_v49 = vpop.f32.mrf.mxu0 }
 0x5d0   :  { %10326 = vst [vmem:[#allocation13_spill] sm:$0xff] %v8482_v49 }
 0x5d1   :  { %v8484_v50 = vpop.f32.mrf.mxu0 }
 0x5d2   :  { %10327 = vst [vmem:[#allocation62_spill] sm:$0xff] %v8484_v50 }
 0x5d3   :  { %v8486_v33 = vpop.f32.mrf.mxu0 }
 0x5d4   :  { %10328 = vst [vmem:[#allocation80_spill] sm:$0xff] %v8486_v33 }
 0x5d5   :  { %v8488_v41 = vpop.f32.mrf.mxu0 }
 0x5d6   :  { %10329 = vst [vmem:[#allocation59_spill] sm:$0xff] %v8488_v41 }
 0x5d7   :  { %v8490_v44 = vpop.f32.mrf.mxu0 }
 0x5d8   :  { %10330 = vst [vmem:[#allocation60_spill] sm:$0xff] %v8490_v44 }
 0x5d9   :  { %v8492_v43 = vpop.f32.mrf.mxu0 }
 0x5da   :  { %10331 = vst [vmem:[#allocation56_spill] sm:$0xff] %v8492_v43 }
 0x5db   :  { %v8494_v18 = vpop.f32.mrf.mxu0 }
 0x5dc   :  { %10332 = vst [vmem:[#allocation57_spill] sm:$0xff] %v8494_v18 }
 0x5dd   :  { %v8496_v8 = vpop.f32.mrf.mxu0 }
 0x5de   :  { %10333 = vst [vmem:[#allocation53_spill] sm:$0xff] %v8496_v8  ;;  %v10345_v8 = vld [vmem:[#allocation75_spill] sm:$0xff] }
 0x5df   :  { %v8498_v39 = vpop.f32.mrf.mxu0 }
 0x5e0   :  { %10334 = vst [vmem:[#allocation54_spill] sm:$0xff] %v8498_v39 }
 0x5e1   :  { %v8500_v1 = vpop.f32.mrf.mxu0 }
 0x5e2   :  { %10335 = vst [vmem:[#allocation50_spill] sm:$0xff] %v8500_v1 }
 0x5e3   :  { %v8502_v12 = vpop.f32.mrf.mxu0 }
 0x5e4   :  { %10336 = vst [vmem:[#allocation51_spill] sm:$0xff] %v8502_v12 }
 0x5e5   :  { %v8504_v21 = vpop.f32.mrf.mxu0 }
 0x5e6   :  { %10337 = vst [vmem:[#allocation47_spill] sm:$0xff] %v8504_v21 }
 0x5e7   :  { %v6155_v34 = vpop.f32.mrf.mxu0 }
 0x5e8   :  { %v1936_v2 = vadd.f32 %v6155_v34, %v10338_v10 }
 0x5e9   :  { %v1927_v62 = vpop.f32.mrf.mxu0 }
 0x5ea   :  { %1994 = vmax.xlane.f32.xlu0 %v1936_v2  ;;  %v1928_v61 = vadd.f32 %v1927_v62, %v10339_v5  ;;  %v10343_v62 = vld [vmem:[#allocation71_spill] sm:$0xff] }
 0x5eb   :  { %v6156_v17 = vpop.f32.mrf.mxu0 }
 0x5ec   :  { %v1939_v24 = vadd.f32 %v6156_v17, %v10341_v40 }
 0x5ed   :  { %v1930_v15 = vpop.f32.mrf.mxu0 }
 0x5ee   :  { %v8509_v54 = vadd.f32 %v1930_v15, %v10340_v52  ;;  %1990 = vmax.xlane.f32.xlu0 %v1928_v61 }
 0x5ef   :  { %v6159_v48 = vpop.f32.mrf.mxu0 }
 0x5f0   :  { %1992 = vmax.xlane.f32.xlu1 %v8509_v54  ;;  %v1952_v63 = vadd.f32 %v6159_v48, %v7803_v19 }
 0x5f1   :  { %v1943_v20 = vpop.f32.mrf.mxu0 }
 0x5f2   :  { %1996 = vmax.xlane.f32.xlu0 %v1939_v24  ;;  %v1944_v6 = vadd.f32 %v1943_v20, %v7821_v60 }
 0x5f3   :  { %v6160_v37 = vpop.f32.mrf.mxu0 }
 0x5f4   :  { %v8515_v47 = vadd.f32 %v6160_v37, %v10342_v29  ;;  %2002 = vmax.xlane.f32.xlu1 %v1952_v63  ;;  %v10344_v37 = vld [vmem:[#allocation73_spill] sm:$0xff] }
 0x5f5   :  { %v1946_v13 = vpop.f32.mrf.mxu0 }
 0x5f6   :  { %2004 = vmax.xlane.f32.xlu0 %v8515_v47  ;;  %v8520_v15 = vadd.f32 %v1946_v13, %v10343_v62 }
 0x5f7   :  { %v6163_v34 = vpop.f32.mrf.mxu0 }
 0x5f8   :  { %1998 = vmax.xlane.f32.xlu1 %v1944_v6  ;;  %v8523_v14 = vadd.f32 %v6163_v34, %v7841_v3 }
 0x5f9   :  { %v1959_v17 = vpop.f32.mrf.mxu0 }
 0x5fa   :  { %2000 = vmax.xlane.f32.xlu0 %v8520_v15  ;;  %v8531_v21 = vadd.f32 %v1959_v17, %v7860_v23  ;;  %v10346_v17 = vld [vmem:[#allocation27_spill] sm:$0xff] }
 0x5fb   :  { %v6164_v48 = vpop.f32.mrf.mxu0 }
 0x5fc   :  { %v8527_v58 = vadd.f32 %v6164_v48, %v10344_v37  ;;  %2010 = vmax.xlane.f32.xlu1 %v8523_v14 }
 0x5fd   :  { %v1962_v20 = vpop.f32.mrf.mxu0 }
 0x5fe   :  { %2012 = vmax.xlane.f32.xlu0 %v8527_v58  ;;  %v8535_v41 = vadd.f32 %v1962_v20, %v10345_v8  ;;  %v10347_v20 = vld [vmem:[#allocation31_spill] sm:$0xff] }
 0x5ff   :  { %v6167_v13 = vpop.f32.mrf.mxu0 }
 0x600   :  { %2006 = vmax.xlane.f32.xlu1 %v8531_v21  ;;  %v8539_v34 = vadd.f32 %v6167_v13, %v7878_v26  ;;  %v10348_v13 = vld [vmem:[#allocation28_spill] sm:$0xff] }
 0x601   :  { %v1975_v48 = vpop.f32.mrf.mxu0 }
 0x602   :  { %2008 = vmax.xlane.f32.xlu0 %v8535_v41  ;;  %v8544_v38 = vadd.f32 %v1975_v48, %v7894_v59  ;;  %v10350_v48 = vld [vmem:[#allocation77_spill] sm:$0xff] }
 0x603   :  { %v6168_v46 = vpop.f32.mrf.mxu0 }
 0x604   :  { %2018 = vmax.xlane.f32.xlu1 %v8539_v34  ;;  %v8558_v42 = vadd.f32 %v6168_v46, %v10350_v48 }
 0x605   :  { %v1978_v4 = vpop.f32.mrf.mxu0 }
 0x606   :  { %v8562_v22 = vadd.f32 %v1978_v4, %v10351_v7 }
 0x608   :  { %2014 = vmax.xlane.f32.xlu1 %v8544_v38 }
 0x618   :  { %2152 = vrot.lane.b32.xlu0 %v7606_v36, %s7327_s11 }
 0x619   :  { %2154 = vrot.lane.b32.xlu1 %v10346_v17, %s7327_s11 }
 0x61c   :  { %2148 = vrot.lane.b32.xlu0 %v10347_v20, %s7327_s11 }
 0x61d   :  { %2150 = vrot.lane.b32.xlu1 %v10348_v13, %s7327_s11 }
 0x621   :  { %2144 = vrot.lane.b32.xlu1 %v10349_v51, %s7327_s11 }
 0x63b   :  { %2020 = vmax.xlane.f32.xlu0 %v8558_v42 }
 0x63f   :  { %2016 = vmax.xlane.f32.xlu0 %v8562_v22 }
 0x655   :  { %2146 = vrot.lane.b32.xlu0 %v10352_v32, %s7327_s11 }
 0x673   :  { %v1995_v16 = vpop.xlane.xlu0 %1994 }
 0x674   :  { %v2024_v27 = vsub.f32 %v1936_v2, %v1995_v16 }
 0x676   :  { %v2042_v12 = vmul.f32 1.442695, %v2024_v27 }
 0x677   :  { %v1991_v1 = vpop.xlane.xlu0 %1990 }
 0x678   :  { %6846 = vpow2.f32 %v2042_v12  ;;  %v2022_v39 = vsub.f32 %v1928_v61, %v1991_v1 }
 0x679   :  { %v1993_v18 = vpop.xlane.xlu1 %1992 }
 0x67a   :  { %v2038_v46 = vmul.f32 1.442695, %v2022_v39  ;;  %v2023_v44 = vsub.f32 %v8509_v54, %v1993_v18 }
 0x67b   :  { %v1997_v43 = vpop.xlane.xlu0 %1996 }
 0x67c   :  { %6848 = vpow2.f32 %v2038_v46  ;;  %v2025_v33 = vsub.f32 %v1939_v24, %v1997_v43  ;;  %v2040_v57 = vmul.f32 1.442695, %v2023_v44 }
 0x67d   :  { %v2003_v4 = vpop.xlane.xlu1 %2002 }
 0x67e   :  { %v2044_v50 = vmul.f32 1.442695, %v2025_v33  ;;  %v2028_v11 = vsub.f32 %v1952_v63, %v2003_v4 }
 0x67f   :  { %v2005_v49 = vpop.xlane.xlu0 %2004 }
 0x680   :  { %6850 = vpow2.f32 %v2044_v50  ;;  %v2050_v28 = vmul.f32 1.442695, %v2028_v11  ;;  %v2029_v16 = vsub.f32 %v8515_v47, %v2005_v49 }
 0x681   :  { %v1999_v30 = vpop.xlane.xlu1 %1998 }
 0x682   :  { %6852 = vpow2.f32 %v2050_v28  ;;  %v2026_v27 = vsub.f32 %v1944_v6, %v1999_v30  ;;  %v2052_v18 = vmul.f32 1.442695, %v2029_v16 }
 0x683   :  { %v2001_v1 = vpop.xlane.xlu0 %2000  ;;  %6854 = vpow2.f32 %v2040_v57 }
 0x684   :  { %v2046_v39 = vmul.f32 1.442695, %v2026_v27  ;;  %v2027_v12 = vsub.f32 %v8520_v15, %v2001_v1 }
 0x685   :  { %v8570_v2 = vpop.eup %6846  ;;  %v2011_v43 = vpop.xlane.xlu1 %2010 }
 0x686   :  { %6856 = vpow2.f32 %v2046_v39  ;;  %v2048_v33 = vmul.f32 1.442695, %v2027_v12  ;;  %v2032_v44 = vsub.f32 %v8523_v14, %v2011_v43  ;;  %2074 = vadd.xlane.f32.xlu0 %v8570_v2 }
 0x687   :  { %v2013_v11 = vpop.xlane.xlu0 %2012 }
 0x688   :  { %6858 = vpow2.f32 %v2048_v33  ;;  %v2058_v57 = vmul.f32 1.442695, %v2032_v44  ;;  %v2033_v14 = vsub.f32 %v8527_v58, %v2013_v11 }
 0x689   :  { %v8574_v28 = vpop.eup %6848  ;;  %v2007_v30 = vpop.xlane.xlu1 %2006  ;;  %6860 = vpow2.f32 %v2052_v18 }
 0x68a   :  { %v2030_v49 = vsub.f32 %v8531_v21, %v2007_v30  ;;  %2070 = vadd.xlane.f32.xlu0 %v8574_v28  ;;  %6862 = vpow2.f32 %v2058_v57  ;;  %v2060_v4 = vmul.f32 1.442695, %v2033_v14 }
 0x68b   :  { %v2009_v50 = vpop.xlane.xlu0 %2008 }
 0x68c   :  { %v2031_v61 = vsub.f32 %v8535_v41, %v2009_v50  ;;  %v2054_v63 = vmul.f32 1.442695, %v2030_v49 }
 0x68d   :  { %v8579_v54 = vpop.eup %6850  ;;  %v2019_v24 = vpop.xlane.xlu1 %2018 }
 0x68e   :  { %v2056_v47 = vmul.f32 1.442695, %v2031_v61  ;;  %v2036_v6 = vsub.f32 %v8539_v34, %v2019_v24  ;;  %2076 = vadd.xlane.f32.xlu0 %v8579_v54 }
 0x68f   :  { %v8584_v15 = vpop.eup %6852  ;;  %v2153_v12 = vpop.permute.xlu0 %2152 }
 0x690   :  { %6864 = vpow2.f32 %v2056_v47  ;;  %v2066_v21 = vmul.f32 1.442695, %v2036_v6  ;;  %2082 = vadd.xlane.f32.xlu1 %v8584_v15  ;;  %v8587_v46 = vpop.eup %6854 }
 0x691   :  { %v2015_v41 = vpop.xlane.xlu1 %2014  ;;  %6866 = vpow2.f32 %v2054_v63  ;;  %v6239_v63 = vpop.f32.mrf.mxu0 }
 0x692   :  { %v2034_v58 = vsub.f32 %v8544_v38, %v2015_v41  ;;  %2072 = vadd.xlane.f32.xlu0 %v8587_v46  ;;  %6868 = vpow2.f32 %v2066_v21 }
 0x693   :  { %v8591_v16 = vpop.eup %6856  ;;  %6870 = vpow2.f32 %v2060_v4  ;;  %v2149_v44 = vpop.permute.xlu0 %2148 }
 0x694   :  { %2078 = vadd.xlane.f32.xlu1 %v8591_v16  ;;  %v2062_v1 = vmul.f32 1.442695, %v2034_v58  ;;  %v2522_v21 = vpop.f32.mrf.mxu0 }
 0x695   :  { %v8594_v34 = vpop.eup %6858  ;;  %v2155_v27 = vpop.permute.xlu1 %2154 }
 0x696   :  { %6171 = vmatprep.subr.bf16.mxu1 %v2155_v27  ;;  %2080 = vadd.xlane.f32.xlu0 %v8594_v34  ;;  %v8597_v39 = vpop.eup %6860  ;;  %6872 = vpow2.f32 %v2062_v1  ;;  %v6240_v4 = vpop.f32.mrf.mxu0 }
 0x697   :  { %6172 = vmatpush3.bf16.msra.mxu1 %v2155_v27  ;;  %v8600_v38 = vpop.eup %6862 }
 0x698   :  { %2084 = vadd.xlane.f32.xlu1 %v8597_v39  ;;  %6173 = vmatprep.subr.bf16.mxu1 %v2153_v12  ;;  %v2525_v27 = vpop.f32.mrf.mxu0 }
 0x699   :  { %v2151_v43 = vpop.permute.xlu1 %2150 }
 0x69a   :  { %v6243_v1 = vpop.f32.mrf.mxu0 }
 0x69b   :  { %6174 = vmatpush3.bf16.msra.mxu1 %v2153_v12  ;;  %v8631_v12 = vadd.f32 %v2525_v27, %v10340_v52 }
 0x69c   :  { %2090 = vadd.xlane.f32.xlu1 %v8600_v38  ;;  %6175 = vmatprep.subr.bf16.mxu1 %v2151_v43 }
 0x69d   :  { %v8603_v18 = vpop.eup %6864  ;;  %v2145_v41 = vpop.permute.xlu1 %2144 }
 0x69e   :  { %2088 = vadd.xlane.f32.xlu0 %v8603_v18  ;;  %v8606_v33 = vpop.eup %6866 }
 0x69f   :  { %6176 = vmatpush3.bf16.msra.mxu1 %v2151_v43  ;;  %v8609_v11 = vpop.eup %6868  ;;  %v2538_v43 = vpop.f32.mrf.mxu0 }
 0x6a0   :  { %2086 = vadd.xlane.f32.xlu1 %v8606_v33  ;;  %6177 = vmatprep.subr.bf16.mxu1 %v2149_v44  ;;  %v8612_v30 = vpop.eup %6870 }
 0x6a2   :  { %2098 = vadd.xlane.f32.xlu0 %v8609_v11 }
 0x6a3   :  { %6178 = vmatpush3.bf16.msra.mxu1 %v2149_v44  ;;  %v8615_v57 = vpop.eup %6872  ;;  %v8635_v44 = vadd.f32 %v6239_v63, %v10338_v10 }
 0x6a4   :  { %2092 = vadd.xlane.f32.xlu1 %v8612_v30 }
 0x6a8   :  { %2094 = vadd.xlane.f32.xlu1 %v8615_v57 }
 0x6c4   :  { %v2021_v49 = vpop.xlane.xlu0 %2020 }
 0x6c5   :  { %v2037_v50 = vsub.f32 %v8558_v42, %v2021_v49  ;;  %v8624_v42 = vadd.f32 %v2522_v21, %v10339_v5  ;;  %v6244_v49 = vpop.f32.mrf.mxu0  ;;  %v10353_v21 = vld [vmem:[#allocation36_spill] sm:$0xff] }
 0x6c7   :  { %v2068_v61 = vmul.f32 1.442695, %v2037_v50  ;;  %v8639_v50 = vadd.f32 %v6240_v4, %v10341_v40 }
 0x6c8   :  { %v2017_v14 = vpop.xlane.xlu0 %2016 }
 0x6c9   :  { %6874 = vpow2.f32 %v2068_v61  ;;  %v2035_v24 = vsub.f32 %v8562_v22, %v2017_v14  ;;  %v2541_v61 = vpop.f32.mrf.mxu0  ;;  %v8643_v14 = vadd.f32 %v2538_v43, %v7821_v60 }
 0x6cb   :  { %v2064_v47 = vmul.f32 1.442695, %v2035_v24  ;;  %v6247_v24 = vpop.f32.mrf.mxu0 }
 0x6cc   :  { %v2147_v6 = vpop.permute.xlu0 %2146 }
 0x6cd   :  { %6876 = vpow2.f32 %v2064_v47  ;;  %6179 = vmatprep.subr.bf16.mxu1 %v2147_v6  ;;  %v8647_v47 = vadd.f32 %v2541_v61, %v10343_v62  ;;  %v2554_v63 = vpop.f32.mrf.mxu0 }
 0x6ce   :  { %6180 = vmatpush3.bf16.msra.mxu1 %v2147_v6  ;;  %v8651_v6 = vadd.f32 %v6244_v49, %v10342_v29  ;;  %v8657_v4 = vadd.f32 %v2554_v63, %v7860_v23  ;;  %v8665_v49 = vadd.f32 %v6247_v24, %v7841_v3 }
 0x6cf   :  { %6181 = vmatprep.subr.bf16.mxu1 %v2145_v41 }
 0x6d2   :  { %6182 = vmatpush3.bf16.msra.mxu1 %v2145_v41  ;;  %v6248_v41 = vpop.f32.mrf.mxu0 }
 0x6d3   :  { %v8669_v31 = vadd.f32 %v6248_v41, %v10344_v37  ;;  %v8684_v41 = vadd.f32 %v6243_v1, %v7803_v19 }
 0x6d4   :  { %v2557_v27 = vpop.f32.mrf.mxu0 }
 0x6d5   :  { %v8661_v43 = vadd.f32 %v2557_v27, %v10345_v8 }
 0x6d6   :  { %v8620_v58 = vpop.eup %6874  ;;  %v6251_v61 = vpop.f32.mrf.mxu0 }
 0x6d7   :  { %2100 = vadd.xlane.f32.xlu1 %v8620_v58 }
 0x6d8   :  { %v2570_v35 = vpop.f32.mrf.mxu0 }
 0x6d9   :  { %v8673_v45 = vadd.f32 %v2570_v35, %v7894_v59  ;;  %v8689_v35 = vadd.f32 %v6251_v61, %v7878_v26 }
 0x6da   :  { %v8626_v22 = vpop.eup %6876  ;;  %v6252_v63 = vpop.f32.mrf.mxu0 }
 0x6db   :  { %2585 = vmax.xlane.f32.xlu1 %v8624_v42  ;;  %2096 = vadd.xlane.f32.xlu0 %v8626_v22  ;;  %v8681_v24 = vadd.f32 %v6252_v63, %v10350_v48 }
 0x6dc   :  { %v2573_v27 = vpop.f32.mrf.mxu0 }
 0x6dd   :  { %v8677_v55 = vadd.f32 %v2573_v27, %v10351_v7 }
 0x6df   :  { %2587 = vmax.xlane.f32.xlu1 %v8631_v12 }
 0x6e3   :  { %2589 = vmax.xlane.f32.xlu1 %v8635_v44 }
 0x6e7   :  { %2591 = vmax.xlane.f32.xlu1 %v8639_v50 }
 0x6eb   :  { %2593 = vmax.xlane.f32.xlu1 %v8643_v14 }
 0x6ef   :  { %2595 = vmax.xlane.f32.xlu1 %v8647_v47 }
 0x6f1   :  { %2142 = vrot.lane.b32.xlu0 %v10353_v21, %s7327_s11 }
 0x6f3   :  { %2599 = vmax.xlane.f32.xlu1 %v8651_v6 }
 0x6f7   :  { %2601 = vmax.xlane.f32.xlu1 %v8657_v4 }
 0x6fb   :  { %2603 = vmax.xlane.f32.xlu1 %v8661_v43 }
 0x6ff   :  { %2605 = vmax.xlane.f32.xlu1 %v8665_v49 }
 0x703   :  { %2607 = vmax.xlane.f32.xlu1 %v8669_v31 }
 0x707   :  { %2609 = vmax.xlane.f32.xlu1 %v8673_v45 }
 0x70b   :  { %2611 = vmax.xlane.f32.xlu1 %v8677_v55 }
 0x70f   :  { %2615 = vmax.xlane.f32.xlu1 %v8681_v24  ;;  %v2075_v9 = vpop.xlane.xlu0 %2074 }
 0x710   :  { %2597 = vmax.xlane.f32.xlu0 %v8684_v41 }
 0x713   :  { %v2071_v0 = vpop.xlane.xlu0 %2070 }
 0x714   :  { %2613 = vmax.xlane.f32.xlu0 %v8689_v35  ;;  %6878 = vrcp.f32 %v2071_v0 }
 0x717   :  { %v2077_v27 = vpop.xlane.xlu0 %2076 }
 0x71b   :  { %v2073_v7 = vpop.xlane.xlu0 %2072 }
 0x71c   :  { %6880 = vrcp.f32 %v2073_v7  ;;  %v2083_v7 = vpop.xlane.xlu1 %2082 }
 0x71d   :  { %6882 = vrcp.f32 %v2077_v27 }
 0x71f   :  { %v2081_v37 = vpop.xlane.xlu0 %2080 }
 0x720   :  { %2749 = vrot.lane.b32.xlu1 %v10346_v17, %s7328_s12  ;;  %v2079_v17 = vpop.xlane.xlu1 %2078  ;;  %6884 = vrcp.f32 %v2081_v37 }
 0x721   :  { %v6879_v1 = vpop.eup %6878  ;;  %6886 = vrcp.f32 %v2075_v9 }
 0x722   :  { %v2118_v61 = vmul.f32 %v6879_v1, %v8574_v28  ;;  %6888 = vrcp.f32 %v2079_v17 }
 0x724   :  { %2743 = vrot.lane.b32.xlu1 %v10347_v20, %s7328_s12  ;;  %v2085_v20 = vpop.xlane.xlu1 %2084 }
 0x725   :  { %6890 = vrcp.f32 %v2085_v20  ;;  %v646_v20 = vld [vmem:[#allocation7 + $0x48] sm:$0xff] }
 0x728   :  { %2741 = vrot.lane.b32.xlu1 %v10352_v32, %s7328_s12  ;;  %v2091_v32 = vpop.xlane.xlu1 %2090 }
 0x729   :  { %v6881_v63 = vpop.eup %6880 }
 0x72a   :  { %2751 = vrot.lane.b32.xlu0 %v10286_v53, %s7328_s12  ;;  %v2119_v0 = vmul.f32 %v6881_v63, %v8587_v46  ;;  %v2089_v53 = vpop.xlane.xlu0 %2088  ;;  %v647_v63 = vld [vmem:[#allocation7 + $0x50] sm:$0xff] }
 0x72c   :  { %v2134_v48 = vpack.c.bf16 %v2119_v0, %v2118_v61  ;;  %v2087_v59 = vpop.xlane.xlu1 %2086  ;;  %v648_v61 = vld [vmem:[#allocation7 + $0x58] sm:$0xff] }
 0x72d   :  { %6892 = vrcp.f32 %v2087_v59  ;;  %v8707_v37 = vpack.c.bf16 %v648_v61, %v647_v63 }
 0x72e   :  { %2747 = vrot.lane.b32.xlu0 %v7606_v36, %s7328_s12  ;;  %6185 = vmatprep.mubr.bf16.mxu1 %v2134_v48  ;;  %v2099_v36 = vpop.xlane.xlu0 %2098  ;;  %6894 = vrcp.f32 %v2083_v7  ;;  %v645_v7 = vld [vmem:[#allocation7 + $0x40] sm:$0xff] }
 0x72f   :  { %6896 = vrcp.f32 %v2089_v53  ;;  %10354 = vst [vmem:[#allocation48_spill] sm:$0xff] %v8707_v37 }
 0x730   :  { %v2093_v3 = vpop.xlane.xlu1 %2092 }
 0x731   :  { %6898 = vrcp.f32 %v2093_v3 }
 0x732   :  { %2745 = vrot.lane.b32.xlu0 %v10348_v13, %s7328_s12  ;;  %v6883_v13 = vpop.eup %6882 }
 0x733   :  { %v6885_v0 = vpop.eup %6884  ;;  %v2121_v9 = vmul.f32 %v6883_v13, %v8579_v54  ;;  %v8713_v54 = vpack.c.bf16 %v646_v20, %v645_v7 }
 0x734   :  { %v2095_v28 = vpop.xlane.xlu1 %2094  ;;  %v6887_v8 = vpop.eup %6886  ;;  %v2123_v17 = vmul.f32 %v6885_v0, %v8594_v34 }
 0x735   :  { %v6889_v23 = vpop.eup %6888  ;;  %v2120_v53 = vmul.f32 %v6887_v8, %v8570_v2  ;;  %10355 = vst [vmem:[#allocation44_spill] sm:$0xff] %v8713_v54 }
 0x736   :  { %v2122_v29 = vmul.f32 %v6889_v23, %v8591_v16  ;;  %v6891_v13 = vpop.eup %6890 }
 0x737   :  { %v2135_v3 = vpack.c.bf16 %v2121_v9, %v2120_v53  ;;  %v2125_v2 = vmul.f32 %v6891_v13, %v8597_v39 }
 0x738   :  { %v2136_v63 = vpack.c.bf16 %v2123_v17, %v2122_v29 }
 0x73a   :  { %v6893_v61 = vpop.eup %6892 }
 0x73b   :  { %v6895_v0 = vpop.eup %6894  ;;  %v2126_v29 = vmul.f32 %v6893_v61, %v8606_v33 }
 0x73c   :  { %v6897_v8 = vpop.eup %6896 }
 0x73e   :  { %v6899_v9 = vpop.eup %6898 }
 0x760   :  { %v2101_v48 = vpop.xlane.xlu1 %2100 }
 0x764   :  { %v2586_v46 = vpop.xlane.xlu1 %2585  ;;  %v2097_v1 = vpop.xlane.xlu0 %2096 }
 0x765   :  { %6900 = vrcp.f32 %v2097_v1  ;;  %v2617_v34 = vsub.f32 %v8624_v42, %v2586_v46  ;;  %v2127_v46 = vmul.f32 %v6897_v8, %v8603_v18 }
 0x766   :  { %6902 = vrcp.f32 %v2091_v32 }
 0x767   :  { %6904 = vrcp.f32 %v2095_v28  ;;  %v2633_v28 = vmul.f32 1.442695, %v2617_v34  ;;  %v2138_v39 = vpack.c.bf16 %v2127_v46, %v2126_v29 }
 0x768   :  { %v2588_v27 = vpop.xlane.xlu1 %2587  ;;  %v2143_v59 = vpop.permute.xlu0 %2142  ;;  %6906 = vrcp.f32 %v2101_v48 }
 0x769   :  { %6183 = vmatprep.subr.bf16.mxu1 %v2143_v59  ;;  %6908 = vrcp.f32 %v2099_v36  ;;  %v2618_v36 = vsub.f32 %v8631_v12, %v2588_v27 }
 0x76a   :  { %6184 = vmatpush3.bf16.msra.mxu1 %v2143_v59 }
 0x76b   :  { %6201 = vmatprep.subr.bf16.mxu1 %v8707_v37  ;;  %v2635_v53 = vmul.f32 1.442695, %v2618_v36 }
 0x76c   :  { %v2590_v1 = vpop.xlane.xlu1 %2589 }
 0x76d   :  { %v2619_v32 = vsub.f32 %v8635_v44, %v2590_v1  ;;  %6186 = vmatmul.mubr.bf16.vlgmr.msra.gmra.mxu1 %v2135_v3  ;;  %v2124_v44 = vmul.f32 %v6895_v0, %v8584_v15 }
 0x76e   :  { %6189 = vmatprep.mubr.bf16.mxu1 %v2136_v63  ;;  %6202 = vmatpush3.bf16.msra.mxu1 %v8707_v37 }
 0x76f   :  { %v2637_v23 = vmul.f32 1.442695, %v2619_v32  ;;  %6203 = vmatprep.subr.bf16.mxu1 %v8713_v54  ;;  %v2137_v48 = vpack.c.bf16 %v2125_v2, %v2124_v44 }
 0x770   :  { %v2592_v16 = vpop.xlane.xlu1 %2591 }
 0x771   :  { %6910 = vpow2.f32 %v2637_v23  ;;  %v2620_v42 = vsub.f32 %v8639_v50, %v2592_v16  ;;  %v2129_v50 = vmul.f32 %v6899_v9, %v8612_v30 }
 0x772   :  { %6204 = vmatpush3.bf16.msra.mxu1 %v8713_v54  ;;  %v6901_v17 = vpop.eup %6900  ;;  %6912 = vpow2.f32 %v2633_v28 }
 0x773   :  { %v2639_v7 = vmul.f32 1.442695, %v2620_v42  ;;  %v6903_v33 = vpop.eup %6902  ;;  %v2131_v18 = vmul.f32 %v6901_v17, %v8626_v22 }
 0x774   :  { %v2594_v59 = vpop.xlane.xlu1 %2593  ;;  %v6905_v20 = vpop.eup %6904  ;;  %v2128_v13 = vmul.f32 %v6903_v33, %v8600_v38 }
 0x775   :  { %6190 = vmatmul.mubr.bf16.gmra.mxu1 %v2137_v48  ;;  %6914 = vpow2.f32 %v2639_v7  ;;  %v2130_v1 = vmul.f32 %v6905_v20, %v8615_v57  ;;  %v6907_v12 = vpop.eup %6906  ;;  %v2621_v42 = vsub.f32 %v8643_v14, %v2594_v59 }
 0x776   :  { %6193 = vmatprep.mubr.bf16.mxu1 %v2138_v39  ;;  %v2139_v63 = vpack.c.bf16 %v2129_v50, %v2128_v13  ;;  %v6909_v34 = vpop.eup %6908  ;;  %6916 = vpow2.f32 %v2635_v53  ;;  %v2133_v22 = vmul.f32 %v6907_v12, %v8620_v58 }
 0x777   :  { %v2140_v61 = vpack.c.bf16 %v2131_v18, %v2130_v1  ;;  %v2132_v57 = vmul.f32 %v6909_v34, %v8609_v11  ;;  %v2641_v39 = vmul.f32 1.442695, %v2621_v42  ;;  %v6323_v1 = vpop.f32.mrf.mxu0 }
 0x778   :  { %v2596_v15 = vpop.xlane.xlu1 %2595 }
 0x779   :  { %v2622_v3 = vsub.f32 %v8647_v47, %v2596_v15  ;;  %v2141_v23 = vpack.c.bf16 %v2133_v22, %v2132_v57  ;;  %v3147_v12 = vpop.f32.mrf.mxu0 }
 0x77b   :  { %v2643_v32 = vmul.f32 1.442695, %v2622_v3 }
 0x77c   :  { %v2600_v27 = vpop.xlane.xlu1 %2599 }
 0x77d   :  { %6194 = vmatmul.mubr.bf16.gmra.mxu1 %v2139_v63  ;;  %6918 = vpow2.f32 %v2643_v32  ;;  %v2624_v17 = vsub.f32 %v8651_v6, %v2600_v27 }
 0x77e   :  { %v8731_v30 = vpop.eup %6910  ;;  %6197 = vmatprep.mubr.bf16.mxu1 %v2140_v61  ;;  %v6324_v61 = vpop.f32.mrf.mxu0 }
 0x77f   :  { %2669 = vadd.xlane.f32.xlu1 %v8731_v30  ;;  %v8737_v0 = vpop.eup %6912  ;;  %v2647_v50 = vmul.f32 1.442695, %v2624_v17 }
 0x780   :  { %v2602_v47 = vpop.xlane.xlu1 %2601  ;;  %v3150_v34 = vpop.f32.mrf.mxu0 }
 0x781   :  { %v2625_v38 = vsub.f32 %v8657_v4, %v2602_v47 }
 0x782   :  { %v8740_v2 = vpop.eup %6914  ;;  %v6327_v32 = vpop.f32.mrf.mxu0 }
 0x783   :  { %v2649_v8 = vmul.f32 1.442695, %v2625_v38  ;;  %2665 = vadd.xlane.f32.xlu1 %v8737_v0  ;;  %v8743_v58 = vpop.eup %6916 }
 0x784   :  { %v2604_v16 = vpop.xlane.xlu1 %2603  ;;  %v3163_v22 = vpop.f32.mrf.mxu0 }
 0x785   :  { %6920 = vpow2.f32 %v2649_v8  ;;  %6198 = vmatmul.mubr.bf16.gmra.mxu1 %v2141_v23 }
 0x786   :  { %v6328_v47 = vpop.f32.mrf.mxu0 }
 0x787   :  { %2671 = vadd.xlane.f32.xlu1 %v8740_v2 }
 0x788   :  { %v2606_v11 = vpop.xlane.xlu1 %2605  ;;  %v3166_v38 = vpop.f32.mrf.mxu0 }
 0x789   :  { %v2627_v14 = vsub.f32 %v8665_v49, %v2606_v11 }
 0x78a   :  { %v8746_v4 = vpop.eup %6918  ;;  %v6331_v57 = vpop.f32.mrf.mxu0 }
 0x78b   :  { %2667 = vadd.xlane.f32.xlu1 %v8743_v58 }
 0x78c   :  { %v2608_v28 = vpop.xlane.xlu1 %2607  ;;  %v3179_v23 = vpop.f32.mrf.mxu0 }
 0x78d   :  { %v2628_v6 = vsub.f32 %v8669_v31, %v2608_v28 }
 0x78e   :  { %v6332_v11 = vpop.f32.mrf.mxu0 }
 0x78f   :  { %2675 = vadd.xlane.f32.xlu1 %v8746_v4 }
 0x790   :  { %v2610_v48 = vpop.xlane.xlu1 %2609 }
 0x791   :  { %v2629_v7 = vsub.f32 %v8673_v45, %v2610_v48  ;;  %v2626_v45 = vsub.f32 %v8661_v43, %v2604_v16 }
 0x792   :  { %v8749_v29 = vpop.eup %6920 }
 0x793   :  { %2681 = vadd.xlane.f32.xlu1 %v8749_v29  ;;  %v2657_v59 = vmul.f32 1.442695, %v2629_v7  ;;  %v2651_v49 = vmul.f32 1.442695, %v2626_v45 }
 0x794   :  { %v2612_v8 = vpop.xlane.xlu1 %2611 }
 0x795   :  { %v2630_v16 = vsub.f32 %v8677_v55, %v2612_v8  ;;  %v8801_v55 = vpop.f32.mrf.mxu1 }
 0x797   :  { %v2659_v42 = vmul.f32 1.442695, %v2630_v16 }
 0x798   :  { %v2616_v28 = vpop.xlane.xlu1 %2615 }
 0x799   :  { %v2598_v44 = vpop.xlane.xlu0 %2597 }
 0x79a   :  { %v2623_v46 = vsub.f32 %v8684_v41, %v2598_v44  ;;  %v2653_v41 = vmul.f32 1.442695, %v2627_v14  ;;  %v2632_v44 = vsub.f32 %v8681_v24, %v2616_v28 }
 0x79c   :  { %v2645_v9 = vmul.f32 1.442695, %v2623_v46  ;;  %v3182_v46 = vpop.f32.mrf.mxu0  ;;  %v2663_v48 = vmul.f32 1.442695, %v2632_v44 }
 0x79d   :  { %v2614_v36 = vpop.xlane.xlu0 %2613 }
 0x79e   :  { %6922 = vpow2.f32 %v2645_v9  ;;  %v2631_v33 = vsub.f32 %v8689_v35, %v2614_v36  ;;  %v2655_v35 = vmul.f32 1.442695, %v2628_v6  ;;  %v6335_v9 = vpop.f32.mrf.mxu0  ;;  %v8838_v6 = vadd.f32 %v6324_v61, %v10341_v40  ;;  %v10358_v61 = vld [vmem:[#allocation69_spill] sm:$0xff] }
 0x79f   :  { %6924 = vpow2.f32 %v2641_v39  ;;  %v8803_v39 = vpop.f32.mrf.mxu1  ;;  %v10371_v40 = vld [vmem:[#allocation77_spill] sm:$0xff] }
 0x7a0   :  { %v2661_v20 = vmul.f32 1.442695, %v2631_v33  ;;  %v8816_v33 = vadd.f32 %v3147_v12, %v10339_v5  ;;  %v2750_v12 = vpop.permute.xlu1 %2749 }
 0x7a1   :  { %v8757_v15 = vpop.permute.xlu0 %2751  ;;  %v8808_v17 = vpop.f32.mrf.mxu1 }
 0x7a2   :  { %6926 = vpow2.f32 %v2661_v20  ;;  %6253 = vmatprep.subr.bf16.mxu1 %v8757_v15 }
 0x7a3   :  { %6928 = vpow2.f32 %v2647_v50  ;;  %v8813_v7 = vpop.f32.mrf.mxu1  ;;  %v8824_v50 = vadd.f32 %v3150_v34, %v10340_v52 }
 0x7a4   :  { %6930 = vpow2.f32 %v2657_v59  ;;  %10356 = vst [vmem:[#allocation45_spill] sm:$0xff] %v8813_v7  ;;  %v8832_v59 = vadd.f32 %v6323_v1, %v10338_v10  ;;  %v8850_v1 = vadd.f32 %v6327_v32, %v7803_v19  ;;  %v8864_v28 = vpop.permute.xlu1 %2743 }
 0x7a5   :  { %6932 = vpow2.f32 %v2653_v41  ;;  %v8821_v20 = vpop.f32.mrf.mxu1  ;;  %v2748_v52 = vpop.permute.xlu0 %2747 }
 0x7a6   :  { %6934 = vpow2.f32 %v2655_v35  ;;  %v8844_v35 = vadd.f32 %v3166_v38, %v10343_v62  ;;  %v10360_v38 = vld [vmem:[#allocation74_spill] sm:$0xff] }
 0x7a7   :  { %6936 = vpow2.f32 %v2651_v49  ;;  %v8829_v14 = vpop.f32.mrf.mxu1  ;;  %v8862_v16 = vadd.f32 %v3179_v23, %v10360_v38  ;;  %v3195_v23 = vpop.f32.mrf.mxu0  ;;  %v10368_v38 = vld [vmem:[#allocation78_spill] sm:$0xff] }
 0x7a8   :  { %6938 = vpow2.f32 %v2659_v42  ;;  %v10362_v42 = vld [vmem:[#allocation75_spill] sm:$0xff]  ;;  %v8890_v62 = vadd.f32 %v3195_v23, %v10368_v38 }
 0x7a9   :  { %6940 = vpow2.f32 %v2663_v48  ;;  %v8835_v41 = vpop.f32.mrf.mxu1  ;;  %v8870_v44 = vadd.f32 %v3182_v46, %v10362_v42  ;;  %v6336_v46 = vpop.f32.mrf.mxu0 }
 0x7aa   :  { %v8900_v5 = vadd.f32 %v6336_v46, %v10371_v40  ;;  %v2746_v23 = vpop.permute.xlu0 %2745 }
 0x7ab   :  { %v8763_v18 = vpop.eup %6922  ;;  %v8841_v45 = vpop.f32.mrf.mxu1 }
 0x7ac   :  { %2677 = vadd.xlane.f32.xlu0 %v8763_v18  ;;  %v8766_v53 = vpop.eup %6924  ;;  %10357 = vst [vmem:[#allocation41_spill] sm:$0xff] %v8841_v45 }
 0x7ad   :  { %v8847_v49 = vpop.f32.mrf.mxu1 }
 0x7af   :  { %v8768_v3 = vpop.eup %6926  ;;  %v8853_v34 = vpop.f32.mrf.mxu1 }
 0x7b0   :  { %2673 = vadd.xlane.f32.xlu0 %v8766_v53  ;;  %2693 = vadd.xlane.f32.xlu1 %v8768_v3  ;;  %v8772_v31 = vpop.eup %6928 }
 0x7b1   :  { %v8774_v43 = vpop.eup %6930  ;;  %v8859_v8 = vpop.f32.mrf.mxu1 }
 0x7b2   :  { %v8778_v13 = vpop.eup %6932  ;;  %10359 = vst [vmem:[#allocation42_spill] sm:$0xff] %v8859_v8 }
 0x7b3   :  { %v8781_v63 = vpop.eup %6934  ;;  %v8867_v32 = vpop.f32.mrf.mxu1 }
 0x7b4   :  { %2679 = vadd.xlane.f32.xlu0 %v8772_v31  ;;  %2689 = vadd.xlane.f32.xlu1 %v8774_v43  ;;  %v8784_v27 = vpop.eup %6936  ;;  %10361 = vst [vmem:[#allocation27_spill] sm:$0xff] %v8867_v32 }
 0x7b5   :  { %v8805_v24 = vpop.eup %6938  ;;  %v8875_v48 = vpop.f32.mrf.mxu1 }
 0x7b6   :  { %v8810_v36 = vpop.eup %6940  ;;  %10363 = vst [vmem:[#allocation31_spill] sm:$0xff] %v8875_v48 }
 0x7b8   :  { %2685 = vadd.xlane.f32.xlu0 %v8778_v13 }
 0x7bc   :  { %2687 = vadd.xlane.f32.xlu0 %v8781_v63 }
 0x7c0   :  { %2683 = vadd.xlane.f32.xlu0 %v8784_v27 }
 0x7c5   :  { %2737 = vrot.lane.b32.xlu1 %v10353_v21, %s7328_s12  ;;  %v8794_v21 = vadd.f32 %v3163_v22, %v7821_v60  ;;  %v8856_v22 = vadd.f32 %v6328_v47, %v10358_v61  ;;  %v8873_v47 = vpop.permute.xlu1 %2741  ;;  %v3198_v60 = vpop.f32.mrf.mxu0  ;;  %v10370_v61 = vld [vmem:[#allocation79_spill] sm:$0xff] }
 0x7c6   :  { %v8896_v19 = vadd.f32 %v3198_v60, %v10370_v61 }
 0x7d6   :  { %2739 = vrot.lane.b32.xlu0 %v10349_v51, %s7328_s12  ;;  %v8798_v51 = vadd.f32 %v6335_v9, %v7878_v26  ;;  %v10364_v9 = vld [vmem:[#allocation72_spill] sm:$0xff] }
 0x7d7   :  { %v8878_v54 = vadd.f32 %v6331_v57, %v10364_v9 }
 0x7e9   :  { %3218 = vmax.xlane.f32.xlu1 %v8794_v21 }
 0x7ed   :  { %3238 = vmax.xlane.f32.xlu1 %v8798_v51 }
 0x7f5   :  { %2691 = vadd.xlane.f32.xlu0 %v8805_v24 }
 0x7f9   :  { %2695 = vadd.xlane.f32.xlu0 %v8810_v36 }
 0x7fd   :  { %3210 = vmax.xlane.f32.xlu0 %v8816_v33 }
 0x7fe   :  { %3513 = vrot.lane.b32.xlu1 %v8369_v56, %s7325_s2  ;;  %v10366_v56 = vld [vmem:[#allocation73_spill] sm:$0xff] }
 0x7ff   :  { %v8884_v26 = vadd.f32 %v6332_v11, %v10366_v56 }
 0x801   :  { %3212 = vmax.xlane.f32.xlu0 %v8824_v50 }
 0x802   :  { %3509 = vrot.lane.b32.xlu1 %v8392_v25, %s7325_s2  ;;  %v8881_v25 = vpop.f32.mrf.mxu1 }
 0x803   :  { %10365 = vst [vmem:[#allocation28_spill] sm:$0xff] %v8881_v25 }
 0x804   :  { %v8887_v42 = vpop.f32.mrf.mxu1 }
 0x805   :  { %3214 = vmax.xlane.f32.xlu0 %v8832_v59  ;;  %10367 = vst [vmem:[#allocation35_spill] sm:$0xff] %v8887_v42 }
 0x806   :  { %v8893_v9 = vpop.f32.mrf.mxu1 }
 0x807   :  { %10369 = vst [vmem:[#allocation32_spill] sm:$0xff] %v8893_v9 }
 0x808   :  { %v2670_v37 = vpop.xlane.xlu1 %2669 }
 0x809   :  { %3216 = vmax.xlane.f32.xlu0 %v8838_v6 }
 0x80c   :  { %v2666_v57 = vpop.xlane.xlu1 %2665 }
 0x80d   :  { %3220 = vmax.xlane.f32.xlu0 %v8844_v35 }
 0x810   :  { %v2672_v56 = vpop.xlane.xlu1 %2671 }
 0x811   :  { %3222 = vmax.xlane.f32.xlu0 %v8850_v1 }
 0x814   :  { %v2668_v45 = vpop.xlane.xlu1 %2667 }
 0x815   :  { %3224 = vmax.xlane.f32.xlu0 %v8856_v22  ;;  %6942 = vrcp.f32 %v2668_v45 }
 0x816   :  { %6944 = vrcp.f32 %v2666_v57 }
 0x817   :  { %6946 = vrcp.f32 %v2672_v56 }
 0x818   :  { %v2676_v40 = vpop.xlane.xlu1 %2675 }
 0x819   :  { %3226 = vmax.xlane.f32.xlu0 %v8862_v16 }
 0x81d   :  { %3228 = vmax.xlane.f32.xlu0 %v8870_v44 }
 0x821   :  { %3230 = vmax.xlane.f32.xlu0 %v8878_v54 }
 0x825   :  { %3232 = vmax.xlane.f32.xlu0 %v8884_v26 }
 0x829   :  { %3234 = vmax.xlane.f32.xlu0 %v8890_v62 }
 0x82d   :  { %v6187_v11 = vpop.f32.mrf.mxu1  ;;  %3236 = vmax.xlane.f32.xlu0 %v8896_v19 }
 0x82f   :  { %v2200_v10 = vpop.f32.mrf.mxu1 }
 0x831   :  { %v6188_v38 = vpop.f32.mrf.mxu1  ;;  %3240 = vmax.xlane.f32.xlu0 %v8900_v5 }
 0x832   :  { %v2264_v9 = vpack.c.bf16 %v6188_v38, %v6187_v11 }
 0x833   :  { %v2203_v32 = vpop.f32.mrf.mxu1 }
 0x834   :  { %v2263_v7 = vpack.c.bf16 %v2203_v32, %v2200_v10 }
 0x835   :  { %v6191_v42 = vpop.f32.mrf.mxu1  ;;  %v2678_v60 = vpop.xlane.xlu0 %2677 }
 0x836   :  { %6205 = vmatprep.mubr.msk.bf16.mxu1 %vm686_vm0, %v2263_v7 }
 0x837   :  { %v2216_v61 = vpop.f32.mrf.mxu1  ;;  %6206 = vmatmul.mubr.msk.bf16.vlgmr.msra.gmra.mxu1 %vm686_vm0, %v2264_v9  ;;  %v2682_v9 = vpop.xlane.xlu1 %2681 }
 0x838   :  { %6254 = vmatpush3.bf16.msra.mxu1 %v8757_v15 }
 0x839   :  { %6255 = vmatprep.subr.bf16.mxu1 %v2750_v12  ;;  %v6192_v46 = vpop.f32.mrf.mxu1  ;;  %v2674_v25 = vpop.xlane.xlu0 %2673 }
 0x83a   :  { %v2266_v10 = vpack.c.bf16 %v6192_v46, %v6191_v42  ;;  %6948 = vrcp.f32 %v2674_v25  ;;  %v10372_v25 = vld [vmem:[#allocation19_spill] sm:$0xff] }
 0x83b   :  { %v2219_v48 = vpop.f32.mrf.mxu1  ;;  %6950 = vrcp.f32 %v2670_v37 }
 0x83c   :  { %v2265_v8 = vpack.c.bf16 %v2219_v48, %v2216_v61  ;;  %6256 = vmatpush3.bf16.msra.mxu1 %v2750_v12  ;;  %6952 = vrcp.f32 %v2676_v40  ;;  %v8908_v12 = vpop.xlane.xlu1 %2693 }
 0x83d   :  { %6257 = vmatprep.subr.bf16.mxu1 %v2748_v52  ;;  %v6195_v38 = vpop.f32.mrf.mxu1  ;;  %v2680_v32 = vpop.xlane.xlu0 %2679 }
 0x83e   :  { %6209 = vmatprep.mubr.msk.bf16.mxu1 %vm686_vm0, %v2265_v8  ;;  %6954 = vrcp.f32 %v2680_v32 }
 0x83f   :  { %v2232_v7 = vpop.f32.mrf.mxu1  ;;  %6210 = vmatmul.mubr.msk.bf16.gmra.mxu1 %vm686_vm0, %v2266_v10  ;;  %6956 = vrcp.f32 %v2678_v60  ;;  %v652_v60 = vld [vmem:[#allocation7 + $0x78] sm:$0xff] }
 0x840   :  { %6258 = vmatpush3.bf16.msra.mxu1 %v2748_v52  ;;  %v6943_v52 = vpop.eup %6942  ;;  %v2690_v11 = vpop.xlane.xlu1 %2689 }
 0x841   :  { %6259 = vmatprep.subr.bf16.mxu1 %v2746_v23  ;;  %v6196_v15 = vpop.f32.mrf.mxu1  ;;  %v2686_v45 = vpop.xlane.xlu0 %2685  ;;  %v2714_v46 = vmul.f32 %v6943_v52, %v8743_v58 }
 0x842   :  { %v2268_v42 = vpack.c.bf16 %v6196_v15, %v6195_v38  ;;  %v6945_v40 = vpop.eup %6944 }
 0x843   :  { %v2235_v57 = vpop.f32.mrf.mxu1 }
 0x844   :  { %v2267_v61 = vpack.c.bf16 %v2235_v57, %v2232_v7  ;;  %6260 = vmatpush3.bf16.msra.mxu1 %v2746_v23  ;;  %v2713_v7 = vmul.f32 %v6945_v40, %v8737_v0  ;;  %v2738_v52 = vpop.permute.xlu1 %2737  ;;  %v650_v40 = vld [vmem:[#allocation7 + $0x68] sm:$0xff] }
 0x845   :  { %6261 = vmatprep.subr.bf16.mxu1 %v8864_v28  ;;  %v6199_v8 = vpop.f32.mrf.mxu1  ;;  %v2688_v48 = vpop.xlane.xlu0 %2687 }
 0x846   :  { %6213 = vmatprep.mubr.msk.bf16.mxu1 %vm686_vm0, %v2267_v61  ;;  %v2729_v32 = vpack.c.bf16 %v2714_v46, %v2713_v7  ;;  %v651_v61 = vld [vmem:[#allocation7 + $0x70] sm:$0xff] }
 0x847   :  { %v2248_v56 = vpop.f32.mrf.mxu1  ;;  %6214 = vmatmul.mubr.msk.bf16.gmra.mxu1 %vm686_vm0, %v2268_v42  ;;  %3511 = vrot.lane.b32.xlu0 %v10372_v25, %s7325_s2  ;;  %v8923_v0 = vpack.c.bf16 %v652_v60, %v651_v61 }
 0x848   :  { %6262 = vmatpush3.bf16.msra.mxu1 %v8864_v28  ;;  %v6947_v28 = vpop.eup %6946 }
 0x849   :  { %6263 = vmatprep.subr.bf16.mxu1 %v8873_v47  ;;  %v6200_v37 = vpop.f32.mrf.mxu1  ;;  %v2684_v23 = vpop.xlane.xlu0 %2683  ;;  %10373 = vst [vmem:[#allocation36_spill] sm:$0xff] %v8923_v0 }
 0x84a   :  { %6958 = vrcp.f32 %v2684_v23  ;;  %v2270_v15 = vpack.c.bf16 %v6200_v37, %v6199_v8  ;;  %v6949_v42 = vpop.eup %6948 }
 0x84b   :  { %v2251_v10 = vpop.f32.mrf.mxu1  ;;  %6960 = vrcp.f32 %v2682_v9  ;;  %v6951_v58 = vpop.eup %6950  ;;  %v2717_v8 = vmul.f32 %v6949_v42, %v8766_v53 }
 0x84c   :  { %v2269_v38 = vpack.c.bf16 %v2251_v10, %v2248_v56  ;;  %6264 = vmatpush3.bf16.msra.mxu1 %v8873_v47  ;;  %v6953_v9 = vpop.eup %6952  ;;  %v2716_v47 = vmul.f32 %v6947_v28, %v8740_v2  ;;  %6962 = vrcp.f32 %v2688_v48  ;;  %v649_v56 = vld [vmem:[#allocation7 + $0x60] sm:$0xff]  ;;  %v2715_v37 = vmul.f32 %v6951_v58, %v8731_v30  ;;  %v10375_v28 = vld [vmem:[#allocation39_spill] sm:$0xff] }
 0x84d   :  { %v2740_v57 = vpop.permute.xlu0 %2739  ;;  %6964 = vrcp.f32 %v2686_v45  ;;  %v2718_v23 = vmul.f32 %v6953_v9, %v8746_v4  ;;  %v8929_v10 = vpack.c.bf16 %v650_v40, %v649_v56  ;;  %v6955_v2 = vpop.eup %6954 }
 0x84e   :  { %6217 = vmatprep.mubr.msk.bf16.mxu1 %vm686_vm0, %v2269_v38  ;;  %6265 = vmatprep.subr.bf16.mxu1 %v2740_v57  ;;  %v2730_v46 = vpack.c.bf16 %v2716_v47, %v2715_v37  ;;  %v6957_v38 = vpop.eup %6956  ;;  %v2720_v30 = vmul.f32 %v6955_v2, %v8772_v31  ;;  %6966 = vrcp.f32 %v2690_v11 }
 0x84f   :  { %6218 = vmatmul.mubr.msk.bf16.gmra.mxu1 %vm686_vm0, %v2270_v15  ;;  %10374 = vst [vmem:[#allocation19_spill] sm:$0xff] %v8929_v10  ;;  %v2731_v48 = vpack.c.bf16 %v2718_v23, %v2717_v8  ;;  %v2719_v45 = vmul.f32 %v6957_v38, %v8763_v18 }
 0x850   :  { %6266 = vmatpush3.bf16.msra.mxu1 %v2740_v57  ;;  %6269 = vmatprep.mubr.bf16.mxu1 %v2729_v32 }
 0x851   :  { %6267 = vmatprep.subr.bf16.mxu1 %v2738_v52  ;;  %v2732_v57 = vpack.c.bf16 %v2720_v30, %v2719_v45 }
 0x854   :  { %6268 = vmatpush3.bf16.msra.mxu1 %v2738_v52 }
 0x855   :  { %6285 = vmatprep.subr.bf16.mxu1 %v8923_v0 }
 0x857   :  { %6270 = vmatmul.mubr.bf16.vlgmr.msra.gmra.mxu1 %v2730_v46  ;;  %v6959_v7 = vpop.eup %6958 }
 0x858   :  { %6286 = vmatpush3.bf16.msra.mxu1 %v8923_v0  ;;  %6273 = vmatprep.mubr.bf16.mxu1 %v2731_v48  ;;  %v6961_v53 = vpop.eup %6960  ;;  %v2722_v4 = vmul.f32 %v6959_v7, %v8784_v27 }
 0x859   :  { %6287 = vmatprep.subr.bf16.mxu1 %v8929_v10  ;;  %v2721_v15 = vmul.f32 %v6961_v53, %v8749_v29  ;;  %v6963_v32 = vpop.eup %6962 }
 0x85a   :  { %v6965_v60 = vpop.eup %6964  ;;  %v2724_v42 = vmul.f32 %v6963_v32, %v8781_v63 }
 0x85b   :  { %v2733_v61 = vpack.c.bf16 %v2722_v4, %v2721_v15  ;;  %v2723_v31 = vmul.f32 %v6965_v60, %v8778_v13  ;;  %v6967_v52 = vpop.eup %6966 }
 0x85c   :  { %6288 = vmatpush3.bf16.msra.mxu1 %v8929_v10  ;;  %v2725_v8 = vmul.f32 %v6967_v52, %v8774_v43 }
 0x85d   :  { %6337 = vmatprep.subr.bf16.mxu1 %v10375_v28  ;;  %v2734_v58 = vpack.c.bf16 %v2724_v42, %v2723_v31 }
 0x85f   :  { %6274 = vmatmul.mubr.bf16.gmra.mxu1 %v2732_v57 }
 0x860   :  { %6277 = vmatprep.mubr.bf16.mxu1 %v2733_v61 }
 0x867   :  { %6278 = vmatmul.mubr.bf16.gmra.mxu1 %v2734_v58  ;;  %v10376_v58 = vld [vmem:[#allocation18_spill] sm:$0xff] }
 0x872   :  { %v3219_v30 = vpop.xlane.xlu1 %3218 }
 0x87e   :  { %v2692_v18 = vpop.xlane.xlu0 %2691 }
 0x87f   :  { %6968 = vrcp.f32 %v2692_v18 }
 0x880   :  { %6970 = vrcp.f32 %v8908_v12 }
 0x882   :  { %v2696_v29 = vpop.xlane.xlu0 %2695 }
 0x883   :  { %6972 = vrcp.f32 %v2696_v29  ;;  %v10377_v29 = vld [vmem:[#allocation21_spill] sm:$0xff] }
 0x886   :  { %v3211_v27 = vpop.xlane.xlu0 %3210 }
 0x887   :  { %v3242_v13 = vsub.f32 %v8816_v33, %v3211_v27  ;;  %v10378_v27 = vld [vmem:[#allocation12_spill] sm:$0xff] }
 0x889   :  { %v3258_v48 = vmul.f32 1.442695, %v3242_v13 }
 0x88a   :  { %v3213_v9 = vpop.xlane.xlu0 %3212 }
 0x88b   :  { %v3243_v43 = vsub.f32 %v8824_v50, %v3213_v9 }
 0x88c   :  { %v6969_v47 = vpop.eup %6968 }
 0x88d   :  { %v2726_v56 = vmul.f32 %v6969_v47, %v8805_v24  ;;  %v6971_v63 = vpop.eup %6970  ;;  %v3260_v53 = vmul.f32 1.442695, %v3243_v43 }
 0x88e   :  { %v3215_v40 = vpop.xlane.xlu0 %3214  ;;  %v2727_v12 = vmul.f32 %v6971_v63, %v8768_v3  ;;  %v3246_v3 = vsub.f32 %v8794_v21, %v3219_v30  ;;  %v10379_v30 = vld [vmem:[#allocation22_spill] sm:$0xff] }
 0x88f   :  { %v3244_v11 = vsub.f32 %v8832_v59, %v3215_v40  ;;  %v2735_v37 = vpack.c.bf16 %v2726_v56, %v2725_v8 }
 0x890   :  { %v6973_v23 = vpop.eup %6972  ;;  %v3266_v15 = vmul.f32 1.442695, %v3246_v3 }
 0x891   :  { %v3262_v46 = vmul.f32 1.442695, %v3244_v11  ;;  %6281 = vmatprep.mubr.bf16.mxu1 %v2735_v37  ;;  %v2728_v2 = vmul.f32 %v6973_v23, %v8810_v36 }
 0x892   :  { %v3217_v38 = vpop.xlane.xlu0 %3216 }
 0x893   :  { %6974 = vpow2.f32 %v3262_v46  ;;  %v3245_v24 = vsub.f32 %v8838_v6, %v3217_v38  ;;  %v2736_v7 = vpack.c.bf16 %v2728_v2, %v2727_v12 }
 0x894   :  { %6976 = vpow2.f32 %v3258_v48 }
 0x895   :  { %v3264_v33 = vmul.f32 1.442695, %v3245_v24  ;;  %6282 = vmatmul.mubr.bf16.gmra.mxu1 %v2736_v7 }
 0x896   :  { %v3221_v59 = vpop.xlane.xlu0 %3220 }
 0x897   :  { %6978 = vpow2.f32 %v3264_v33  ;;  %v3247_v8 = vsub.f32 %v8844_v35, %v3221_v59 }
 0x898   :  { %6980 = vpow2.f32 %v3260_v53 }
 0x899   :  { %v3268_v13 = vmul.f32 1.442695, %v3247_v8  ;;  %v10384_v8 = vld [vmem:[#allocation13_spill] sm:$0xff] }
 0x89a   :  { %v3223_v4 = vpop.xlane.xlu0 %3222 }
 0x89b   :  { %v3248_v36 = vsub.f32 %v8850_v1, %v3223_v4  ;;  %v1759_v4 = vadd.f32 %v8801_v55, %v10379_v30 }
 0x89d   :  { %v3270_v45 = vmul.f32 1.442695, %v3248_v36  ;;  %v10381_v36 = vld [vmem:[#allocation24_spill] sm:$0xff] }
 0x89e   :  { %v3225_v32 = vpop.xlane.xlu0 %3224 }
 0x89f   :  { %6982 = vpow2.f32 %v3270_v45  ;;  %v3249_v9 = vsub.f32 %v8856_v22, %v3225_v32  ;;  %v1751_v45 = vadd.f32 %v8803_v39, %v10381_v36 }
 0x8a0   :  { %v8952_v50 = vpop.eup %6974  ;;  %6984 = vpow2.f32 %v3266_v15 }
 0x8a1   :  { %3294 = vadd.xlane.f32.xlu1 %v8952_v50  ;;  %v8955_v6 = vpop.eup %6976  ;;  %v3272_v56 = vmul.f32 1.442695, %v3249_v9 }
 0x8a2   :  { %v3227_v61 = vpop.xlane.xlu0 %3226 }
 0x8a3   :  { %6986 = vpow2.f32 %v3272_v56  ;;  %v3250_v37 = vsub.f32 %v8862_v16, %v3227_v61  ;;  %v1775_v56 = vadd.f32 %v8821_v20, %v10384_v8 }
 0x8a4   :  { %v8957_v57 = vpop.eup %6978  ;;  %6988 = vpow2.f32 %v3268_v13  ;;  %v10386_v13 = vld [vmem:[#allocation62_spill] sm:$0xff] }
 0x8a5   :  { %3290 = vadd.xlane.f32.xlu1 %v8955_v6  ;;  %3296 = vadd.xlane.f32.xlu0 %v8957_v57  ;;  %v8961_v21 = vpop.eup %6980  ;;  %v3274_v46 = vmul.f32 1.442695, %v3250_v37 }
 0x8a6   :  { %v3229_v42 = vpop.xlane.xlu0 %3228 }
 0x8a7   :  { %v3251_v35 = vsub.f32 %v8870_v44, %v3229_v42  ;;  %v10382_v42 = vld [vmem:[#allocation25_spill] sm:$0xff] }
 0x8a9   :  { %3292 = vadd.xlane.f32.xlu0 %v8961_v21  ;;  %v3276_v16 = vmul.f32 1.442695, %v3251_v35 }
 0x8aa   :  { %v3231_v31 = vpop.xlane.xlu0 %3230 }
 0x8ab   :  { %v3252_v40 = vsub.f32 %v8878_v54, %v3231_v31  ;;  %v1762_v31 = vadd.f32 %v8808_v17, %v10382_v42 }
 0x8ac   :  { %v8964_v1 = vpop.eup %6982 }
 0x8ad   :  { %3302 = vadd.xlane.f32.xlu1 %v8964_v1  ;;  %v8967_v60 = vpop.eup %6984  ;;  %v3278_v23 = vmul.f32 1.442695, %v3252_v40  ;;  %v1767_v40 = vadd.f32 %v8829_v14, %v10386_v13  ;;  %v10397_v13 = vld [vmem:[#allocation35_spill] sm:$0xff] }
 0x8ae   :  { %v3233_v18 = vpop.xlane.xlu0 %3232 }
 0x8af   :  { %v3253_v22 = vsub.f32 %v8884_v26, %v3233_v18 }
 0x8b0   :  { %v8983_v2 = vpop.eup %6986 }
 0x8b1   :  { %3298 = vadd.xlane.f32.xlu1 %v8967_v60  ;;  %v3280_v12 = vmul.f32 1.442695, %v3253_v22  ;;  %v8986_v54 = vpop.eup %6988 }
 0x8b2   :  { %v3235_v52 = vpop.xlane.xlu0 %3234 }
 0x8b3   :  { %v3254_v44 = vsub.f32 %v8890_v62, %v3235_v52  ;;  %v10383_v52 = vld [vmem:[#allocation55_spill] sm:$0xff] }
 0x8b5   :  { %v3282_v7 = vmul.f32 1.442695, %v3254_v44 }
 0x8b6   :  { %v3237_v47 = vpop.xlane.xlu0 %3236 }
 0x8b7   :  { %v3255_v63 = vsub.f32 %v8896_v19, %v3237_v47  ;;  %v3239_v19 = vpop.xlane.xlu1 %3238 }
 0x8b8   :  { %v3256_v48 = vsub.f32 %v8798_v51, %v3239_v19 }
 0x8b9   :  { %v3284_v11 = vmul.f32 1.442695, %v3255_v63  ;;  %v10385_v63 = vld [vmem:[#allocation61_spill] sm:$0xff] }
 0x8ba   :  { %v3286_v26 = vmul.f32 1.442695, %v3256_v48  ;;  %v3241_v24 = vpop.xlane.xlu0 %3240  ;;  %v10388_v48 = vld [vmem:[#allocation60_spill] sm:$0xff] }
 0x8bb   :  { %6990 = vpow2.f32 %v3284_v11  ;;  %v3257_v51 = vsub.f32 %v8900_v5, %v3241_v24  ;;  %v10380_v5 = vld [vmem:[#allocation23_spill] sm:$0xff]  ;;  %v1791_v14 = vadd.f32 %v8847_v49, %v10388_v48 }
 0x8bc   :  { %6992 = vpow2.f32 %v3278_v23 }
 0x8bd   :  { %6994 = vpow2.f32 %v3274_v46  ;;  %v3288_v59 = vmul.f32 1.442695, %v3257_v51  ;;  %v10387_v46 = vld [vmem:[#allocation80_spill] sm:$0xff]  ;;  %v10391_v51 = vld [vmem:[#allocation42_spill] sm:$0xff] }
 0x8be   :  { %6996 = vpow2.f32 %v3280_v12  ;;  %v1778_v22 = vadd.f32 %v8835_v41, %v10387_v46  ;;  %v10390_v41 = vld [vmem:[#allocation57_spill] sm:$0xff] }
 0x8bf   :  { %3505 = vrot.lane.b32.xlu0 %v10376_v58, %s7325_s2  ;;  %6998 = vpow2.f32 %v3276_v16 }
 0x8c0   :  { %7000 = vpow2.f32 %v3286_v26  ;;  %v10389_v26 = vld [vmem:[#allocation56_spill] sm:$0xff] }
 0x8c1   :  { %7002 = vpow2.f32 %v3282_v7  ;;  %v1783_v44 = vadd.f32 %v8853_v34, %v10389_v26 }
 0x8c2   :  { %3507 = vrot.lane.b32.xlu1 %v10377_v29, %s7325_s2  ;;  %7004 = vpow2.f32 %v3288_v59  ;;  %v1794_v59 = vadd.f32 %v10391_v51, %v10390_v41 }
 0x8c3   :  { %3503 = vrot.lane.b32.xlu0 %v10378_v27, %s7325_s2 }
 0x8c8   :  { %v8989_v38 = vpop.eup %6990 }
 0x8c9   :  { %v8994_v43 = vpop.eup %6992 }
 0x8ca   :  { %v8998_v33 = vpop.eup %6994 }
 0x8cb   :  { %v9001_v53 = vpop.eup %6996 }
 0x8cc   :  { %v9004_v62 = vpop.eup %6998 }
 0x8cd   :  { %v9015_v32 = vpop.eup %7000 }
 0x8ce   :  { %v9026_v47 = vpop.eup %7002 }
 0x8cf   :  { %v9039_v37 = vpop.eup %7004 }
 0x8e2   :  { %3304 = vadd.xlane.f32.xlu0 %v8983_v2 }
 0x8e6   :  { %3300 = vadd.xlane.f32.xlu0 %v8986_v54  ;;  %3316 = vadd.xlane.f32.xlu1 %v8989_v38 }
 0x8ea   :  { %3310 = vadd.xlane.f32.xlu0 %v8994_v43 }
 0x8ee   :  { %3306 = vadd.xlane.f32.xlu0 %v8998_v33 }
 0x8f2   :  { %3312 = vadd.xlane.f32.xlu0 %v9001_v53 }
 0x8f6   :  { %3308 = vadd.xlane.f32.xlu0 %v9004_v62 }
 0x8f7   :  { %v6207_v3 = vpop.f32.mrf.mxu1  ;;  %3499 = vrot.lane.b32.xlu1 %v10380_v5, %s7325_s2 }
 0x8f8   :  { %v9013_v15 = vadd.f32 %v6207_v3, %v1759_v4 }
 0x8f9   :  { %v2329_v61 = vpop.f32.mrf.mxu1 }
 0x8fa   :  { %v9019_v18 = vadd.f32 %v2329_v61, %v1751_v45  ;;  %3318 = vadd.xlane.f32.xlu0 %v9015_v32  ;;  %v10392_v45 = vld [vmem:[#allocation54_spill] sm:$0xff]  ;;  %v10393_v61 = vld [vmem:[#allocation31_spill] sm:$0xff] }
 0x8fb   :  { %v6208_v55 = vpop.f32.mrf.mxu1  ;;  %3483 = vrot.lane.b32.xlu1 %v10383_v52, %s7325_s2  ;;  %v1807_v49 = vadd.f32 %v10393_v61, %v10392_v45  ;;  %v10401_v61 = vld [vmem:[#allocation40_spill] sm:$0xff] }
 0x8fc   :  { %v9024_v9 = vadd.f32 %v6208_v55, %v1762_v31  ;;  %v10394_v31 = vld [vmem:[#allocation50_spill] sm:$0xff]  ;;  %v10395_v55 = vld [vmem:[#allocation28_spill] sm:$0xff] }
 0x8fd   :  { %v9028_v39 = vpop.f32.mrf.mxu1  ;;  %v1799_v34 = vadd.f32 %v10395_v55, %v10394_v31 }
 0x8fe   :  { %3314 = vadd.xlane.f32.xlu0 %v9026_v47 }
 0x8ff   :  { %v6211_v17 = vpop.f32.mrf.mxu1  ;;  %3487 = vrot.lane.b32.xlu1 %v10385_v63, %s7325_s2 }
 0x900   :  { %v9037_v11 = vadd.f32 %v6211_v17, %v1775_v56  ;;  %v10396_v17 = vld [vmem:[#allocation51_spill] sm:$0xff] }
 0x901   :  { %v2345_v23 = vpop.f32.mrf.mxu1 }
 0x902   :  { %v9043_v35 = vadd.f32 %v2345_v23, %v1767_v40  ;;  %3320 = vadd.xlane.f32.xlu0 %v9039_v37  ;;  %v1810_v40 = vadd.f32 %v10397_v13, %v10396_v17  ;;  %v10404_v13 = vld [vmem:[#allocation52_spill] sm:$0xff] }
 0x903   :  { %v6212_v20 = vpop.f32.mrf.mxu1 }
 0x904   :  { %v9046_v12 = vadd.f32 %v6212_v20, %v1778_v22 }
 0x905   :  { %v9048_v19 = vpop.f32.mrf.mxu1 }
 0x907   :  { %v6215_v16 = vpop.f32.mrf.mxu1 }
 0x908   :  { %v9054_v24 = vadd.f32 %v6215_v16, %v1791_v14  ;;  %v10398_v14 = vld [vmem:[#allocation20_spill] sm:$0xff] }
 0x909   :  { %v2361_v7 = vpop.f32.mrf.mxu1 }
 0x90a   :  { %v9058_v30 = vadd.f32 %v2361_v7, %v1783_v44  ;;  %v10399_v44 = vld [vmem:[#allocation43_spill] sm:$0xff] }
 0x90b   :  { %v6216_v4 = vpop.f32.mrf.mxu1 }
 0x90c   :  { %v9060_v3 = vadd.f32 %v6216_v4, %v1794_v59  ;;  %v10400_v4 = vld [vmem:[#allocation46_spill] sm:$0xff] }
 0x90d   :  { %v9062_v36 = vpop.f32.mrf.mxu1 }
 0x90f   :  { %v6219_v42 = vpop.f32.mrf.mxu1 }
 0x910   :  { %v9068_v8 = vadd.f32 %v6219_v42, %v1807_v49  ;;  %v10402_v42 = vld [vmem:[#allocation49_spill] sm:$0xff] }
 0x911   :  { %v2377_v56 = vpop.f32.mrf.mxu1 }
 0x912   :  { %v9072_v23 = vadd.f32 %v2377_v56, %v1799_v34  ;;  %v10403_v56 = vld [vmem:[#allocation37_spill] sm:$0xff] }
 0x913   :  { %v6220_v46 = vpop.f32.mrf.mxu1 }
 0x914   :  { %v9074_v22 = vadd.f32 %v6220_v46, %v1810_v40  ;;  %v10405_v46 = vld [vmem:[#allocation38_spill] sm:$0xff] }
 0x915   :  { %v9076_v20 = vpop.f32.mrf.mxu1 }
 0x917   :  { %v6271_v48 = vpop.f32.mrf.mxu1 }
 0x918   :  { %3501 = vrot.lane.b32.xlu0 %v10398_v14, %s7325_s2 }
 0x919   :  { %v2795_v16 = vpop.f32.mrf.mxu1 }
 0x91b   :  { %v6272_v26 = vpop.f32.mrf.mxu1 }
 0x91c   :  { %3475 = vrot.lane.b32.xlu0 %v10399_v44, %s7325_s2  ;;  %v2859_v51 = vpack.c.bf16 %v6272_v26, %v6271_v48 }
 0x91d   :  { %v2798_v7 = vpop.f32.mrf.mxu1 }
 0x91e   :  { %v2858_v41 = vpack.c.bf16 %v2798_v7, %v2795_v16  ;;  %v10406_v16 = vld [vmem:[#allocation58_spill] sm:$0xff] }
 0x91f   :  { %v6275_v59 = vpop.f32.mrf.mxu1 }
 0x920   :  { %6289 = vmatprep.mubr.msk.bf16.mxu1 %vm686_vm0, %v2858_v41  ;;  %3477 = vrot.lane.b32.xlu0 %v10400_v4, %s7325_s2 }
 0x921   :  { %v2811_v45 = vpop.f32.mrf.mxu1  ;;  %6290 = vmatmul.mubr.msk.bf16.vlgmr.msra.gmra.mxu1 %vm686_vm0, %v2859_v51  ;;  %v10407_v51 = vld [vmem:[#allocation33_spill] sm:$0xff] }
 0x922   :  { %6338 = vmatpush3.bf16.msra.mxu1 %v10375_v28 }
 0x923   :  { %6339 = vmatprep.subr.bf16.mxu1 %v10401_v61  ;;  %v6276_v49 = vpop.f32.mrf.mxu1 }
 0x924   :  { %3479 = vrot.lane.b32.xlu0 %v10402_v42, %s7325_s2  ;;  %v2861_v34 = vpack.c.bf16 %v6276_v49, %v6275_v59  ;;  %v10408_v59 = vld [vmem:[#allocation63_spill] sm:$0xff]  ;;  %v10410_v49 = vld [vmem:[#allocation29_spill] sm:$0xff] }
 0x925   :  { %v2814_v31 = vpop.f32.mrf.mxu1 }
 0x926   :  { %v2860_v55 = vpack.c.bf16 %v2814_v31, %v2811_v45  ;;  %6340 = vmatpush3.bf16.msra.mxu1 %v10401_v61  ;;  %v10409_v45 = vld [vmem:[#allocation34_spill] sm:$0xff]  ;;  %v3514_v31 = vpop.permute.xlu1 %3513 }
 0x927   :  { %6341 = vmatprep.subr.bf16.mxu1 %v10403_v56  ;;  %v6279_v17 = vpop.f32.mrf.mxu1 }
 0x928   :  { %6293 = vmatprep.mubr.msk.bf16.mxu1 %vm686_vm0, %v2860_v55  ;;  %3481 = vrot.lane.b32.xlu0 %v10404_v13, %s7325_s2  ;;  %v10411_v55 = vld [vmem:[#allocation30_spill] sm:$0xff] }
 0x929   :  { %v2827_v40 = vpop.f32.mrf.mxu1  ;;  %6294 = vmatmul.mubr.msk.bf16.gmra.mxu1 %vm686_vm0, %v2861_v34  ;;  %v3512_v34 = vpop.permute.xlu0 %3511 }
 0x92a   :  { %6342 = vmatpush3.bf16.msra.mxu1 %v10403_v56 }
 0x92b   :  { %6343 = vmatprep.subr.bf16.mxu1 %v10405_v46  ;;  %v6280_v48 = vpop.f32.mrf.mxu1 }
 0x92c   :  { %3485 = vrot.lane.b32.xlu0 %v10406_v16, %s7325_s2  ;;  %v2863_v41 = vpack.c.bf16 %v6280_v48, %v6279_v17  ;;  %v3510_v17 = vpop.permute.xlu1 %3509 }
 0x92d   :  { %v2830_v26 = vpop.f32.mrf.mxu1 }
 0x92e   :  { %v2862_v7 = vpack.c.bf16 %v2830_v26, %v2827_v40  ;;  %6344 = vmatpush3.bf16.msra.mxu1 %v10405_v46  ;;  %v3297_v40 = vpop.xlane.xlu0 %3296 }
 0x92f   :  { %6345 = vmatprep.subr.bf16.mxu1 %v10407_v51 }
 0x930   :  { %6297 = vmatprep.mubr.msk.bf16.mxu1 %vm686_vm0, %v2862_v7  ;;  %3489 = vrot.lane.b32.xlu0 %v10408_v59, %s7325_s2  ;;  %v3295_v48 = vpop.xlane.xlu1 %3294 }
 0x931   :  { %6298 = vmatmul.mubr.msk.bf16.gmra.mxu1 %vm686_vm0, %v2863_v41 }
 0x932   :  { %6346 = vmatpush3.bf16.msra.mxu1 %v10407_v51  ;;  %v3293_v26 = vpop.xlane.xlu0 %3292 }
 0x933   :  { %6347 = vmatprep.subr.bf16.mxu1 %v10409_v45  ;;  %7006 = vrcp.f32 %v3293_v26 }
 0x934   :  { %v3291_v7 = vpop.xlane.xlu1 %3290 }
 0x935   :  { %7008 = vrcp.f32 %v3291_v7 }
 0x936   :  { %6348 = vmatpush3.bf16.msra.mxu1 %v10409_v45  ;;  %7010 = vrcp.f32 %v3297_v40  ;;  %v3506_v26 = vpop.permute.xlu0 %3505 }
 0x937   :  { %6349 = vmatprep.subr.bf16.mxu1 %v10410_v49  ;;  %7012 = vrcp.f32 %v3295_v48 }
 0x93a   :  { %6350 = vmatpush3.bf16.msra.mxu1 %v10410_v49 }
 0x93b   :  { %6351 = vmatprep.subr.bf16.mxu1 %v10411_v55 }
 0x93e   :  { %6352 = vmatpush3.bf16.msra.mxu1 %v10411_v55 }
 0x93f   :  { %6681 = vmatprep.subr.msk.bf16.mxu1 %vm686_vm0, %v3514_v31 }
 0x940   :  { %v7007_v10 = vpop.eup %7006 }
 0x941   :  { %v3339_v16 = vmul.f32 %v7007_v10, %v8961_v21  ;;  %v3303_v10 = vpop.xlane.xlu1 %3302  ;;  %v3504_v21 = vpop.permute.xlu0 %3503 }
 0x942   :  { %v7009_v59 = vpop.eup %7008 }
 0x943   :  { %v3338_v42 = vmul.f32 %v7009_v59, %v8955_v6  ;;  %v7011_v44 = vpop.eup %7010 }
 0x944   :  { %v7013_v40 = vpop.eup %7012  ;;  %v3341_v48 = vmul.f32 %v7011_v44, %v8957_v57  ;;  %v3555_v57 = vsel %vm686_vm0, %v3510_v17, 0 }
 0x945   :  { %v3354_v5 = vpack.c.bf16 %v3339_v16, %v3338_v42  ;;  %v3340_v7 = vmul.f32 %v7013_v40, %v8952_v50 }
 0x947   :  { %v3355_v14 = vpack.c.bf16 %v3341_v48, %v3340_v7 }
 0x955   :  { %v6283_v41 = vpop.f32.mrf.mxu1 }
 0x957   :  { %v2843_v0 = vpop.f32.mrf.mxu1 }
 0x959   :  { %v6284_v63 = vpop.f32.mrf.mxu1 }
 0x95a   :  { %v2865_v4 = vpack.c.bf16 %v6284_v63, %v6283_v41 }
 0x95b   :  { %v2846_v52 = vpop.f32.mrf.mxu1 }
 0x95c   :  { %v2864_v13 = vpack.c.bf16 %v2846_v52, %v2843_v0  ;;  %v3561_v0 = vsel %vm686_vm0, %v3514_v31, 0  ;;  %v3299_v52 = vpop.xlane.xlu1 %3298 }
 0x95e   :  { %6301 = vmatprep.mubr.msk.bf16.mxu1 %vm686_vm0, %v2864_v13 }
 0x95f   :  { %6302 = vmatmul.mubr.msk.bf16.gmra.mxu1 %vm686_vm0, %v2865_v4 }
 0x960   :  { %6353 = vmatprep.mubr.bf16.mxu1 %v3354_v5  ;;  %v3558_v5 = vsel %vm686_vm0, %v3512_v34, 0  ;;  %v3508_v44 = vpop.permute.xlu1 %3507 }
 0x967   :  { %6354 = vmatmul.mubr.bf16.vlgmr.msra.gmra.mxu1 %v3355_v14 }
 0x968   :  { %6370 = vmatpush3.bf16.xpose.msra.mxu1 %v3561_v0 }
 0x969   :  { %6682 = vmatprep.subr.msk.bf16.mxu1 %vm686_vm0, %v3512_v34  ;;  %v3552_v34 = vsel %vm686_vm0, %v3508_v44, 0 }
 0x96b   :  { %v3305_v6 = vpop.xlane.xlu0 %3304 }
 0x96c   :  { %7014 = vrcp.f32 %v3305_v6 }
 0x96d   :  { %7016 = vrcp.f32 %v3299_v52 }
 0x96e   :  { %7018 = vrcp.f32 %v3303_v10 }
 0x96f   :  { %v3301_v63 = vpop.xlane.xlu0 %3300  ;;  %v3317_v0 = vpop.xlane.xlu1 %3316 }
 0x970   :  { %6372 = vmatpush3.bf16.xpose.msra.mxu1 %v3558_v5  ;;  %7020 = vrcp.f32 %v3301_v63 }
 0x971   :  { %6683 = vmatprep.subr.msk.bf16.mxu1 %vm686_vm0, %v3510_v17 }
 0x973   :  { %v3311_v50 = vpop.xlane.xlu0 %3310 }
 0x977   :  { %v3307_v14 = vpop.xlane.xlu0 %3306 }
 0x978   :  { %6374 = vmatpush3.bf16.xpose.msra.mxu1 %v3555_v57 }
 0x979   :  { %6684 = vmatprep.subr.msk.bf16.mxu1 %vm686_vm0, %v3508_v44  ;;  %v7015_v4 = vpop.eup %7014 }
 0x97a   :  { %v7017_v13 = vpop.eup %7016  ;;  %v3345_v31 = vmul.f32 %v7015_v4, %v8983_v2  ;;  %v3549_v2 = vsel %vm686_vm0, %v3506_v26, 0 }
 0x97b   :  { %v3313_v42 = vpop.xlane.xlu0 %3312  ;;  %v7019_v16 = vpop.eup %7018  ;;  %v3342_v17 = vmul.f32 %v7017_v13, %v8967_v60 }
 0x97c   :  { %7022 = vrcp.f32 %v3313_v42  ;;  %v3344_v48 = vmul.f32 %v7019_v16, %v8964_v1 }
 0x97d   :  { %v7021_v59 = vpop.eup %7020  ;;  %7024 = vrcp.f32 %v3307_v14 }
 0x97e   :  { %7026 = vrcp.f32 %v3311_v50  ;;  %v3343_v40 = vmul.f32 %v7021_v59, %v8986_v54  ;;  %v3357_v10 = vpack.c.bf16 %v3345_v31, %v3344_v48 }
 0x97f   :  { %v3309_v41 = vpop.xlane.xlu0 %3308 }
 0x980   :  { %6376 = vmatpush3.bf16.xpose.msra.mxu1 %v3552_v34  ;;  %7028 = vrcp.f32 %v3309_v41  ;;  %v3356_v7 = vpack.c.bf16 %v3343_v40, %v3342_v17 }
 0x981   :  { %6685 = vmatprep.subr.msk.bf16.mxu1 %vm686_vm0, %v3506_v26  ;;  %7030 = vrcp.f32 %v3317_v0  ;;  %v3546_v26 = vsel %vm686_vm0, %v3504_v21, 0 }
 0x982   :  { %6357 = vmatprep.mubr.bf16.mxu1 %v3356_v7  ;;  %v10412_v7 = vld [vmem:[#allocation14_spill] sm:$0xff] }
 0x983   :  { %v3319_v6 = vpop.xlane.xlu0 %3318  ;;  %6358 = vmatmul.mubr.bf16.gmra.mxu1 %v3357_v10 }
 0x987   :  { %v3315_v52 = vpop.xlane.xlu0 %3314 }
 0x988   :  { %6378 = vmatpush3.bf16.xpose.msra.mxu1 %v3549_v2  ;;  %7032 = vrcp.f32 %v3315_v52 }
 0x989   :  { %6686 = vmatprep.subr.msk.bf16.mxu1 %vm686_vm0, %v3504_v21  ;;  %v7023_v60 = vpop.eup %7022  ;;  %7034 = vrcp.f32 %v3319_v6  ;;  %v3500_v21 = vpop.permute.xlu1 %3499 }
 0x98a   :  { %v7025_v54 = vpop.eup %7024  ;;  %v3349_v50 = vmul.f32 %v7023_v60, %v9001_v53  ;;  %v9162_v60 = vld [vmem:[%s10065_s4] ss:$0 sm:$0xff] }
 0x98b   :  { %v3321_v1 = vpop.xlane.xlu0 %3320  ;;  %v7027_v5 = vpop.eup %7026  ;;  %v3346_v57 = vmul.f32 %v7025_v54, %v8998_v33 }
 0x98c   :  { %7036 = vrcp.f32 %v3321_v1  ;;  %v3348_v4 = vmul.f32 %v7027_v5, %v8994_v43 }
 0x98d   :  { %v7029_v63 = vpop.eup %7028  ;;  %v3484_v0 = vpop.permute.xlu1 %3483 }
 0x98e   :  { %v3347_v14 = vmul.f32 %v7029_v63, %v9004_v62  ;;  %v3359_v13 = vpack.c.bf16 %v3349_v50, %v3348_v4  ;;  %v7031_v16 = vpop.eup %7030  ;;  %v10414_v63 = vld [vmem:[#allocation26_spill] sm:$0xff]  ;;  %v10415_v50 = vld [vmem:[#allocation45_spill] sm:$0xff] }
 0x98f   :  { %v3502_v44 = vpop.permute.xlu0 %3501  ;;  %v3351_v33 = vmul.f32 %v7031_v16, %v8989_v38 }
 0x990   :  { %6380 = vmatpush3.bf16.xpose.msra.mxu1 %v3546_v26  ;;  %v3358_v42 = vpack.c.bf16 %v3347_v14, %v3346_v57  ;;  %v3543_v62 = vsel %vm686_vm0, %v3502_v44, 0  ;;  %v1754_v57 = vadd.f32 %v10415_v50, %v10414_v63 }
 0x991   :  { %6687 = vmatprep.subr.msk.bf16.mxu1 %vm686_vm0, %v3502_v44  ;;  %v3488_v2 = vpop.permute.xlu1 %3487 }
 0x992   :  { %6361 = vmatprep.mubr.bf16.mxu1 %v3358_v42  ;;  %v2393_v4 = vadd.f32 %v9028_v39, %v1754_v57 }
 0x993   :  { %6362 = vmatmul.mubr.bf16.gmra.mxu1 %v3359_v13  ;;  %v3476_v40 = vpop.permute.xlu0 %3475 }
 0x995   :  { %v7033_v59 = vpop.eup %7032 }
 0x996   :  { %v3350_v53 = vmul.f32 %v7033_v59, %v9026_v47  ;;  %v7035_v31 = vpop.eup %7034  ;;  %v3540_v47 = vsel %vm686_vm0, %v3500_v21, 0 }
 0x997   :  { %v3352_v41 = vmul.f32 %v7035_v31, %v9015_v32  ;;  %v3478_v38 = vpop.permute.xlu0 %3477  ;;  %v10413_v32 = vld [vmem:[#allocation17_spill] sm:$0xff] }
 0x998   :  { %6382 = vmatpush3.bf16.xpose.msra.mxu1 %v3543_v62  ;;  %v3360_v34 = vpack.c.bf16 %v3351_v33, %v3350_v53  ;;  %v10416_v62 = vld [vmem:[#allocation59_spill] sm:$0xff] }
 0x999   :  { %v7037_v43 = vpop.eup %7036  ;;  %6688 = vmatprep.subr.msk.bf16.mxu1 %vm686_vm0, %v3500_v21  ;;  %v10417_v21 = vld [vmem:[#allocation41_spill] sm:$0xff] }
 0x99a   :  { %6365 = vmatprep.mubr.bf16.mxu1 %v3360_v34  ;;  %v3353_v17 = vmul.f32 %v7037_v43, %v9039_v37  ;;  %v1770_v39 = vadd.f32 %v10417_v21, %v10416_v62 }
 0x99b   :  { %v3480_v10 = vpop.permute.xlu0 %3479 }
 0x99c   :  { %v3361_v48 = vpack.c.bf16 %v3353_v17, %v3352_v41  ;;  %v2397_v41 = vadd.f32 %v9048_v19, %v1770_v39 }
 0x99e   :  { %6366 = vmatmul.mubr.bf16.gmra.mxu1 %v3361_v48 }
 0x99f   :  { %6385 = vmatprep.mubr.msk.bf16.mxu1 %vm686_vm0, %v3476_v40  ;;  %v3482_v37 = vpop.permute.xlu0 %3481 }
 0x9a0   :  { %6384 = vmatpush3.bf16.xpose.msra.mxu1 %v3540_v47 }
 0x9a1   :  { %6453 = vmatprep.subr.bf16.mxu1 %v10412_v7 }
 0x9a3   :  { %v3486_v6 = vpop.permute.xlu0 %3485 }
 0x9a7   :  { %6386 = vmatmul.mubr.msk.bf16.vlgmr.msra.gmra.mxu1 %vm686_vm0, %v3478_v38  ;;  %v3490_v52 = vpop.permute.xlu0 %3489 }
 0x9a8   :  { %6389 = vmatprep.mubr.msk.bf16.mxu1 %vm686_vm0, %v3480_v10  ;;  %6454 = vmatpush3.bf16.msra.mxu1 %v10412_v7 }
 0x9a9   :  { %6455 = vmatprep.subr.bf16.mxu1 %v10413_v32 }
 0x9ac   :  { %6456 = vmatpush3.bf16.msra.mxu1 %v10413_v32  ;;  %v10418_v32 = vld [vmem:[#allocation53_spill] sm:$0xff] }
 0x9af   :  { %6390 = vmatmul.mubr.msk.bf16.gmra.mxu1 %vm686_vm0, %v3482_v37  ;;  %v10419_v37 = vld [vmem:[#allocation27_spill] sm:$0xff] }
 0x9b0   :  { %6393 = vmatprep.mubr.msk.bf16.mxu1 %vm686_vm0, %v3484_v0  ;;  %v1786_v19 = vadd.f32 %v10419_v37, %v10418_v32 }
 0x9b7   :  { %6394 = vmatmul.mubr.msk.bf16.gmra.mxu1 %vm686_vm0, %v3486_v6 }
 0x9b8   :  { %6397 = vmatprep.mubr.msk.bf16.mxu1 %vm686_vm0, %v3488_v2  ;;  %v2401_v2 = vadd.f32 %v9062_v36, %v1786_v19  ;;  %v10421_v36 = vld [vmem:[#allocation32_spill] sm:$0xff] }
 0x9b9   :  { %v10422_v19 = vld [vmem:[#allocation64_spill] sm:$0xff] }
 0x9bf   :  { %6398 = vmatmul.mubr.msk.bf16.gmra.mxu1 %vm686_vm0, %v3490_v52 }
 0x9e1   :  { %v6291_v54 = vpop.f32.mrf.mxu1 }
 0x9e2   :  { %v2989_v1 = vadd.f32 %v6291_v54, %v9013_v15 }
 0x9e3   :  { %v2924_v5 = vpop.f32.mrf.mxu1 }
 0x9e4   :  { %v3011_v14 = vadd.f32 %v9162_v60, %v2989_v1  ;;  %v2987_v26 = vadd.f32 %v2924_v5, %v9019_v18 }
 0x9e5   :  { %v6292_v44 = vpop.f32.mrf.mxu1 }
 0x9e6   :  { %3027 = vst [vmem:[#allocation8 + $0x10] sm:$0xff] %v3011_v14  ;;  %v3009_v42 = vadd.f32 %v9162_v60, %v2987_v26  ;;  %v2990_v13 = vadd.f32 %v6292_v44, %v9024_v9  ;;  %v10420_v14 = vld [vmem:[#allocation47_spill] sm:$0xff] }
 0x9e7   :  { %v2927_v16 = vpop.f32.mrf.mxu1  ;;  %v1802_v26 = vadd.f32 %v10421_v36, %v10420_v14 }
 0x9e8   :  { %3025 = vst [vmem:[#allocation8] sm:$0xff] %v3009_v42  ;;  %v3012_v15 = vadd.f32 %v9162_v60, %v2990_v13  ;;  %v2988_v59 = vadd.f32 %v2927_v16, %v2393_v4 }
 0x9e9   :  { %v6295_v53 = vpop.f32.mrf.mxu1  ;;  %v2405_v42 = vadd.f32 %v9076_v20, %v1802_v26 }
 0x9ea   :  { %3028 = vst [vmem:[#allocation8 + $0x18] sm:$0xff] %v3012_v15  ;;  %v3010_v33 = vadd.f32 %v9162_v60, %v2988_v59  ;;  %v2993_v31 = vadd.f32 %v6295_v53, %v9037_v11 }
 0x9eb   :  { %v2940_v18 = vpop.f32.mrf.mxu1 }
 0x9ec   :  { %3026 = vst [vmem:[#allocation8 + $0x8] sm:$0xff] %v3010_v33  ;;  %v3015_v34 = vadd.f32 %v9162_v60, %v2993_v31  ;;  %v2991_v9 = vadd.f32 %v2940_v18, %v9043_v35 }
 0x9ed   :  { %v6296_v43 = vpop.f32.mrf.mxu1 }
 0x9ee   :  { %3031 = vst [vmem:[#allocation8 + $0x30] sm:$0xff] %v3015_v34  ;;  %v3013_v17 = vadd.f32 %v9162_v60, %v2991_v9  ;;  %v2994_v40 = vadd.f32 %v6296_v43, %v9046_v12 }
 0x9ef   :  { %v2943_v48 = vpop.f32.mrf.mxu1 }
 0x9f0   :  { %3029 = vst [vmem:[#allocation8 + $0x20] sm:$0xff] %v3013_v17  ;;  %v3016_v11 = vadd.f32 %v9162_v60, %v2994_v40  ;;  %v2992_v47 = vadd.f32 %v2943_v48, %v2397_v41 }
 0x9f1   :  { %v6299_v38 = vpop.f32.mrf.mxu1 }
 0x9f2   :  { %3032 = vst [vmem:[#allocation8 + $0x38] sm:$0xff] %v3016_v11  ;;  %v3014_v7 = vadd.f32 %v9162_v60, %v2992_v47  ;;  %v2997_v10 = vadd.f32 %v6299_v38, %v9054_v24 }
 0x9f3   :  { %v2956_v35 = vpop.f32.mrf.mxu1 }
 0x9f4   :  { %3030 = vst [vmem:[#allocation8 + $0x28] sm:$0xff] %v3014_v7  ;;  %v3019_v0 = vadd.f32 %v9162_v60, %v2997_v10  ;;  %v2995_v12 = vadd.f32 %v2956_v35, %v9058_v30 }
 0x9f5   :  { %v6300_v6 = vpop.f32.mrf.mxu1 }
 0x9f6   :  { %3035 = vst [vmem:[#allocation8 + $0x50] sm:$0xff] %v3019_v0  ;;  %v3017_v52 = vadd.f32 %v9162_v60, %v2995_v12  ;;  %v2998_v54 = vadd.f32 %v6300_v6, %v9060_v3  ;;  %v10423_v6 = vld [vmem:[#allocation65_spill] sm:$0xff] }
 0x9f7   :  { %v2959_v1 = vpop.f32.mrf.mxu1 }
 0x9f8   :  { %3033 = vst [vmem:[#allocation8 + $0x40] sm:$0xff] %v3017_v52  ;;  %v3020_v24 = vadd.f32 %v9162_v60, %v2998_v54  ;;  %v2996_v5 = vadd.f32 %v2959_v1, %v2401_v2  ;;  %v10424_v1 = vld [vmem:[#allocation67_spill] sm:$0xff] }
 0x9fa   :  { %3036 = vst [vmem:[#allocation8 + $0x58] sm:$0xff] %v3020_v24  ;;  %v3018_v63 = vadd.f32 %v9162_v60, %v2996_v5  ;;  %v10425_v5 = vld [vmem:[#allocation66_spill] sm:$0xff] }
 0x9fc   :  { %3034 = vst [vmem:[#allocation8 + $0x48] sm:$0xff] %v3018_v63 }
 0xa1f   :  { %v6303_v50 = vpop.f32.mrf.mxu1 }
 0xa20   :  { %v3001_v30 = vadd.f32 %v6303_v50, %v9068_v8 }
 0xa21   :  { %v2972_v57 = vpop.f32.mrf.mxu1 }
 0xa22   :  { %v3023_v44 = vadd.f32 %v9162_v60, %v3001_v30  ;;  %v2999_v3 = vadd.f32 %v2972_v57, %v9072_v23 }
 0xa23   :  { %v6304_v4 = vpop.f32.mrf.mxu1 }
 0xa24   :  { %3039 = vst [vmem:[#allocation8 + $0x70] sm:$0xff] %v3023_v44  ;;  %v3021_v13 = vadd.f32 %v9162_v60, %v2999_v3  ;;  %v3002_v16 = vadd.f32 %v6304_v4, %v9074_v22  ;;  %v10426_v3 = vld [vmem:[#allocation68_spill] sm:$0xff] }
 0xa25   :  { %v2975_v15 = vpop.f32.mrf.mxu1 }
 0xa26   :  { %3037 = vst [vmem:[#allocation8 + $0x60] sm:$0xff] %v3021_v13  ;;  %v3024_v8 = vadd.f32 %v9162_v60, %v3002_v16  ;;  %v3000_v59 = vadd.f32 %v2975_v15, %v2405_v42  ;;  %v10427_v42 = vld [vmem:[#allocation69_spill] sm:$0xff]  ;;  %v10428_v15 = vld [vmem:[#allocation70_spill] sm:$0xff] }
 0xa27   :  { %v6355_v53 = vpop.f32.mrf.mxu1 }
 0xa28   :  { %3040 = vst [vmem:[#allocation8 + $0x78] sm:$0xff] %v3024_v8  ;;  %v3022_v33 = vadd.f32 %v9162_v60, %v3000_v59  ;;  %v10429_v59 = vld [vmem:[#allocation71_spill] sm:$0xff] }
 0xa29   :  { %v3396_v31 = vpop.f32.mrf.mxu1 }
 0xa2a   :  { %3038 = vst [vmem:[#allocation8 + $0x68] sm:$0xff] %v3022_v33 }
 0xa2b   :  { %v6356_v23 = vpop.f32.mrf.mxu1 }
 0xa2c   :  { %v3460_v20 = vpack.c.bf16 %v6356_v23, %v6355_v53 }
 0xa2d   :  { %v3399_v18 = vpop.f32.mrf.mxu1 }
 0xa2e   :  { %v3459_v62 = vpack.c.bf16 %v3399_v18, %v3396_v31  ;;  %v10430_v31 = vld [vmem:[#allocation72_spill] sm:$0xff]  ;;  %v10431_v18 = vld [vmem:[#allocation73_spill] sm:$0xff] }
 0xa30   :  { %6457 = vmatprep.mubr.msk.bf16.mxu1 %vm686_vm0, %v3459_v62 }
 0xa31   :  { %6458 = vmatmul.mubr.msk.bf16.vlgmr.msra.gmra.mxu1 %vm686_vm0, %v3460_v20 }
 0xa43   :  { %v6359_v22 = vpop.f32.mrf.mxu1 }
 0xa45   :  { %v3412_v21 = vpop.f32.mrf.mxu1 }
 0xa47   :  { %v6360_v39 = vpop.f32.mrf.mxu1 }
 0xa48   :  { %v3462_v43 = vpack.c.bf16 %v6360_v39, %v6359_v22  ;;  %v10432_v22 = vld [vmem:[#allocation74_spill] sm:$0xff]  ;;  %v10433_v39 = vld [vmem:[#allocation75_spill] sm:$0xff] }
 0xa49   :  { %v3415_v34 = vpop.f32.mrf.mxu1 }
 0xa4a   :  { %v3461_v9 = vpack.c.bf16 %v3415_v34, %v3412_v21 }
 0xa4c   :  { %6461 = vmatprep.mubr.msk.bf16.mxu1 %vm686_vm0, %v3461_v9 }
 0xa4d   :  { %6462 = vmatmul.mubr.msk.bf16.gmra.mxu1 %vm686_vm0, %v3462_v43  ;;  %v10434_v43 = vld [vmem:[#allocation76_spill] sm:$0xff] }
 0xa53   :  { %v6363_v60 = vpop.f32.mrf.mxu1 }
 0xa55   :  { %v3428_v41 = vpop.f32.mrf.mxu1 }
 0xa57   :  { %v6364_v17 = vpop.f32.mrf.mxu1 }
 0xa58   :  { %v3464_v11 = vpack.c.bf16 %v6364_v17, %v6363_v60 }
 0xa59   :  { %v3431_v40 = vpop.f32.mrf.mxu1 }
 0xa5a   :  { %v3463_v48 = vpack.c.bf16 %v3431_v40, %v3428_v41  ;;  %v10435_v41 = vld [vmem:[#allocation77_spill] sm:$0xff] }
 0xa5c   :  { %6465 = vmatprep.mubr.msk.bf16.mxu1 %vm686_vm0, %v3463_v48  ;;  %v10436_v48 = vld [vmem:[#allocation78_spill] sm:$0xff] }
 0xa5d   :  { %6466 = vmatmul.mubr.msk.bf16.gmra.mxu1 %vm686_vm0, %v3464_v11 }
 0xa5e   :  { %v6367_v47 = vpop.f32.mrf.mxu1 }
 0xa60   :  { %v3444_v38 = vpop.f32.mrf.mxu1 }
 0xa62   :  { %v6368_v7 = vpop.f32.mrf.mxu1 }
 0xa63   :  { %v3466_v32 = vpack.c.bf16 %v6368_v7, %v6367_v47  ;;  %v10437_v47 = vld [vmem:[#allocation79_spill] sm:$0xff] }
 0xa64   :  { %v3447_v10 = vpop.f32.mrf.mxu1 }
 0xa65   :  { %v3465_v35 = vpack.c.bf16 %v3447_v10, %v3444_v38 }
 0xa67   :  { %v6387_v37 = vpop.f32.mrf.mxu1  ;;  %6469 = vmatprep.mubr.msk.bf16.mxu1 %vm686_vm0, %v3465_v35 }
 0xa68   :  { %v3606_v0 = vadd.f32 %v6387_v37, %v10422_v19  ;;  %6470 = vmatmul.mubr.msk.bf16.gmra.mxu1 %vm686_vm0, %v3466_v32 }
 0xa69   :  { %v3597_v12 = vpop.f32.mrf.mxu1 }
 0xa6a   :  { %v3598_v2 = vadd.f32 %v3597_v12, %v10423_v6  ;;  %3664 = vmax.xlane.f32.xlu0 %v3606_v0 }
 0xa6b   :  { %v6388_v52 = vpop.f32.mrf.mxu1 }
 0xa6c   :  { %3660 = vmax.xlane.f32.xlu1 %v3598_v2  ;;  %v3609_v24 = vadd.f32 %v6388_v52, %v10424_v1 }
 0xa6d   :  { %v3600_v54 = vpop.f32.mrf.mxu1 }
 0xa6e   :  { %v9216_v63 = vadd.f32 %v3600_v54, %v10425_v5 }
 0xa6f   :  { %v6391_v50 = vpop.f32.mrf.mxu1 }
 0xa70   :  { %3662 = vmax.xlane.f32.xlu0 %v9216_v63  ;;  %3666 = vmax.xlane.f32.xlu1 %v3609_v24  ;;  %v9224_v4 = vadd.f32 %v6391_v50, %v10426_v3 }
 0xa71   :  { %v3613_v30 = vpop.f32.mrf.mxu1 }
 0xa72   :  { %v9232_v8 = vadd.f32 %v3613_v30, %v10428_v15 }
 0xa73   :  { %v6392_v57 = vpop.f32.mrf.mxu1 }
 0xa74   :  { %v9227_v13 = vadd.f32 %v6392_v57, %v10427_v42 }
 0xa75   :  { %v3616_v14 = vpop.f32.mrf.mxu1 }
 0xa76   :  { %v9235_v53 = vadd.f32 %v3616_v14, %v10429_v59 }
 0xa77   :  { %v6395_v36 = vpop.f32.mrf.mxu1 }
 0xa78   :  { %v9240_v23 = vadd.f32 %v6395_v36, %v10430_v31 }
 0xa79   :  { %v3629_v26 = vpop.f32.mrf.mxu1 }
 0xa7a   :  { %v9248_v21 = vadd.f32 %v3629_v26, %v10432_v22 }
 0xa7b   :  { %v6396_v44 = vpop.f32.mrf.mxu1 }
 0xa7c   :  { %v9243_v62 = vadd.f32 %v6396_v44, %v10431_v18 }
 0xa7d   :  { %v3632_v16 = vpop.f32.mrf.mxu1 }
 0xa7e   :  { %v9251_v34 = vadd.f32 %v3632_v16, %v10433_v39 }
 0xa7f   :  { %v6399_v33 = vpop.f32.mrf.mxu1 }
 0xa80   :  { %v9256_v60 = vadd.f32 %v6399_v33, %v10434_v43 }
 0xa81   :  { %3832 = vrot.lane.b32.xlu1 %v10401_v61, %s7325_s2  ;;  %v3645_v20 = vpop.f32.mrf.mxu1 }
 0xa82   :  { %v9264_v11 = vadd.f32 %v3645_v20, %v10436_v48 }
 0xa83   :  { %v6400_v9 = vpop.f32.mrf.mxu1 }
 0xa84   :  { %v9259_v17 = vadd.f32 %v6400_v9, %v10435_v41 }
 0xa85   :  { %v3648_v40 = vpop.f32.mrf.mxu1 }
 0xa86   :  { %3834 = vrot.lane.b32.xlu0 %v10375_v28, %s7325_s2  ;;  %v9267_v38 = vadd.f32 %v3648_v40, %v10437_v47 }
 0xaa5   :  { %3672 = vmax.xlane.f32.xlu0 %v9224_v4  ;;  %3674 = vmax.xlane.f32.xlu1 %v9227_v13 }
 0xaa9   :  { %3670 = vmax.xlane.f32.xlu1 %v9235_v53  ;;  %3668 = vmax.xlane.f32.xlu0 %v9232_v8 }
 0xaad   :  { %3680 = vmax.xlane.f32.xlu0 %v9240_v23  ;;  %3682 = vmax.xlane.f32.xlu1 %v9243_v62 }
 0xab1   :  { %3678 = vmax.xlane.f32.xlu1 %v9251_v34  ;;  %3676 = vmax.xlane.f32.xlu0 %v9248_v21 }
 0xab5   :  { %3688 = vmax.xlane.f32.xlu0 %v9256_v60  ;;  %3690 = vmax.xlane.f32.xlu1 %v9259_v17 }
 0xab9   :  { %3686 = vmax.xlane.f32.xlu1 %v9267_v38  ;;  %3684 = vmax.xlane.f32.xlu0 %v9264_v11 }
 0xacf   :  { %3830 = vrot.lane.b32.xlu0 %v10403_v56, %s7325_s2 }
 0xad3   :  { %3828 = vrot.lane.b32.xlu0 %v10405_v46, %s7325_s2 }
 0xad7   :  { %3826 = vrot.lane.b32.xlu0 %v10407_v51, %s7325_s2 }
 0xadb   :  { %3824 = vrot.lane.b32.xlu0 %v10409_v45, %s7325_s2 }
 0xadf   :  { %3820 = vrot.lane.b32.xlu0 %v10411_v55, %s7325_s2 }
 0xaf3   :  { %v3665_v7 = vpop.xlane.xlu0 %3664 }
 0xaf4   :  { %v3694_v10 = vsub.f32 %v3606_v0, %v3665_v7 }
 0xaf5   :  { %v3661_v35 = vpop.xlane.xlu1 %3660 }
 0xaf6   :  { %v3712_v32 = vmul.f32 1.442695, %v3694_v10  ;;  %v3692_v37 = vsub.f32 %v3598_v2, %v3661_v35 }
 0xaf8   :  { %7038 = vpow2.f32 %v3712_v32  ;;  %v3708_v12 = vmul.f32 1.442695, %v3692_v37 }
 0xaf9   :  { %v3667_v52 = vpop.xlane.xlu1 %3666  ;;  %v3663_v54 = vpop.xlane.xlu0 %3662 }
 0xafa   :  { %v3695_v50 = vsub.f32 %v3609_v24, %v3667_v52  ;;  %7040 = vpow2.f32 %v3708_v12  ;;  %v3693_v57 = vsub.f32 %v9216_v63, %v3663_v54 }
 0xafc   :  { %v3714_v30 = vmul.f32 1.442695, %v3695_v50  ;;  %v3710_v26 = vmul.f32 1.442695, %v3693_v57 }
 0xafd   :  { %v3835_v14 = vpop.permute.xlu0 %3834  ;;  %v3833_v36 = vpop.permute.xlu1 %3832 }
 0xafe   :  { %6401 = vmatprep.subr.bf16.mxu0 %v3835_v14  ;;  %7042 = vpow2.f32 %v3714_v30 }
 0xaff   :  { %6402 = vmatpush3.bf16.msra.mxu0 %v3835_v14  ;;  %7044 = vpow2.f32 %v3710_v26 }
 0xb00   :  { %6403 = vmatprep.subr.bf16.mxu0 %v3833_v36 }
 0xb03   :  { %6404 = vmatpush3.bf16.msra.mxu0 %v3833_v36 }
 0xb05   :  { %v9282_v0 = vpop.eup %7038 }
 0xb06   :  { %3744 = vadd.xlane.f32.xlu1 %v9282_v0 }
 0xb07   :  { %v9285_v2 = vpop.eup %7040 }
 0xb0a   :  { %3740 = vadd.xlane.f32.xlu1 %v9285_v2 }
 0xb0b   :  { %v9288_v24 = vpop.eup %7042 }
 0xb0c   :  { %v9291_v63 = vpop.eup %7044 }
 0xb0e   :  { %3746 = vadd.xlane.f32.xlu1 %v9288_v24 }
 0xb12   :  { %3742 = vadd.xlane.f32.xlu1 %v9291_v63 }
 0xb23   :  { %3822 = vrot.lane.b32.xlu1 %v10410_v49, %s7325_s2 }
 0xb2e   :  { %v3675_v44 = vpop.xlane.xlu1 %3674  ;;  %v3673_v16 = vpop.xlane.xlu0 %3672 }
 0xb2f   :  { %v3698_v9 = vsub.f32 %v9224_v4, %v3673_v16  ;;  %v3699_v10 = vsub.f32 %v9227_v13, %v3675_v44 }
 0xb31   :  { %v3720_v52 = vmul.f32 1.442695, %v3698_v9  ;;  %v3722_v54 = vmul.f32 1.442695, %v3699_v10 }
 0xb32   :  { %v3671_v33 = vpop.xlane.xlu1 %3670  ;;  %v3669_v20 = vpop.xlane.xlu0 %3668 }
 0xb33   :  { %v3697_v40 = vsub.f32 %v9235_v53, %v3671_v33  ;;  %v3696_v7 = vsub.f32 %v9232_v8, %v3669_v20 }
 0xb35   :  { %v3718_v35 = vmul.f32 1.442695, %v3697_v40  ;;  %v3716_v32 = vmul.f32 1.442695, %v3696_v7 }
 0xb36   :  { %v3683_v37 = vpop.xlane.xlu1 %3682  ;;  %v3681_v12 = vpop.xlane.xlu0 %3680 }
 0xb37   :  { %7046 = vpow2.f32 %v3718_v35  ;;  %v3702_v53 = vsub.f32 %v9240_v23, %v3681_v12  ;;  %v3703_v13 = vsub.f32 %v9243_v62, %v3683_v37 }
 0xb38   :  { %7048 = vpow2.f32 %v3716_v32 }
 0xb39   :  { %7050 = vpow2.f32 %v3720_v52  ;;  %v3728_v44 = vmul.f32 1.442695, %v3702_v53  ;;  %v3730_v16 = vmul.f32 1.442695, %v3703_v13 }
 0xb3a   :  { %v3679_v50 = vpop.xlane.xlu1 %3678  ;;  %v3677_v30 = vpop.xlane.xlu0 %3676  ;;  %7052 = vpow2.f32 %v3722_v54 }
 0xb3b   :  { %v3701_v57 = vsub.f32 %v9251_v34, %v3679_v50  ;;  %v3700_v4 = vsub.f32 %v9248_v21, %v3677_v30 }
 0xb3d   :  { %v3726_v8 = vmul.f32 1.442695, %v3701_v57  ;;  %v3724_v14 = vmul.f32 1.442695, %v3700_v4 }
 0xb3e   :  { %v3691_v36 = vpop.xlane.xlu1 %3690  ;;  %v3689_v26 = vpop.xlane.xlu0 %3688 }
 0xb3f   :  { %7054 = vpow2.f32 %v3724_v14  ;;  %v3706_v23 = vsub.f32 %v9256_v60, %v3689_v26  ;;  %v3707_v62 = vsub.f32 %v9259_v17, %v3691_v36  ;;  %v10439_v14 = vld [vmem:[#allocation16_spill] sm:$0xff]  ;;  %v10441_v26 = vld [vmem:[#allocation23_spill] sm:$0xff] }
 0xb40   :  { %7056 = vpow2.f32 %v3726_v8  ;;  %v10438_v8 = vld [vmem:[#allocation15_spill] sm:$0xff]  ;;  %v10440_v36 = vld [vmem:[#allocation20_spill] sm:$0xff] }
 0xb41   :  { %7058 = vpow2.f32 %v3728_v44  ;;  %v3738_v32 = vmul.f32 1.442695, %v3707_v62  ;;  %v10442_v44 = vld [vmem:[#allocation43_spill] sm:$0xff] }
 0xb42   :  { %v3687_v33 = vpop.xlane.xlu1 %3686  ;;  %v3685_v20 = vpop.xlane.xlu0 %3684  ;;  %7060 = vpow2.f32 %v3730_v16  ;;  %v10443_v16 = vld [vmem:[#allocation46_spill] sm:$0xff]  ;;  %v10449_v62 = vld [vmem:[#allocation63_spill] sm:$0xff] }
 0xb43   :  { %v3705_v9 = vsub.f32 %v9267_v38, %v3687_v33  ;;  %v3704_v34 = vsub.f32 %v9264_v11, %v3685_v20  ;;  %v3736_v11 = vmul.f32 1.442695, %v3706_v23  ;;  %v10444_v33 = vld [vmem:[#allocation49_spill] sm:$0xff]  ;;  %v10445_v20 = vld [vmem:[#allocation52_spill] sm:$0xff] }
 0xb44   :  { %v9306_v21 = vpop.eup %7046  ;;  %v10448_v23 = vld [vmem:[#allocation61_spill] sm:$0xff] }
 0xb45   :  { %v3734_v40 = vmul.f32 1.442695, %v3705_v9  ;;  %v3732_v7 = vmul.f32 1.442695, %v3704_v34  ;;  %3750 = vadd.xlane.f32.xlu0 %v9306_v21  ;;  %v9311_v10 = vpop.eup %7048  ;;  %v10446_v9 = vld [vmem:[#allocation55_spill] sm:$0xff]  ;;  %v10447_v34 = vld [vmem:[#allocation58_spill] sm:$0xff] }
 0xb46   :  { %v3831_v35 = vpop.permute.xlu0 %3830  ;;  %v9314_v38 = vpop.eup %7050 }
 0xb47   :  { %3748 = vadd.xlane.f32.xlu1 %v9311_v10  ;;  %6405 = vmatprep.subr.bf16.mxu0 %v3831_v35  ;;  %7062 = vpow2.f32 %v3732_v7  ;;  %v9317_v60 = vpop.eup %7052 }
 0xb48   :  { %6406 = vmatpush3.bf16.msra.mxu0 %v3831_v35  ;;  %7064 = vpow2.f32 %v3734_v40 }
 0xb49   :  { %3752 = vadd.xlane.f32.xlu0 %v9314_v38  ;;  %7066 = vpow2.f32 %v3736_v11 }
 0xb4a   :  { %v3829_v17 = vpop.permute.xlu0 %3828  ;;  %7068 = vpow2.f32 %v3738_v32  ;;  %v10450_v32 = vld [vmem:[#allocation81_spill] sm:$0xff] }
 0xb4b   :  { %3754 = vadd.xlane.f32.xlu1 %v9317_v60  ;;  %6407 = vmatprep.subr.bf16.mxu0 %v3829_v17 }
 0xb4c   :  { %6408 = vmatpush3.bf16.msra.mxu0 %v3829_v17  ;;  %v9320_v37 = vpop.eup %7054 }
 0xb4d   :  { %v9322_v12 = vpop.eup %7056  ;;  %3756 = vadd.xlane.f32.xlu0 %v9320_v37 }
 0xb4e   :  { %v3827_v52 = vpop.permute.xlu0 %3826  ;;  %v9326_v54 = vpop.eup %7058 }
 0xb4f   :  { %3758 = vadd.xlane.f32.xlu1 %v9322_v12  ;;  %6409 = vmatprep.subr.bf16.mxu0 %v3827_v52  ;;  %v9328_v50 = vpop.eup %7060 }
 0xb50   :  { %6410 = vmatpush3.bf16.msra.mxu0 %v3827_v52 }
 0xb51   :  { %3760 = vadd.xlane.f32.xlu0 %v9326_v54 }
 0xb52   :  { %v3825_v30 = vpop.permute.xlu0 %3824 }
 0xb53   :  { %3762 = vadd.xlane.f32.xlu1 %v9328_v50  ;;  %6411 = vmatprep.subr.bf16.mxu0 %v3825_v30 }
 0xb54   :  { %6412 = vmatpush3.bf16.msra.mxu0 %v3825_v30  ;;  %v9332_v57 = vpop.eup %7062 }
 0xb55   :  { %v9334_v4 = vpop.eup %7064  ;;  %3764 = vadd.xlane.f32.xlu0 %v9332_v57 }
 0xb56   :  { %v9338_v53 = vpop.eup %7066 }
 0xb57   :  { %3766 = vadd.xlane.f32.xlu1 %v9334_v4  ;;  %v9340_v13 = vpop.eup %7068 }
 0xb59   :  { %3768 = vadd.xlane.f32.xlu0 %v9338_v53 }
 0xb5b   :  { %3770 = vadd.xlane.f32.xlu1 %v9340_v13 }
 0xb6c   :  { %4219 = vrot.lane.b32.xlu1 %v10372_v25, %s7327_s11 }
 0xb6f   :  { %4221 = vrot.lane.b32.xlu0 %v10438_v8, %s7327_s11 }
 0xb70   :  { %4217 = vrot.lane.b32.xlu1 %v10439_v14, %s7327_s11 }
 0xb73   :  { %4215 = vrot.lane.b32.xlu0 %v10377_v29, %s7327_s11 }
 0xb74   :  { %4213 = vrot.lane.b32.xlu1 %v10376_v58, %s7327_s11 }
 0xb77   :  { %4211 = vrot.lane.b32.xlu0 %v10378_v27, %s7327_s11 }
 0xb78   :  { %4209 = vrot.lane.b32.xlu1 %v10440_v36, %s7327_s11 }
 0xb7b   :  { %4207 = vrot.lane.b32.xlu0 %v10441_v26, %s7327_s11 }
 0xb7c   :  { %4191 = vrot.lane.b32.xlu1 %v10442_v44, %s7327_s11 }
 0xb7f   :  { %4193 = vrot.lane.b32.xlu0 %v10443_v16, %s7327_s11 }
 0xb80   :  { %4195 = vrot.lane.b32.xlu1 %v10444_v33, %s7327_s11 }
 0xb83   :  { %4197 = vrot.lane.b32.xlu0 %v10445_v20, %s7327_s11 }
 0xb84   :  { %4199 = vrot.lane.b32.xlu1 %v10446_v9, %s7327_s11 }
 0xb87   :  { %4201 = vrot.lane.b32.xlu0 %v10447_v34, %s7327_s11 }
 0xb88   :  { %4203 = vrot.lane.b32.xlu1 %v10448_v23, %s7327_s11 }
 0xb8b   :  { %4205 = vrot.lane.b32.xlu0 %v10449_v62, %s7327_s11 }
 0xb8c   :  { %4816 = vrot.lane.b32.xlu1 %v10438_v8, %s7328_s12 }
 0xb8f   :  { %v3745_v40 = vpop.xlane.xlu1 %3744  ;;  %4814 = vrot.lane.b32.xlu0 %v10372_v25, %s7328_s12 }
 0xb90   :  { %4812 = vrot.lane.b32.xlu1 %v10439_v14, %s7328_s12 }
 0xb93   :  { %v3741_v7 = vpop.xlane.xlu1 %3740  ;;  %4810 = vrot.lane.b32.xlu0 %v10377_v29, %s7328_s12 }
 0xb94   :  { %4808 = vrot.lane.b32.xlu1 %v10376_v58, %s7328_s12  ;;  %v3821_v58 = vpop.permute.xlu0 %3820 }
 0xb97   :  { %v3747_v35 = vpop.xlane.xlu1 %3746  ;;  %4806 = vrot.lane.b32.xlu0 %v10378_v27, %s7328_s12 }
 0xb98   :  { %4804 = vrot.lane.b32.xlu1 %v10440_v36, %s7328_s12  ;;  %7070 = vrcp.f32 %v3747_v35 }
 0xb99   :  { %7072 = vrcp.f32 %v3741_v7 }
 0xb9a   :  { %7074 = vrcp.f32 %v3745_v40 }
 0xb9b   :  { %v3743_v25 = vpop.xlane.xlu1 %3742  ;;  %4802 = vrot.lane.b32.xlu0 %v10441_v26, %s7328_s12 }
 0xb9c   :  { %7076 = vrcp.f32 %v3743_v25  ;;  %4786 = vrot.lane.b32.xlu1 %v10442_v44, %s7328_s12 }
 0xb9f   :  { %v3823_v29 = vpop.permute.xlu1 %3822  ;;  %4788 = vrot.lane.b32.xlu0 %v10443_v16, %s7328_s12 }
 0xba0   :  { %4790 = vrot.lane.b32.xlu1 %v10444_v33, %s7328_s12  ;;  %6413 = vmatprep.subr.bf16.mxu0 %v3823_v29 }
 0xba1   :  { %6414 = vmatpush3.bf16.msra.mxu0 %v3823_v29 }
 0xba2   :  { %6415 = vmatprep.subr.bf16.mxu0 %v3821_v58 }
 0xba3   :  { %4792 = vrot.lane.b32.xlu0 %v10445_v20, %s7328_s12 }
 0xba4   :  { %4794 = vrot.lane.b32.xlu1 %v10446_v9, %s7328_s12 }
 0xba5   :  { %v7071_v27 = vpop.eup %7070  ;;  %6416 = vmatpush3.bf16.msra.mxu0 %v3821_v58 }
 0xba6   :  { %v7073_v11 = vpop.eup %7072  ;;  %6433 = vmatprep.subr.bf16.mxu0 %v10450_v32  ;;  %v3791_v30 = vmul.f32 %v7071_v27, %v9288_v24 }
 0xba7   :  { %v7075_v17 = vpop.eup %7074  ;;  %4796 = vrot.lane.b32.xlu0 %v10447_v34, %s7328_s12  ;;  %v3788_v8 = vmul.f32 %v7073_v11, %v9285_v2  ;;  %v10451_v2 = vld [vmem:[#allocation82_spill] sm:$0xff] }
 0xba8   :  { %4798 = vrot.lane.b32.xlu1 %v10448_v23, %s7328_s12  ;;  %v3790_v36 = vmul.f32 %v7075_v17, %v9282_v0 }
 0xba9   :  { %v7077_v52 = vpop.eup %7076 }
 0xbaa   :  { %v3789_v14 = vmul.f32 %v7077_v52, %v9291_v63  ;;  %v3805_v44 = vpack.c.bf16 %v3791_v30, %v3790_v36 }
 0xbab   :  { %4800 = vrot.lane.b32.xlu0 %v10449_v62, %s7328_s12 }
 0xbac   :  { %4532 = vrot.lane.b32.xlu1 %v10401_v61, %s7327_s11  ;;  %v3804_v26 = vpack.c.bf16 %v3789_v14, %v3788_v8 }
 0xbae   :  { %6417 = vmatprep.mubr.bf16.mxu0 %v3804_v26 }
 0xbaf   :  { %6418 = vmatmul.mubr.bf16.vlgmr.msra.gmra.mxu0 %v3805_v44  ;;  %4534 = vrot.lane.b32.xlu0 %v10375_v28, %s7327_s11 }
 0xbb0   :  { %6434 = vmatpush3.bf16.msra.mxu0 %v10450_v32 }
 0xbb1   :  { %6435 = vmatprep.subr.bf16.mxu0 %v10451_v2 }
 0xbb4   :  { %6436 = vmatpush3.bf16.msra.mxu0 %v10451_v2 }
 0xbce   :  { %v3751_v0 = vpop.xlane.xlu0 %3750 }
 0xbcf   :  { %7078 = vrcp.f32 %v3751_v0 }
 0xbd0   :  { %v3749_v24 = vpop.xlane.xlu1 %3748 }
 0xbd1   :  { %7080 = vrcp.f32 %v3749_v24 }
 0xbd2   :  { %v3753_v63 = vpop.xlane.xlu0 %3752 }
 0xbd3   :  { %7082 = vrcp.f32 %v3753_v63 }
 0xbd4   :  { %v3755_v16 = vpop.xlane.xlu1 %3754 }
 0xbd5   :  { %7084 = vrcp.f32 %v3755_v16 }
 0xbd6   :  { %v3757_v33 = vpop.xlane.xlu0 %3756 }
 0xbd7   :  { %7086 = vrcp.f32 %v3757_v33 }
 0xbd8   :  { %v3759_v20 = vpop.xlane.xlu1 %3758 }
 0xbd9   :  { %7088 = vrcp.f32 %v3759_v20 }
 0xbda   :  { %v3761_v9 = vpop.xlane.xlu0 %3760 }
 0xbdb   :  { %7090 = vrcp.f32 %v3761_v9 }
 0xbdc   :  { %v7079_v34 = vpop.eup %7078  ;;  %v3763_v23 = vpop.xlane.xlu1 %3762 }
 0xbdd   :  { %7092 = vrcp.f32 %v3763_v23  ;;  %v3793_v35 = vmul.f32 %v7079_v34, %v9306_v21 }
 0xbde   :  { %v7081_v62 = vpop.eup %7080  ;;  %v3765_v40 = vpop.xlane.xlu0 %3764 }
 0xbdf   :  { %v3792_v7 = vmul.f32 %v7081_v62, %v9311_v10  ;;  %7094 = vrcp.f32 %v3765_v40 }
 0xbe0   :  { %v7083_v25 = vpop.eup %7082  ;;  %v3767_v29 = vpop.xlane.xlu1 %3766 }
 0xbe1   :  { %7096 = vrcp.f32 %v3767_v29  ;;  %v3806_v58 = vpack.c.bf16 %v3793_v35, %v3792_v7  ;;  %v3794_v32 = vmul.f32 %v7083_v25, %v9314_v38 }
 0xbe2   :  { %v7085_v27 = vpop.eup %7084  ;;  %v3769_v11 = vpop.xlane.xlu0 %3768 }
 0xbe3   :  { %6421 = vmatprep.mubr.bf16.mxu0 %v3806_v58  ;;  %v3795_v17 = vmul.f32 %v7085_v27, %v9317_v60  ;;  %7098 = vrcp.f32 %v3769_v11 }
 0xbe4   :  { %v3771_v52 = vpop.xlane.xlu1 %3770  ;;  %v7087_v30 = vpop.eup %7086 }
 0xbe5   :  { %7100 = vrcp.f32 %v3771_v52  ;;  %v3807_v8 = vpack.c.bf16 %v3795_v17, %v3794_v32  ;;  %v3796_v21 = vmul.f32 %v7087_v30, %v9320_v37 }
 0xbe6   :  { %v7089_v10 = vpop.eup %7088  ;;  %v9424_v14 = vpop.permute.xlu0 %4221 }
 0xbe7   :  { %6422 = vmatmul.mubr.bf16.gmra.mxu0 %v3807_v8  ;;  %v3797_v36 = vmul.f32 %v7089_v10, %v9322_v12  ;;  %6689 = vmatprep.subr.msk.bf16.mxu0 %vm686_vm0, %v9424_v14  ;;  %v4269_v61 = vsel %vm686_vm0, %v9424_v14, 0 }
 0xbe8   :  { %v9430_v26 = vpop.permute.xlu1 %4219  ;;  %v7091_v38 = vpop.eup %7090 }
 0xbe9   :  { %v3808_v60 = vpack.c.bf16 %v3797_v36, %v3796_v21  ;;  %v3798_v0 = vmul.f32 %v7091_v38, %v9326_v54 }
 0xbea   :  { %v7093_v44 = vpop.eup %7092  ;;  %v9432_v2 = vpop.permute.xlu0 %4215 }
 0xbeb   :  { %6425 = vmatprep.mubr.bf16.mxu0 %v3808_v60  ;;  %v3799_v24 = vmul.f32 %v7093_v44, %v9328_v50 }
 0xbec   :  { %v9436_v63 = vpop.permute.xlu1 %4217  ;;  %v7095_v37 = vpop.eup %7094 }
 0xbed   :  { %v3809_v16 = vpack.c.bf16 %v3799_v24, %v3798_v0  ;;  %v3800_v20 = vmul.f32 %v7095_v37, %v9332_v57 }
 0xbee   :  { %v7097_v12 = vpop.eup %7096  ;;  %v9438_v33 = vpop.permute.xlu0 %4211 }
 0xbef   :  { %6426 = vmatmul.mubr.bf16.gmra.mxu0 %v3809_v16  ;;  %v3801_v9 = vmul.f32 %v7097_v12, %v9334_v4 }
 0xbf0   :  { %v4214_v34 = vpop.permute.xlu1 %4213  ;;  %v7099_v23 = vpop.eup %7098 }
 0xbf1   :  { %v3810_v62 = vpack.c.bf16 %v3801_v9, %v3800_v20  ;;  %v3802_v54 = vmul.f32 %v7099_v23, %v9338_v53  ;;  %v4257_v14 = vsel %vm686_vm0, %v4214_v34, 0 }
 0xbf2   :  { %v7101_v40 = vpop.eup %7100  ;;  %v9442_v7 = vpop.permute.xlu0 %4207 }
 0xbf3   :  { %6429 = vmatprep.mubr.bf16.mxu0 %v3810_v62  ;;  %v3803_v50 = vmul.f32 %v7101_v40, %v9340_v13 }
 0xbf4   :  { %v4210_v35 = vpop.permute.xlu1 %4209 }
 0xbf5   :  { %v3811_v25 = vpack.c.bf16 %v3803_v50, %v3802_v54 }
 0xbf6   :  { %v9446_v29 = vpop.permute.xlu0 %4193 }
 0xbf7   :  { %6430 = vmatmul.mubr.bf16.gmra.mxu0 %v3811_v25 }
 0xbf8   :  { %v9448_v58 = vpop.permute.xlu1 %4191 }
 0xbfa   :  { %v9450_v57 = vpop.permute.xlu0 %4197 }
 0xbfc   :  { %v9452_v4 = vpop.permute.xlu1 %4195 }
 0xbfe   :  { %v9454_v27 = vpop.permute.xlu0 %4201 }
 0xc00   :  { %v9456_v11 = vpop.permute.xlu1 %4199 }
 0xc02   :  { %v9458_v32 = vpop.permute.xlu0 %4205 }
 0xc04   :  { %v9460_v53 = vpop.permute.xlu1 %4203 }
 0xc06   :  { %v9462_v13 = vpop.permute.xlu0 %4814 }
 0xc08   :  { %v9464_v17 = vpop.permute.xlu1 %4816 }
 0xc0a   :  { %v9466_v52 = vpop.permute.xlu0 %4810 }
 0xc0c   :  { %v9468_v30 = vpop.permute.xlu1 %4812 }
 0xc0e   :  { %v9470_v8 = vpop.permute.xlu0 %4806 }
 0xc10   :  { %v9472_v10 = vpop.permute.xlu1 %4808 }
 0xc12   :  { %v9474_v21 = vpop.permute.xlu0 %4802 }
 0xc14   :  { %v9476_v36 = vpop.permute.xlu1 %4804 }
 0xc16   :  { %v9478_v38 = vpop.permute.xlu0 %4788 }
 0xc18   :  { %v9480_v60 = vpop.permute.xlu1 %4786 }
 0xc1a   :  { %v9482_v44 = vpop.permute.xlu0 %4792 }
 0xc1c   :  { %v9484_v0 = vpop.permute.xlu1 %4790 }
 0xc1e   :  { %v9486_v24 = vpop.permute.xlu0 %4796 }
 0xc20   :  { %v9488_v37 = vpop.permute.xlu1 %4794 }
 0xc22   :  { %v9490_v16 = vpop.permute.xlu0 %4800 }
 0xc24   :  { %v9492_v12 = vpop.permute.xlu1 %4798 }
 0xc26   :  { %v4535_v20 = vpop.permute.xlu0 %4534 }
 0xc27   :  { %6505 = vmatprep.subr.bf16.mxu1 %v4535_v20 }
 0xc28   :  { %v4533_v9 = vpop.permute.xlu1 %4532  ;;  %6506 = vmatpush3.bf16.msra.mxu1 %v4535_v20  ;;  %v4266_v20 = vsel %vm686_vm0, %v9430_v26, 0 }
 0xc29   :  { %6507 = vmatprep.subr.bf16.mxu1 %v4533_v9 }
 0xc2c   :  { %6508 = vmatpush3.bf16.msra.mxu1 %v4533_v9  ;;  %v4263_v9 = vsel %vm686_vm0, %v9436_v63, 0 }
 0xc6f   :  { %v6419_v23 = vpop.f32.mrf.mxu0 }
 0xc71   :  { %v3878_v62 = vpop.f32.mrf.mxu0 }
 0xc73   :  { %v6420_v40 = vpop.f32.mrf.mxu0 }
 0xc74   :  { %v3942_v25 = vpack.c.bf16 %v6420_v40, %v6419_v23  ;;  %v4251_v23 = vsel %vm686_vm0, %v4210_v35, 0 }
 0xc75   :  { %v3881_v54 = vpop.f32.mrf.mxu0 }
 0xc76   :  { %v3941_v50 = vpack.c.bf16 %v3881_v54, %v3878_v62 }
 0xc78   :  { %6437 = vmatprep.mubr.msk.bf16.mxu0 %vm686_vm0, %v3941_v50 }
 0xc79   :  { %6438 = vmatmul.mubr.msk.bf16.vlgmr.msra.gmra.mxu0 %vm686_vm0, %v3942_v25 }
 0xc7a   :  { %6474 = vmatpush3.bf16.xpose.msra.mxu0 %v4269_v61  ;;  %v4260_v61 = vsel %vm686_vm0, %v9432_v2, 0 }
 0xc7b   :  { %6690 = vmatprep.subr.msk.bf16.mxu0 %vm686_vm0, %v9430_v26  ;;  %v4254_v26 = vsel %vm686_vm0, %v9438_v33, 0 }
 0xc82   :  { %6476 = vmatpush3.bf16.xpose.msra.mxu0 %v4266_v20 }
 0xc83   :  { %6691 = vmatprep.subr.msk.bf16.mxu0 %vm686_vm0, %v9436_v63 }
 0xc8a   :  { %6478 = vmatpush3.bf16.xpose.msra.mxu0 %v4263_v9 }
 0xc8b   :  { %6692 = vmatprep.subr.msk.bf16.mxu0 %vm686_vm0, %v9432_v2 }
 0xc92   :  { %6480 = vmatpush3.bf16.xpose.msra.mxu0 %v4260_v61 }
 0xc93   :  { %6693 = vmatprep.subr.msk.bf16.mxu0 %vm686_vm0, %v4214_v34 }
 0xc9a   :  { %6482 = vmatpush3.bf16.xpose.msra.mxu0 %v4257_v14 }
 0xc9b   :  { %6694 = vmatprep.subr.msk.bf16.mxu0 %vm686_vm0, %v9438_v33  ;;  %v4248_v33 = vsel %vm686_vm0, %v9442_v7, 0 }
 0xca2   :  { %6484 = vmatpush3.bf16.xpose.msra.mxu0 %v4254_v26 }
 0xca3   :  { %6695 = vmatprep.subr.msk.bf16.mxu0 %vm686_vm0, %v4210_v35 }
 0xca7   :  { %v6423_v63 = vpop.f32.mrf.mxu0 }
 0xca9   :  { %v3894_v62 = vpop.f32.mrf.mxu0 }
 0xcaa   :  { %6486 = vmatpush3.bf16.xpose.msra.mxu0 %v4251_v23 }
 0xcab   :  { %6696 = vmatprep.subr.msk.bf16.mxu0 %vm686_vm0, %v9442_v7  ;;  %v6424_v2 = vpop.f32.mrf.mxu0  ;;  %v4864_v7 = vsel %vm686_vm0, %v9464_v17, 0 }
 0xcac   :  { %v3944_v54 = vpack.c.bf16 %v6424_v2, %v6423_v63 }
 0xcad   :  { %v3897_v34 = vpop.f32.mrf.mxu0 }
 0xcae   :  { %v3943_v40 = vpack.c.bf16 %v3897_v34, %v3894_v62  ;;  %v4861_v34 = vsel %vm686_vm0, %v9462_v13, 0 }
 0xcaf   :  { %v6427_v50 = vpop.f32.mrf.mxu0 }
 0xcb0   :  { %6441 = vmatprep.mubr.msk.bf16.mxu0 %vm686_vm0, %v3943_v40 }
 0xcb1   :  { %v3910_v25 = vpop.f32.mrf.mxu0  ;;  %6442 = vmatmul.mubr.msk.bf16.gmra.mxu0 %vm686_vm0, %v3944_v54 }
 0xcb2   :  { %6488 = vmatpush3.bf16.xpose.msra.mxu0 %v4248_v33 }
 0xcb3   :  { %6697 = vmatprep.subr.msk.bf16.mxu0 %vm686_vm0, %v9464_v17  ;;  %v6428_v35 = vpop.f32.mrf.mxu0 }
 0xcb4   :  { %v3946_v61 = vpack.c.bf16 %v6428_v35, %v6427_v50 }
 0xcb5   :  { %v3913_v20 = vpop.f32.mrf.mxu0 }
 0xcb6   :  { %v3945_v9 = vpack.c.bf16 %v3913_v20, %v3910_v25 }
 0xcb7   :  { %v6431_v14 = vpop.f32.mrf.mxu0 }
 0xcb8   :  { %6445 = vmatprep.mubr.msk.bf16.mxu0 %vm686_vm0, %v3945_v9 }
 0xcb9   :  { %v3926_v26 = vpop.f32.mrf.mxu0  ;;  %6446 = vmatmul.mubr.msk.bf16.gmra.mxu0 %vm686_vm0, %v3946_v61 }
 0xcbb   :  { %v6432_v63 = vpop.f32.mrf.mxu0 }
 0xcbc   :  { %v3948_v2 = vpack.c.bf16 %v6432_v63, %v6431_v14 }
 0xcbd   :  { %v3929_v23 = vpop.f32.mrf.mxu0 }
 0xcbe   :  { %v3947_v62 = vpack.c.bf16 %v3929_v23, %v3926_v26 }
 0xcc0   :  { %6449 = vmatprep.mubr.msk.bf16.mxu0 %vm686_vm0, %v3947_v62 }
 0xcc1   :  { %6450 = vmatmul.mubr.msk.bf16.gmra.mxu0 %vm686_vm0, %v3948_v2 }
 0xcc2   :  { %6489 = vmatprep.mubr.msk.bf16.mxu0 %vm686_vm0, %v9448_v58  ;;  %v4855_v58 = vsel %vm686_vm0, %v9466_v52, 0 }
 0xcc9   :  { %6490 = vmatmul.mubr.msk.bf16.vlgmr.msra.gmra.mxu0 %vm686_vm0, %v9446_v29  ;;  %v4858_v29 = vsel %vm686_vm0, %v9468_v30, 0 }
 0xcca   :  { %6558 = vmatpush3.bf16.xpose.msra.mxu0 %v4864_v7  ;;  %6493 = vmatprep.mubr.msk.bf16.mxu0 %vm686_vm0, %v9452_v4  ;;  %v4849_v4 = vsel %vm686_vm0, %v9470_v8, 0 }
 0xccb   :  { %6698 = vmatprep.subr.msk.bf16.mxu0 %vm686_vm0, %v9462_v13 }
 0xcd1   :  { %6494 = vmatmul.mubr.msk.bf16.gmra.mxu0 %vm686_vm0, %v9450_v57  ;;  %v4852_v57 = vsel %vm686_vm0, %v9472_v10, 0 }
 0xcd2   :  { %6560 = vmatpush3.bf16.xpose.msra.mxu0 %v4861_v34  ;;  %6497 = vmatprep.mubr.msk.bf16.mxu0 %vm686_vm0, %v9456_v11  ;;  %v4843_v11 = vsel %vm686_vm0, %v9474_v21, 0 }
 0xcd3   :  { %6699 = vmatprep.subr.msk.bf16.mxu0 %vm686_vm0, %v9468_v30 }
 0xcd9   :  { %6498 = vmatmul.mubr.msk.bf16.gmra.mxu0 %vm686_vm0, %v9454_v27  ;;  %v4846_v27 = vsel %vm686_vm0, %v9476_v36, 0 }
 0xcda   :  { %6562 = vmatpush3.bf16.xpose.msra.mxu0 %v4858_v29  ;;  %6501 = vmatprep.mubr.msk.bf16.mxu0 %vm686_vm0, %v9460_v53 }
 0xcdb   :  { %6700 = vmatprep.subr.msk.bf16.mxu0 %vm686_vm0, %v9466_v52 }
 0xce1   :  { %6502 = vmatmul.mubr.msk.bf16.gmra.mxu0 %vm686_vm0, %v9458_v32 }
 0xce2   :  { %6564 = vmatpush3.bf16.xpose.msra.mxu0 %v4855_v58  ;;  %6573 = vmatprep.mubr.msk.bf16.mxu0 %vm686_vm0, %v9480_v60 }
 0xce3   :  { %6701 = vmatprep.subr.msk.bf16.mxu0 %vm686_vm0, %v9472_v10 }
 0xcea   :  { %6566 = vmatpush3.bf16.xpose.msra.mxu0 %v4852_v57 }
 0xceb   :  { %6702 = vmatprep.subr.msk.bf16.mxu0 %vm686_vm0, %v9470_v8 }
 0xcf2   :  { %6568 = vmatpush3.bf16.xpose.msra.mxu0 %v4849_v4 }
 0xcf3   :  { %6703 = vmatprep.subr.msk.bf16.mxu0 %vm686_vm0, %v9476_v36 }
 0xcfa   :  { %6570 = vmatpush3.bf16.xpose.msra.mxu0 %v4846_v27 }
 0xcfb   :  { %6704 = vmatprep.subr.msk.bf16.mxu0 %vm686_vm0, %v9474_v21 }
 0xd02   :  { %6572 = vmatpush3.bf16.xpose.msra.mxu0 %v4843_v11 }
 0xd09   :  { %6574 = vmatmul.mubr.msk.bf16.vlgmr.msra.gmra.mxu0 %vm686_vm0, %v9478_v38 }
 0xd0a   :  { %6577 = vmatprep.mubr.msk.bf16.mxu0 %vm686_vm0, %v9484_v0 }
 0xd11   :  { %6578 = vmatmul.mubr.msk.bf16.gmra.mxu0 %vm686_vm0, %v9482_v44 }
 0xd12   :  { %6581 = vmatprep.mubr.msk.bf16.mxu0 %vm686_vm0, %v9488_v37 }
 0xd19   :  { %6582 = vmatmul.mubr.msk.bf16.gmra.mxu0 %vm686_vm0, %v9486_v24 }
 0xd1a   :  { %6585 = vmatprep.mubr.msk.bf16.mxu0 %vm686_vm0, %v9492_v12 }
 0xd21   :  { %6586 = vmatmul.mubr.msk.bf16.gmra.mxu0 %vm686_vm0, %v9490_v16 }
 0xd39   :  { %v9592_v32 = vpop.f32.mrf.mxu0 }
 0xd3b   :  { %v9594_v53 = vpop.f32.mrf.mxu0 }
 0xd3d   :  { %v9596_v13 = vpop.f32.mrf.mxu0 }
 0xd3f   :  { %v9598_v17 = vpop.f32.mrf.mxu0 }
 0xd71   :  { %v9600_v52 = vpop.f32.mrf.mxu0 }
 0xd72   :  { %10452 = vst [vmem:[#allocation39_spill] sm:$0xff] %v9600_v52 }
 0xd73   :  { %v9602_v30 = vpop.f32.mrf.mxu0 }
 0xd74   :  { %10453 = vst [vmem:[#allocation18_spill] sm:$0xff] %v9602_v30 }
 0xd75   :  { %v9604_v8 = vpop.f32.mrf.mxu0 }
 0xd76   :  { %10454 = vst [vmem:[#allocation21_spill] sm:$0xff] %v9604_v8 }
 0xd77   :  { %v9606_v10 = vpop.f32.mrf.mxu0 }
 0xd78   :  { %10455 = vst [vmem:[#allocation12_spill] sm:$0xff] %v9606_v10 }
 0xd79   :  { %v9608_v21 = vpop.f32.mrf.mxu0 }
 0xd7a   :  { %10456 = vst [vmem:[#allocation22_spill] sm:$0xff] %v9608_v21 }
 0xd7b   :  { %v9610_v36 = vpop.f32.mrf.mxu0 }
 0xd7c   :  { %10457 = vst [vmem:[#allocation24_spill] sm:$0xff] %v9610_v36 }
 0xd7d   :  { %v9612_v38 = vpop.f32.mrf.mxu0 }
 0xd7e   :  { %10458 = vst [vmem:[#allocation25_spill] sm:$0xff] %v9612_v38 }
 0xd7f   :  { %v9614_v60 = vpop.f32.mrf.mxu0 }
 0xd80   :  { %10459 = vst [vmem:[#allocation13_spill] sm:$0xff] %v9614_v60 }
 0xd81   :  { %v9616_v44 = vpop.f32.mrf.mxu0 }
 0xd82   :  { %10460 = vst [vmem:[#allocation62_spill] sm:$0xff] %v9616_v44 }
 0xd83   :  { %v9618_v0 = vpop.f32.mrf.mxu0 }
 0xd84   :  { %10461 = vst [vmem:[#allocation80_spill] sm:$0xff] %v9618_v0 }
 0xd85   :  { %v9620_v24 = vpop.f32.mrf.mxu0 }
 0xd86   :  { %10462 = vst [vmem:[#allocation60_spill] sm:$0xff] %v9620_v24 }
 0xd87   :  { %v9622_v37 = vpop.f32.mrf.mxu0 }
 0xd88   :  { %10463 = vst [vmem:[#allocation56_spill] sm:$0xff] %v9622_v37 }
 0xd89   :  { %v6491_v16 = vpop.f32.mrf.mxu0 }
 0xd8a   :  { %v4314_v12 = vadd.f32 %v6491_v16, %v10422_v19 }
 0xd8b   :  { %v4305_v40 = vpop.f32.mrf.mxu0 }
 0xd8c   :  { %v4306_v54 = vadd.f32 %v4305_v40, %v10423_v6  ;;  %4372 = vmax.xlane.f32.xlu0 %v4314_v12 }
 0xd8d   :  { %v6492_v50 = vpop.f32.mrf.mxu0 }
 0xd8e   :  { %4368 = vmax.xlane.f32.xlu1 %v4306_v54  ;;  %v4317_v33 = vadd.f32 %v6492_v50, %v10424_v1 }
 0xd8f   :  { %v4308_v25 = vpop.f32.mrf.mxu0 }
 0xd90   :  { %v4309_v35 = vadd.f32 %v4308_v25, %v10425_v5 }
 0xd91   :  { %v6495_v20 = vpop.f32.mrf.mxu0 }
 0xd92   :  { %4370 = vmax.xlane.f32.xlu0 %v4309_v35  ;;  %4374 = vmax.xlane.f32.xlu1 %v4317_v33  ;;  %v4330_v61 = vadd.f32 %v6495_v20, %v10426_v3 }
 0xd93   :  { %v4321_v9 = vpop.f32.mrf.mxu0 }
 0xd94   :  { %v4322_v23 = vadd.f32 %v4321_v9, %v10428_v15 }
 0xd95   :  { %v6496_v14 = vpop.f32.mrf.mxu0 }
 0xd96   :  { %v9630_v26 = vadd.f32 %v6496_v14, %v10427_v42  ;;  %4380 = vmax.xlane.f32.xlu0 %v4330_v61 }
 0xd97   :  { %v4324_v63 = vpop.f32.mrf.mxu0 }
 0xd98   :  { %4382 = vmax.xlane.f32.xlu1 %v9630_v26  ;;  %v4325_v2 = vadd.f32 %v4324_v63, %v10429_v59 }
 0xd99   :  { %v6499_v62 = vpop.f32.mrf.mxu0 }
 0xd9a   :  { %4376 = vmax.xlane.f32.xlu0 %v4322_v23  ;;  %v9636_v34 = vadd.f32 %v6499_v62, %v10430_v31 }
 0xd9b   :  { %v4337_v7 = vpop.f32.mrf.mxu0 }
 0xd9c   :  { %4378 = vmax.xlane.f32.xlu1 %v4325_v2  ;;  %v9643_v4 = vadd.f32 %v4337_v7, %v10432_v22 }
 0xd9d   :  { %v6500_v29 = vpop.f32.mrf.mxu0 }
 0xd9e   :  { %v9639_v58 = vadd.f32 %v6500_v29, %v10431_v18  ;;  %4388 = vmax.xlane.f32.xlu0 %v9636_v34 }
 0xd9f   :  { %v4340_v57 = vpop.f32.mrf.mxu0 }
 0xda0   :  { %4390 = vmax.xlane.f32.xlu1 %v9639_v58  ;;  %v9647_v11 = vadd.f32 %v4340_v57, %v10433_v39 }
 0xda1   :  { %v6503_v27 = vpop.f32.mrf.mxu0 }
 0xda2   :  { %4384 = vmax.xlane.f32.xlu0 %v9643_v4  ;;  %v9651_v16 = vadd.f32 %v6503_v27, %v10434_v43 }
 0xda3   :  { %v4353_v40 = vpop.f32.mrf.mxu0 }
 0xda4   :  { %4386 = vmax.xlane.f32.xlu1 %v9647_v11  ;;  %v9656_v50 = vadd.f32 %v4353_v40, %v10436_v48 }
 0xda5   :  { %v6504_v25 = vpop.f32.mrf.mxu0 }
 0xda6   :  { %4396 = vmax.xlane.f32.xlu0 %v9651_v16  ;;  %v9668_v20 = vadd.f32 %v6504_v25, %v10435_v41 }
 0xda7   :  { %v4356_v9 = vpop.f32.mrf.mxu0 }
 0xda8   :  { %v9672_v14 = vadd.f32 %v4356_v9, %v10437_v47 }
 0xdaa   :  { %4392 = vmax.xlane.f32.xlu0 %v9656_v50 }
 0xdb5   :  { %4526 = vrot.lane.b32.xlu1 %v10407_v51, %s7327_s11 }
 0xdc0   :  { %4530 = vrot.lane.b32.xlu0 %v10403_v56, %s7327_s11 }
 0xdc4   :  { %4528 = vrot.lane.b32.xlu0 %v10405_v46, %s7327_s11 }
 0xdc8   :  { %4522 = vrot.lane.b32.xlu0 %v10410_v49, %s7327_s11 }
 0xdd9   :  { %4398 = vmax.xlane.f32.xlu1 %v9668_v20 }
 0xddd   :  { %4394 = vmax.xlane.f32.xlu1 %v9672_v14 }
 0xdee   :  { %4524 = vrot.lane.b32.xlu1 %v10409_v45, %s7327_s11 }
 0xe15   :  { %v4373_v63 = vpop.xlane.xlu0 %4372 }
 0xe16   :  { %v4402_v62 = vsub.f32 %v4314_v12, %v4373_v63 }
 0xe17   :  { %v4369_v7 = vpop.xlane.xlu1 %4368 }
 0xe18   :  { %v4420_v29 = vmul.f32 1.442695, %v4402_v62  ;;  %v4400_v57 = vsub.f32 %v4306_v54, %v4369_v7 }
 0xe1a   :  { %7102 = vpow2.f32 %v4420_v29  ;;  %v4416_v27 = vmul.f32 1.442695, %v4400_v57 }
 0xe1b   :  { %v4375_v40 = vpop.xlane.xlu1 %4374  ;;  %v4371_v25 = vpop.xlane.xlu0 %4370 }
 0xe1c   :  { %v4403_v37 = vsub.f32 %v4317_v33, %v4375_v40  ;;  %7104 = vpow2.f32 %v4416_v27  ;;  %v4401_v0 = vsub.f32 %v4309_v35, %v4371_v25 }
 0xe1e   :  { %v4422_v24 = vmul.f32 1.442695, %v4403_v37  ;;  %v4418_v38 = vmul.f32 1.442695, %v4401_v0 }
 0xe1f   :  { %v4381_v9 = vpop.xlane.xlu0 %4380 }
 0xe20   :  { %v4406_v44 = vsub.f32 %v4330_v61, %v4381_v9  ;;  %7106 = vpow2.f32 %v4422_v24 }
 0xe21   :  { %v4383_v60 = vpop.xlane.xlu1 %4382 }
 0xe22   :  { %v4428_v36 = vmul.f32 1.442695, %v4406_v44  ;;  %v4407_v12 = vsub.f32 %v9630_v26, %v4383_v60 }
 0xe23   :  { %v4377_v21 = vpop.xlane.xlu0 %4376 }
 0xe24   :  { %7108 = vpow2.f32 %v4428_v36  ;;  %v4404_v63 = vsub.f32 %v4322_v23, %v4377_v21  ;;  %v4430_v37 = vmul.f32 1.442695, %v4407_v12 }
 0xe25   :  { %v4379_v54 = vpop.xlane.xlu1 %4378  ;;  %7110 = vpow2.f32 %v4418_v38 }
 0xe26   :  { %v4424_v62 = vmul.f32 1.442695, %v4404_v63  ;;  %v4405_v7 = vsub.f32 %v4325_v2, %v4379_v54 }
 0xe27   :  { %v9678_v29 = vpop.eup %7102  ;;  %v4389_v33 = vpop.xlane.xlu0 %4388 }
 0xe28   :  { %7112 = vpow2.f32 %v4424_v62  ;;  %v4426_v35 = vmul.f32 1.442695, %v4405_v7  ;;  %v4410_v61 = vsub.f32 %v9636_v34, %v4389_v33  ;;  %4452 = vadd.xlane.f32.xlu1 %v9678_v29 }
 0xe29   :  { %v4391_v44 = vpop.xlane.xlu1 %4390  ;;  %v9682_v36 = vpop.eup %7104 }
 0xe2a   :  { %7114 = vpow2.f32 %v4426_v35  ;;  %v4436_v21 = vmul.f32 1.442695, %v4410_v61  ;;  %v4411_v23 = vsub.f32 %v9639_v58, %v4391_v44 }
 0xe2b   :  { %v4385_v60 = vpop.xlane.xlu0 %4384  ;;  %7116 = vpow2.f32 %v4430_v37 }
 0xe2c   :  { %v4408_v38 = vsub.f32 %v9643_v4, %v4385_v60  ;;  %4448 = vadd.xlane.f32.xlu1 %v9682_v36  ;;  %7118 = vpow2.f32 %v4436_v21  ;;  %v4438_v9 = vmul.f32 1.442695, %v4411_v23  ;;  %v6575_v21 = vpop.f32.mrf.mxu0 }
 0xe2d   :  { %v4387_v0 = vpop.xlane.xlu1 %4386  ;;  %v9687_v26 = vpop.eup %7106 }
 0xe2e   :  { %v4409_v24 = vsub.f32 %v9647_v11, %v4387_v0  ;;  %v4432_v34 = vmul.f32 1.442695, %v4408_v38  ;;  %v4900_v38 = vpop.f32.mrf.mxu0 }
 0xe2f   :  { %v4397_v2 = vpop.xlane.xlu0 %4396 }
 0xe30   :  { %v4434_v57 = vmul.f32 1.442695, %v4409_v24  ;;  %v4414_v27 = vsub.f32 %v9651_v16, %v4397_v2  ;;  %4454 = vadd.xlane.f32.xlu1 %v9687_v26  ;;  %v6576_v0 = vpop.f32.mrf.mxu0 }
 0xe31   :  { %v9692_v40 = vpop.eup %7108  ;;  %v4527_v33 = vpop.permute.xlu1 %4526 }
 0xe32   :  { %7120 = vpow2.f32 %v4434_v57  ;;  %v4444_v4 = vmul.f32 1.442695, %v4414_v27  ;;  %4460 = vadd.xlane.f32.xlu0 %v9692_v40  ;;  %v9695_v25 = vpop.eup %7110  ;;  %v4903_v24 = vpop.f32.mrf.mxu0 }
 0xe33   :  { %v4393_v11 = vpop.xlane.xlu0 %4392  ;;  %7122 = vpow2.f32 %v4432_v34 }
 0xe34   :  { %v4412_v58 = vsub.f32 %v9656_v50, %v4393_v11  ;;  %4450 = vadd.xlane.f32.xlu1 %v9695_v25  ;;  %7124 = vpow2.f32 %v4444_v4  ;;  %v6579_v23 = vpop.f32.mrf.mxu0 }
 0xe35   :  { %v9699_v12 = vpop.eup %7112  ;;  %7126 = vpow2.f32 %v4438_v9 }
 0xe36   :  { %v4440_v16 = vmul.f32 1.442695, %v4412_v58  ;;  %4456 = vadd.xlane.f32.xlu0 %v9699_v12  ;;  %v4916_v2 = vpop.f32.mrf.mxu0 }
 0xe37   :  { %v9702_v63 = vpop.eup %7114  ;;  %v4531_v54 = vpop.permute.xlu0 %4530 }
 0xe38   :  { %4458 = vadd.xlane.f32.xlu1 %v9702_v63  ;;  %6509 = vmatprep.subr.bf16.mxu1 %v4531_v54  ;;  %v9705_v62 = vpop.eup %7116  ;;  %7128 = vpow2.f32 %v4440_v16  ;;  %v6580_v57 = vpop.f32.mrf.mxu0 }
 0xe39   :  { %6510 = vmatpush3.bf16.msra.mxu1 %v4531_v54  ;;  %v9708_v7 = vpop.eup %7118 }
 0xe3a   :  { %4462 = vadd.xlane.f32.xlu0 %v9705_v62  ;;  %v4919_v9 = vpop.f32.mrf.mxu0 }
 0xe3b   :  { %v4529_v50 = vpop.permute.xlu0 %4528 }
 0xe3c   :  { %6511 = vmatprep.subr.bf16.mxu1 %v4529_v50 }
 0xe3d   :  { %6512 = vmatpush3.bf16.msra.mxu1 %v4529_v50  ;;  %v6583_v50 = vpop.f32.mrf.mxu0 }
 0xe3e   :  { %4468 = vadd.xlane.f32.xlu0 %v9708_v7  ;;  %6513 = vmatprep.subr.bf16.mxu1 %v4527_v33 }
 0xe3f   :  { %v9711_v37 = vpop.eup %7120  ;;  %v4932_v10 = vpop.f32.mrf.mxu0 }
 0xe40   :  { %4466 = vadd.xlane.f32.xlu1 %v9711_v37  ;;  %v9714_v35 = vpop.eup %7122 }
 0xe41   :  { %6514 = vmatpush3.bf16.msra.mxu1 %v4527_v33  ;;  %v9717_v61 = vpop.eup %7124  ;;  %v4523_v33 = vpop.permute.xlu0 %4522 }
 0xe42   :  { %4464 = vadd.xlane.f32.xlu0 %v9714_v35  ;;  %v9720_v44 = vpop.eup %7126  ;;  %v6584_v8 = vpop.f32.mrf.mxu0 }
 0xe44   :  { %4476 = vadd.xlane.f32.xlu1 %v9717_v61  ;;  %v4935_v52 = vpop.f32.mrf.mxu0 }
 0xe45   :  { %v9723_v60 = vpop.eup %7128 }
 0xe46   :  { %4470 = vadd.xlane.f32.xlu0 %v9720_v44 }
 0xe48   :  { %4472 = vadd.xlane.f32.xlu1 %v9723_v60 }
 0xe59   :  { %4520 = vrot.lane.b32.xlu1 %v10411_v55, %s7327_s11 }
 0xe62   :  { %v4399_v34 = vpop.xlane.xlu1 %4398 }
 0xe63   :  { %v4415_v4 = vsub.f32 %v9668_v20, %v4399_v34  ;;  %v9734_v20 = vadd.f32 %v4916_v2, %v10428_v15  ;;  %v6587_v34 = vpop.f32.mrf.mxu0  ;;  %v9749_v15 = vadd.f32 %v4903_v24, %v10425_v5  ;;  %v9753_v2 = vadd.f32 %v6575_v21, %v10422_v19 }
 0xe64   :  { %v9767_v5 = vadd.f32 %v6579_v23, %v10426_v3  ;;  %v9773_v19 = vadd.f32 %v6580_v57, %v10427_v42  ;;  %v10464_v23 = vld [vmem:[#allocation40_spill] sm:$0xff] }
 0xe65   :  { %v4446_v54 = vmul.f32 1.442695, %v4415_v4  ;;  %v9744_v4 = vadd.f32 %v6587_v34, %v10434_v43  ;;  %v9761_v43 = vadd.f32 %v4919_v9, %v10429_v59  ;;  %v4948_v3 = vpop.f32.mrf.mxu0 }
 0xe66   :  { %v4395_v27 = vpop.xlane.xlu1 %4394  ;;  %v9797_v59 = vadd.f32 %v4948_v3, %v10436_v48 }
 0xe67   :  { %v4413_v11 = vsub.f32 %v9672_v14, %v4395_v27  ;;  %v9741_v27 = vadd.f32 %v4900_v38, %v10423_v6  ;;  %v9757_v6 = vadd.f32 %v6576_v0, %v10424_v1  ;;  %v9779_v1 = vadd.f32 %v4932_v10, %v10432_v22  ;;  %v6588_v42 = vpop.f32.mrf.mxu0 }
 0xe69   :  { %v4442_v58 = vmul.f32 1.442695, %v4413_v11 }
 0xe6a   :  { %v4525_v16 = vpop.permute.xlu1 %4524 }
 0xe6b   :  { %7130 = vpow2.f32 %v4442_v58  ;;  %6515 = vmatprep.subr.bf16.mxu1 %v4525_v16 }
 0xe6c   :  { %6516 = vmatpush3.bf16.msra.mxu1 %v4525_v16  ;;  %7132 = vpow2.f32 %v4446_v54 }
 0xe6d   :  { %6517 = vmatprep.subr.bf16.mxu1 %v4523_v33 }
 0xe70   :  { %6518 = vmatpush3.bf16.msra.mxu1 %v4523_v33 }
 0xe78   :  { %v9730_v30 = vpop.eup %7130 }
 0xe79   :  { %4474 = vadd.xlane.f32.xlu0 %v9730_v30  ;;  %v9736_v14 = vpop.eup %7132 }
 0xe7d   :  { %4478 = vadd.xlane.f32.xlu0 %v9736_v14  ;;  %4971 = vmax.xlane.f32.xlu1 %v9734_v20 }
 0xe81   :  { %4963 = vmax.xlane.f32.xlu0 %v9741_v27  ;;  %4991 = vmax.xlane.f32.xlu1 %v9744_v4 }
 0xe85   :  { %4965 = vmax.xlane.f32.xlu0 %v9749_v15 }
 0xe89   :  { %4967 = vmax.xlane.f32.xlu0 %v9753_v2 }
 0xe8d   :  { %4969 = vmax.xlane.f32.xlu0 %v9757_v6 }
 0xe91   :  { %4973 = vmax.xlane.f32.xlu0 %v9761_v43 }
 0xe92   :  { %5129 = vrot.lane.b32.xlu1 %v10375_v28, %s7328_s12  ;;  %v9785_v28 = vadd.f32 %v4935_v52, %v10433_v39  ;;  %v9805_v39 = vadd.f32 %v6588_v42, %v10435_v41 }
 0xe95   :  { %4975 = vmax.xlane.f32.xlu0 %v9767_v5 }
 0xe96   :  { %5125 = vrot.lane.b32.xlu1 %v10403_v56, %s7328_s12  ;;  %v9789_v56 = vadd.f32 %v6583_v50, %v10430_v31 }
 0xe99   :  { %4977 = vmax.xlane.f32.xlu0 %v9773_v19 }
 0xe9a   :  { %5123 = vrot.lane.b32.xlu1 %v10405_v46, %s7328_s12  ;;  %v9793_v46 = vadd.f32 %v6584_v8, %v10431_v18 }
 0xe9d   :  { %4979 = vmax.xlane.f32.xlu0 %v9779_v1 }
 0xe9e   :  { %5117 = vrot.lane.b32.xlu1 %v10410_v49, %s7328_s12  ;;  %v4951_v49 = vpop.f32.mrf.mxu0 }
 0xe9f   :  { %v9801_v22 = vadd.f32 %v4951_v49, %v10437_v47 }
 0xea1   :  { %4981 = vmax.xlane.f32.xlu0 %v9785_v28 }
 0xea5   :  { %4983 = vmax.xlane.f32.xlu0 %v9789_v56 }
 0xea9   :  { %4985 = vmax.xlane.f32.xlu0 %v9793_v46 }
 0xead   :  { %4987 = vmax.xlane.f32.xlu0 %v9797_v59 }
 0xeb1   :  { %v4453_v31 = vpop.xlane.xlu1 %4452  ;;  %4989 = vmax.xlane.f32.xlu0 %v9801_v22 }
 0xeb5   :  { %v4449_v18 = vpop.xlane.xlu1 %4448  ;;  %4993 = vmax.xlane.f32.xlu0 %v9805_v39 }
 0xeb6   :  { %7134 = vrcp.f32 %v4449_v18 }
 0xeb9   :  { %v4455_v52 = vpop.xlane.xlu1 %4454 }
 0xebb   :  { %v4461_v8 = vpop.xlane.xlu0 %4460 }
 0xebd   :  { %v4451_v48 = vpop.xlane.xlu1 %4450 }
 0xebe   :  { %7136 = vrcp.f32 %v4451_v48 }
 0xebf   :  { %v4457_v10 = vpop.xlane.xlu0 %4456  ;;  %7138 = vrcp.f32 %v4455_v52  ;;  %v10465_v52 = vld [vmem:[#allocation48_spill] sm:$0xff] }
 0xec1   :  { %v4459_v21 = vpop.xlane.xlu1 %4458 }
 0xec2   :  { %7140 = vrcp.f32 %v4459_v21 }
 0xec3   :  { %v4463_v38 = vpop.xlane.xlu0 %4462  ;;  %7142 = vrcp.f32 %v4453_v31  ;;  %v7135_v0 = vpop.eup %7134 }
 0xec4   :  { %7144 = vrcp.f32 %v4457_v10  ;;  %v4496_v11 = vmul.f32 %v7135_v0, %v9682_v36 }
 0xec5   :  { %7146 = vrcp.f32 %v4463_v38 }
 0xec7   :  { %v4469_v47 = vpop.xlane.xlu0 %4468 }
 0xec9   :  { %v4467_v24 = vpop.xlane.xlu1 %4466 }
 0xecb   :  { %v7137_v41 = vpop.eup %7136  ;;  %5127 = vrot.lane.b32.xlu0 %v10464_v23, %s7328_s12  ;;  %v4465_v57 = vpop.xlane.xlu0 %4464 }
 0xecc   :  { %v4497_v9 = vmul.f32 %v7137_v41, %v9695_v25  ;;  %7148 = vrcp.f32 %v4465_v57  ;;  %v7139_v54 = vpop.eup %7138 }
 0xecd   :  { %v4477_v58 = vpop.xlane.xlu1 %4476  ;;  %7150 = vrcp.f32 %v4461_v8  ;;  %v4499_v25 = vmul.f32 %v7139_v54, %v9687_v26 }
 0xece   :  { %v4512_v16 = vpack.c.bf16 %v4497_v9, %v4496_v11  ;;  %7152 = vrcp.f32 %v4467_v24 }
 0xecf   :  { %5121 = vrot.lane.b32.xlu0 %v10407_v51, %s7328_s12  ;;  %v4471_v50 = vpop.xlane.xlu0 %4470  ;;  %v7141_v34 = vpop.eup %7140 }
 0xed0   :  { %6521 = vmatprep.mubr.bf16.mxu1 %v4512_v16  ;;  %v7143_v3 = vpop.eup %7142  ;;  %7154 = vrcp.f32 %v4471_v50  ;;  %v4501_v49 = vmul.f32 %v7141_v34, %v9702_v63 }
 0xed1   :  { %v4473_v33 = vpop.xlane.xlu1 %4472  ;;  %v7145_v36 = vpop.eup %7144  ;;  %v4498_v31 = vmul.f32 %v7143_v3, %v9678_v29  ;;  %7156 = vrcp.f32 %v4469_v47  ;;  %v10466_v29 = vld [vmem:[#allocation44_spill] sm:$0xff] }
 0xed2   :  { %v4500_v51 = vmul.f32 %v7145_v36, %v9699_v12  ;;  %v7147_v8 = vpop.eup %7146  ;;  %7158 = vrcp.f32 %v4473_v33 }
 0xed3   :  { %5119 = vrot.lane.b32.xlu0 %v10409_v45, %s7328_s12  ;;  %v4513_v18 = vpack.c.bf16 %v4499_v25, %v4498_v31  ;;  %v4503_v63 = vmul.f32 %v7147_v8, %v9705_v62 }
 0xed4   :  { %v4514_v48 = vpack.c.bf16 %v4501_v49, %v4500_v51 }
 0xed5   :  { %v4521_v42 = vpop.permute.xlu1 %4520 }
 0xed6   :  { %6519 = vmatprep.subr.bf16.mxu1 %v4521_v42 }
 0xed7   :  { %6520 = vmatpush3.bf16.msra.mxu1 %v4521_v42 }
 0xed8   :  { %6537 = vmatprep.subr.bf16.mxu1 %v10465_v52 }
 0xed9   :  { %v7149_v45 = vpop.eup %7148 }
 0xeda   :  { %6522 = vmatmul.mubr.bf16.vlgmr.msra.gmra.mxu1 %v4513_v18  ;;  %v7151_v10 = vpop.eup %7150  ;;  %v4504_v21 = vmul.f32 %v7149_v45, %v9714_v35 }
 0xedb   :  { %6525 = vmatprep.mubr.bf16.mxu1 %v4514_v48  ;;  %6538 = vmatpush3.bf16.msra.mxu1 %v10465_v52  ;;  %v7153_v26 = vpop.eup %7152  ;;  %v4502_v12 = vmul.f32 %v7151_v10, %v9692_v40 }
 0xedc   :  { %6539 = vmatprep.subr.bf16.mxu1 %v10466_v29  ;;  %v4505_v38 = vmul.f32 %v7153_v26, %v9711_v37 }
 0xedd   :  { %v4515_v47 = vpack.c.bf16 %v4503_v63, %v4502_v12  ;;  %v7155_v0 = vpop.eup %7154 }
 0xede   :  { %v4516_v24 = vpack.c.bf16 %v4505_v38, %v4504_v21  ;;  %v7157_v41 = vpop.eup %7156  ;;  %v4507_v23 = vmul.f32 %v7155_v0, %v9720_v44 }
 0xedf   :  { %6540 = vmatpush3.bf16.msra.mxu1 %v10466_v29  ;;  %v4506_v62 = vmul.f32 %v7157_v41, %v9708_v7  ;;  %v7159_v16 = vpop.eup %7158 }
 0xee0   :  { %v4508_v7 = vmul.f32 %v7159_v16, %v9723_v60 }
 0xee1   :  { %v4517_v57 = vpack.c.bf16 %v4507_v23, %v4506_v62 }
 0xee2   :  { %6526 = vmatmul.mubr.bf16.gmra.mxu1 %v4515_v47 }
 0xee3   :  { %6529 = vmatprep.mubr.bf16.mxu1 %v4516_v24 }
 0xeea   :  { %6530 = vmatmul.mubr.bf16.gmra.mxu1 %v4517_v57 }
 0xf02   :  { %v4475_v35 = vpop.xlane.xlu0 %4474 }
 0xf03   :  { %7160 = vrcp.f32 %v4475_v35 }
 0xf04   :  { %7162 = vrcp.f32 %v4477_v58 }
 0xf06   :  { %v4972_v40 = vpop.xlane.xlu1 %4971  ;;  %v4479_v37 = vpop.xlane.xlu0 %4478 }
 0xf07   :  { %7164 = vrcp.f32 %v4479_v37  ;;  %v4999_v48 = vsub.f32 %v9734_v20, %v4972_v40 }
 0xf09   :  { %v5019_v63 = vmul.f32 1.442695, %v4999_v48 }
 0xf0a   :  { %v4992_v11 = vpop.xlane.xlu1 %4991  ;;  %v4964_v9 = vpop.xlane.xlu0 %4963 }
 0xf0b   :  { %v4995_v58 = vsub.f32 %v9741_v27, %v4964_v9 }
 0xf0d   :  { %v5011_v52 = vmul.f32 1.442695, %v4995_v58 }
 0xf0e   :  { %v9830_v54 = vpop.permute.xlu1 %5129  ;;  %v4966_v50 = vpop.xlane.xlu0 %4965 }
 0xf0f   :  { %6589 = vmatprep.subr.bf16.mxu1 %v9830_v54  ;;  %v4996_v8 = vsub.f32 %v9749_v15, %v4966_v50 }
 0xf10   :  { %v7161_v44 = vpop.eup %7160 }
 0xf11   :  { %v4509_v34 = vmul.f32 %v7161_v44, %v9730_v30  ;;  %v7163_v33 = vpop.eup %7162  ;;  %v5013_v45 = vmul.f32 1.442695, %v4996_v8 }
 0xf12   :  { %v4968_v3 = vpop.xlane.xlu0 %4967  ;;  %v4510_v31 = vmul.f32 %v7163_v33, %v9717_v61 }
 0xf13   :  { %v4997_v36 = vsub.f32 %v9753_v2, %v4968_v3  ;;  %v4518_v25 = vpack.c.bf16 %v4509_v34, %v4508_v7 }
 0xf14   :  { %v7165_v42 = vpop.eup %7164 }
 0xf15   :  { %v5015_v49 = vmul.f32 1.442695, %v4997_v36  ;;  %6533 = vmatprep.mubr.bf16.mxu1 %v4518_v25  ;;  %v4511_v51 = vmul.f32 %v7165_v42, %v9736_v14 }
 0xf16   :  { %v4970_v18 = vpop.xlane.xlu0 %4969 }
 0xf17   :  { %7166 = vpow2.f32 %v5015_v49  ;;  %v4998_v60 = vsub.f32 %v9757_v6, %v4970_v18  ;;  %v4519_v30 = vpack.c.bf16 %v4511_v51, %v4510_v31  ;;  %v9901_v51 = vpop.f32.mrf.mxu1 }
 0xf18   :  { %7168 = vpow2.f32 %v5011_v52 }
 0xf19   :  { %6534 = vmatmul.mubr.bf16.gmra.mxu1 %v4519_v30  ;;  %v5017_v2 = vmul.f32 1.442695, %v4998_v60  ;;  %v9905_v18 = vpop.f32.mrf.mxu1 }
 0xf1a   :  { %v4974_v27 = vpop.xlane.xlu0 %4973 }
 0xf1b   :  { %7170 = vpow2.f32 %v5017_v2  ;;  %v5000_v61 = vsub.f32 %v9761_v43, %v4974_v27  ;;  %v5009_v43 = vsub.f32 %v9744_v4, %v4992_v11  ;;  %v9907_v52 = vpop.f32.mrf.mxu1 }
 0xf1c   :  { %7172 = vpow2.f32 %v5013_v45 }
 0xf1d   :  { %v5021_v29 = vmul.f32 1.442695, %v5000_v61  ;;  %v5039_v24 = vmul.f32 1.442695, %v5009_v43  ;;  %v9909_v60 = vpop.f32.mrf.mxu1 }
 0xf1e   :  { %v4976_v10 = vpop.xlane.xlu0 %4975 }
 0xf1f   :  { %v5001_v14 = vsub.f32 %v9767_v5, %v4976_v10  ;;  %v9911_v30 = vpop.f32.mrf.mxu1 }
 0xf21   :  { %v5023_v26 = vmul.f32 1.442695, %v5001_v14  ;;  %v9913_v8 = vpop.f32.mrf.mxu1 }
 0xf22   :  { %v4978_v6 = vpop.xlane.xlu0 %4977 }
 0xf23   :  { %7174 = vpow2.f32 %v5023_v26  ;;  %v5002_v15 = vsub.f32 %v9773_v19, %v4978_v6  ;;  %v9915_v27 = vpop.f32.mrf.mxu1 }
 0xf24   :  { %v9845_v21 = vpop.eup %7166  ;;  %7176 = vpow2.f32 %v5019_v63 }
 0xf25   :  { %5047 = vadd.xlane.f32.xlu0 %v9845_v21  ;;  %7178 = vpow2.f32 %v5021_v29  ;;  %v5025_v12 = vmul.f32 1.442695, %v5002_v15  ;;  %v9848_v38 = vpop.eup %7168  ;;  %v9917_v2 = vpop.f32.mrf.mxu1 }
 0xf26   :  { %v4980_v20 = vpop.xlane.xlu0 %4979 }
 0xf27   :  { %7180 = vpow2.f32 %v5025_v12  ;;  %v5003_v62 = vsub.f32 %v9779_v1, %v4980_v20  ;;  %v9919_v48 = vpop.f32.mrf.mxu1 }
 0xf28   :  { %v9853_v0 = vpop.eup %7170 }
 0xf29   :  { %5043 = vadd.xlane.f32.xlu0 %v9848_v38  ;;  %v9856_v23 = vpop.eup %7172  ;;  %v5027_v37 = vmul.f32 1.442695, %v5003_v62  ;;  %v9921_v45 = vpop.f32.mrf.mxu1 }
 0xf2a   :  { %v4982_v5 = vpop.xlane.xlu0 %4981  ;;  %v5126_v62 = vpop.permute.xlu1 %5125 }
 0xf2b   :  { %v5004_v47 = vsub.f32 %v9785_v28, %v4982_v5  ;;  %v9923_v10 = vpop.f32.mrf.mxu1 }
 0xf2d   :  { %v5029_v19 = vmul.f32 1.442695, %v5004_v47  ;;  %5049 = vadd.xlane.f32.xlu0 %v9853_v0 }
 0xf2e   :  { %v4984_v41 = vpop.xlane.xlu0 %4983 }
 0xf2f   :  { %7182 = vpow2.f32 %v5029_v19  ;;  %v5005_v57 = vsub.f32 %v9789_v56, %v4984_v41 }
 0xf30   :  { %v9860_v35 = vpop.eup %7174  ;;  %7184 = vpow2.f32 %v5039_v24 }
 0xf31   :  { %v5031_v4 = vmul.f32 1.442695, %v5005_v57  ;;  %5045 = vadd.xlane.f32.xlu0 %v9856_v23  ;;  %5055 = vadd.xlane.f32.xlu1 %v9860_v35  ;;  %v9864_v40 = vpop.eup %7176 }
 0xf32   :  { %v4986_v28 = vpop.xlane.xlu0 %4985  ;;  %v9867_v9 = vpop.eup %7178 }
 0xf33   :  { %7186 = vpow2.f32 %v5031_v4  ;;  %v5006_v11 = vsub.f32 %v9793_v46, %v4986_v28 }
 0xf34   :  { %7188 = vpow2.f32 %v5027_v37  ;;  %v9872_v50 = vpop.eup %7180 }
 0xf35   :  { %5053 = vadd.xlane.f32.xlu0 %v9867_v9  ;;  %5051 = vadd.xlane.f32.xlu1 %v9864_v40  ;;  %v5033_v56 = vmul.f32 1.442695, %v5006_v11 }
 0xf36   :  { %v4988_v1 = vpop.xlane.xlu0 %4987 }
 0xf37   :  { %v5007_v16 = vsub.f32 %v9797_v59, %v4988_v1  ;;  %7190 = vpow2.f32 %v5033_v56  ;;  %v5124_v56 = vpop.permute.xlu1 %5123 }
 0xf39   :  { %5057 = vadd.xlane.f32.xlu1 %v9872_v50  ;;  %v5035_v44 = vmul.f32 1.442695, %v5007_v16 }
 0xf3a   :  { %v4990_v7 = vpop.xlane.xlu0 %4989 }
 0xf3b   :  { %v5008_v46 = vsub.f32 %v9801_v22, %v4990_v7  ;;  %7192 = vpow2.f32 %v5035_v44 }
 0xf3c   :  { %v9876_v34 = vpop.eup %7182 }
 0xf3d   :  { %v5037_v33 = vmul.f32 1.442695, %v5008_v46  ;;  %5061 = vadd.xlane.f32.xlu0 %v9876_v34  ;;  %v9879_v58 = vpop.eup %7184 }
 0xf3e   :  { %v4994_v3 = vpop.xlane.xlu0 %4993 }
 0xf3f   :  { %7194 = vpow2.f32 %v5037_v33  ;;  %v5010_v59 = vsub.f32 %v9805_v39, %v4994_v3  ;;  %v5118_v3 = vpop.permute.xlu1 %5117 }
 0xf40   :  { %v9882_v36 = vpop.eup %7186 }
 0xf41   :  { %v5041_v25 = vmul.f32 1.442695, %v5010_v59  ;;  %5071 = vadd.xlane.f32.xlu0 %v9879_v58  ;;  %5063 = vadd.xlane.f32.xlu1 %v9882_v36  ;;  %v9886_v22 = vpop.eup %7188 }
 0xf42   :  { %v5128_v20 = vpop.permute.xlu0 %5127 }
 0xf43   :  { %7196 = vpow2.f32 %v5041_v25 }
 0xf44   :  { %v9889_v42 = vpop.eup %7190 }
 0xf45   :  { %5059 = vadd.xlane.f32.xlu1 %v9886_v22 }
 0xf46   :  { %v5122_v24 = vpop.permute.xlu0 %5121 }
 0xf48   :  { %v9892_v49 = vpop.eup %7192 }
 0xf49   :  { %5065 = vadd.xlane.f32.xlu1 %v9889_v42 }
 0xf4a   :  { %v5120_v11 = vpop.permute.xlu0 %5119 }
 0xf4c   :  { %v9894_v31 = vpop.eup %7194 }
 0xf4d   :  { %5067 = vadd.xlane.f32.xlu1 %v9892_v49  ;;  %5069 = vadd.xlane.f32.xlu0 %v9894_v31 }
 0xf50   :  { %v9898_v39 = vpop.eup %7196 }
 0xf51   :  { %5073 = vadd.xlane.f32.xlu1 %v9898_v39 }
 0xf63   :  { %5115 = vrot.lane.b32.xlu0 %v10411_v55, %s7328_s12  ;;  %v9925_v55 = vpop.f32.mrf.mxu1 }
 0xf65   :  { %v9927_v61 = vpop.f32.mrf.mxu1 }
 0xf67   :  { %v9929_v14 = vpop.f32.mrf.mxu1 }
 0xf69   :  { %v9931_v26 = vpop.f32.mrf.mxu1 }
 0xf6b   :  { %v9933_v63 = vpop.f32.mrf.mxu1 }
 0xf9a   :  { %v6523_v6 = vpop.f32.mrf.mxu1 }
 0xf9c   :  { %v4578_v29 = vpop.f32.mrf.mxu1 }
 0xf9e   :  { %v6524_v15 = vpop.f32.mrf.mxu1 }
 0xf9f   :  { %v4642_v5 = vpack.c.bf16 %v6524_v15, %v6523_v6 }
 0xfa0   :  { %v4581_v12 = vpop.f32.mrf.mxu1 }
 0xfa1   :  { %v4641_v43 = vpack.c.bf16 %v4581_v12, %v4578_v29 }
 0xfa2   :  { %v6527_v47 = vpop.f32.mrf.mxu1 }
 0xfa3   :  { %6541 = vmatprep.mubr.msk.bf16.mxu1 %vm686_vm0, %v4641_v43 }
 0xfa4   :  { %v4594_v19 = vpop.f32.mrf.mxu1  ;;  %6542 = vmatmul.mubr.msk.bf16.vlgmr.msra.gmra.mxu1 %vm686_vm0, %v4642_v5 }
 0xfa5   :  { %6590 = vmatpush3.bf16.msra.mxu1 %v9830_v54 }
 0xfa6   :  { %6591 = vmatprep.subr.bf16.mxu1 %v5128_v20  ;;  %v6528_v41 = vpop.f32.mrf.mxu1 }
 0xfa7   :  { %v4644_v28 = vpack.c.bf16 %v6528_v41, %v6527_v47 }
 0xfa8   :  { %v4597_v57 = vpop.f32.mrf.mxu1 }
 0xfa9   :  { %v4643_v4 = vpack.c.bf16 %v4597_v57, %v4594_v19  ;;  %6592 = vmatpush3.bf16.msra.mxu1 %v5128_v20 }
 0xfaa   :  { %6593 = vmatprep.subr.bf16.mxu1 %v5126_v62  ;;  %v6531_v37 = vpop.f32.mrf.mxu1 }
 0xfab   :  { %6545 = vmatprep.mubr.msk.bf16.mxu1 %vm686_vm0, %v4643_v4 }
 0xfac   :  { %v4610_v1 = vpop.f32.mrf.mxu1  ;;  %6546 = vmatmul.mubr.msk.bf16.gmra.mxu1 %vm686_vm0, %v4644_v28 }
 0xfad   :  { %6594 = vmatpush3.bf16.msra.mxu1 %v5126_v62 }
 0xfae   :  { %6595 = vmatprep.subr.bf16.mxu1 %v5124_v56  ;;  %v6532_v54 = vpop.f32.mrf.mxu1  ;;  %v5048_v16 = vpop.xlane.xlu0 %5047 }
 0xfaf   :  { %v4646_v46 = vpack.c.bf16 %v6532_v54, %v6531_v37 }
 0xfb0   :  { %v4613_v44 = vpop.f32.mrf.mxu1 }
 0xfb1   :  { %v4645_v7 = vpack.c.bf16 %v4613_v44, %v4610_v1  ;;  %6596 = vmatpush3.bf16.msra.mxu1 %v5124_v56 }
 0xfb2   :  { %6597 = vmatprep.subr.bf16.mxu1 %v5122_v24  ;;  %v5044_v33 = vpop.xlane.xlu0 %5043 }
 0xfb3   :  { %6549 = vmatprep.mubr.msk.bf16.mxu1 %vm686_vm0, %v4645_v7 }
 0xfb4   :  { %6550 = vmatmul.mubr.msk.bf16.gmra.mxu1 %vm686_vm0, %v4646_v46 }
 0xfb5   :  { %6598 = vmatpush3.bf16.msra.mxu1 %v5122_v24 }
 0xfb6   :  { %6599 = vmatprep.subr.bf16.mxu1 %v5120_v11  ;;  %v5050_v59 = vpop.xlane.xlu0 %5049 }
 0xfb9   :  { %6600 = vmatpush3.bf16.msra.mxu1 %v5120_v11  ;;  %v10467_v11 = vld [vmem:[#allocation36_spill] sm:$0xff] }
 0xfba   :  { %6601 = vmatprep.subr.bf16.mxu1 %v5118_v3  ;;  %v5056_v25 = vpop.xlane.xlu1 %5055  ;;  %v5046_v6 = vpop.xlane.xlu0 %5045 }
 0xfbb   :  { %7198 = vrcp.f32 %v5046_v6 }
 0xfbc   :  { %7200 = vrcp.f32 %v5044_v33 }
 0xfbd   :  { %6602 = vmatpush3.bf16.msra.mxu1 %v5118_v3  ;;  %7202 = vrcp.f32 %v5050_v59 }
 0xfbe   :  { %v5052_v29 = vpop.xlane.xlu1 %5051  ;;  %v5054_v15 = vpop.xlane.xlu0 %5053 }
 0xfbf   :  { %7204 = vrcp.f32 %v5052_v29 }
 0xfc0   :  { %7206 = vrcp.f32 %v5054_v15 }
 0xfc1   :  { %7208 = vrcp.f32 %v5048_v16 }
 0xfc2   :  { %v5058_v20 = vpop.xlane.xlu1 %5057 }
 0xfc3   :  { %7210 = vrcp.f32 %v5058_v20 }
 0xfc6   :  { %v5062_v12 = vpop.xlane.xlu0 %5061 }
 0xfc8   :  { %v7199_v62 = vpop.eup %7198 }
 0xfc9   :  { %v7201_v28 = vpop.eup %7200  ;;  %v5092_v1 = vmul.f32 %v7199_v62, %v9856_v23 }
 0xfca   :  { %v5064_v43 = vpop.xlane.xlu1 %5063  ;;  %v5072_v5 = vpop.xlane.xlu0 %5071  ;;  %v5091_v16 = vmul.f32 %v7201_v28, %v9848_v38 }
 0xfcb   :  { %v7203_v44 = vpop.eup %7202 }
 0xfcc   :  { %v7205_v46 = vpop.eup %7204  ;;  %v5107_v3 = vpack.c.bf16 %v5092_v1, %v5091_v16  ;;  %v5094_v23 = vmul.f32 %v7203_v44, %v9853_v0 }
 0xfcd   :  { %v7207_v59 = vpop.eup %7206 }
 0xfce   :  { %v5060_v47 = vpop.xlane.xlu1 %5059  ;;  %v7209_v6 = vpop.eup %7208  ;;  %v5096_v38 = vmul.f32 %v7207_v59, %v9867_v9 }
 0xfcf   :  { %7212 = vrcp.f32 %v5060_v47  ;;  %v5093_v29 = vmul.f32 %v7209_v6, %v9845_v21 }
 0xfd0   :  { %7214 = vrcp.f32 %v5056_v25  ;;  %v5095_v25 = vmul.f32 %v7205_v46, %v9864_v40  ;;  %v7211_v20 = vpop.eup %7210  ;;  %v10468_v40 = vld [vmem:[#allocation19_spill] sm:$0xff] }
 0xfd1   :  { %7216 = vrcp.f32 %v5062_v12  ;;  %v5108_v15 = vpack.c.bf16 %v5094_v23, %v5093_v29 }
 0xfd2   :  { %v5066_v4 = vpop.xlane.xlu1 %5065  ;;  %v5109_v47 = vpack.c.bf16 %v5096_v38, %v5095_v25 }
 0xfd3   :  { %7218 = vrcp.f32 %v5066_v4 }
 0xfd6   :  { %v5070_v19 = vpop.xlane.xlu0 %5069  ;;  %v5068_v33 = vpop.xlane.xlu1 %5067 }
 0xfd7   :  { %7220 = vrcp.f32 %v5068_v33  ;;  %v4140_v33 = vadd.f32 %v9907_v52, %v9596_v13  ;;  %v10471_v52 = vld [vmem:[#allocation21_spill] sm:$0xff] }
 0xfd8   :  { %7222 = vrcp.f32 %v5070_v19  ;;  %v5098_v19 = vmul.f32 %v7211_v20, %v9872_v50  ;;  %v4156_v29 = vadd.f32 %v9915_v27, %v10471_v52 }
 0xfd9   :  { %v6535_v24 = vpop.f32.mrf.mxu1  ;;  %7224 = vrcp.f32 %v5064_v43 }
 0xfda   :  { %v5116_v41 = vpop.permute.xlu0 %5115  ;;  %v5074_v12 = vpop.xlane.xlu1 %5073 }
 0xfdb   :  { %v4626_v57 = vpop.f32.mrf.mxu1  ;;  %6603 = vmatprep.subr.bf16.mxu1 %v5116_v41  ;;  %7226 = vrcp.f32 %v5074_v12 }
 0xfdc   :  { %6604 = vmatpush3.bf16.msra.mxu1 %v5116_v41  ;;  %7228 = vrcp.f32 %v5072_v5 }
 0xfdd   :  { %v6536_v37 = vpop.f32.mrf.mxu1  ;;  %6621 = vmatprep.subr.bf16.mxu1 %v10467_v11 }
 0xfde   :  { %v4648_v7 = vpack.c.bf16 %v6536_v37, %v6535_v24  ;;  %v7213_v24 = vpop.eup %7212 }
 0xfdf   :  { %v4629_v56 = vpop.f32.mrf.mxu1  ;;  %v7215_v41 = vpop.eup %7214  ;;  %v5099_v9 = vmul.f32 %v7213_v24, %v9886_v22 }
 0xfe0   :  { %v4647_v54 = vpack.c.bf16 %v4629_v56, %v4626_v57  ;;  %v7217_v0 = vpop.eup %7216  ;;  %v5097_v21 = vmul.f32 %v7215_v41, %v9860_v35 }
 0xfe1   :  { %v5100_v43 = vmul.f32 %v7217_v0, %v9876_v34  ;;  %v7219_v62 = vpop.eup %7218  ;;  %v10474_v0 = vld [vmem:[#allocation24_spill] sm:$0xff] }
 0xfe2   :  { %6553 = vmatprep.mubr.msk.bf16.mxu1 %vm686_vm0, %v4647_v54  ;;  %v5110_v57 = vpack.c.bf16 %v5098_v19, %v5097_v21  ;;  %v5102_v50 = vmul.f32 %v7219_v62, %v9889_v42  ;;  %v4137_v42 = vadd.f32 %v9901_v51, %v9592_v32  ;;  %v10469_v32 = vld [vmem:[#allocation39_spill] sm:$0xff]  ;;  %v4161_v19 = vadd.f32 %v9921_v45, %v10474_v0  ;;  %v10476_v62 = vld [vmem:[#allocation13_spill] sm:$0xff]  ;;  %v7230_v0 = vld [vmem:[%s10065_s4] ss:$0 sm:$0xff]  ;;  %s7329_s4 = smov [#allocation8]  }
 0xfe3   :  { %6554 = vmatmul.mubr.msk.bf16.gmra.mxu1 %vm686_vm0, %v4648_v7  ;;  %v5111_v28 = vpack.c.bf16 %v5100_v43, %v5099_v9  ;;  %v4153_v51 = vadd.f32 %v9911_v30, %v10469_v32  ;;  %v10475_v9 = vld [vmem:[#allocation25_spill] sm:$0xff]  ;;  %s5419_s17 = sshll.u32 %s7329_s4, 4  ;;  %s5420_s17 = int_to_ptr.vmem [resolvable:$true] %s5419_s17 }
 0xfe4   :  { %6605 = vmatprep.mubr.bf16.mxu1 %v5107_v3  ;;  %v7221_v4 = vpop.eup %7220  ;;  %v4172_v21 = vadd.f32 %v9923_v10, %v10475_v9  ;;  %s7291_s18 = scalar_lea.vmem %s5420_s17, 4096  ;;  %p7296_p2 = scmp.lt.s32.totalorder %s5420_s17, %s5420_s17 }
 0xfe5   :  { %v7223_v37 = vpop.eup %7222  ;;  %v5103_v1 = vmul.f32 %v7221_v4, %v9892_v49  ;;  %p7292_p1 = scmp.ne.s32.totalorder %s5420_s17, %s7291_s18  ;;  %p7297_p3 = scmp.lt.s32.totalorder %s7291_s18, %s7291_s18 }
 0xfe6   :  { %v5104_v22 = vmul.f32 %v7223_v37, %v9894_v31  ;;  %v4129_v31 = vadd.f32 %v9905_v18, %v9594_v53  ;;  %v10470_v18 = vld [vmem:[#allocation18_spill] sm:$0xff] }
 0xfe7   :  { %v4145_v25 = vadd.f32 %v9913_v8, %v10470_v18  ;;  %v10477_v37 = vld [vmem:[#allocation62_spill] sm:$0xff]  ;;  %p7298_p4 = por %p7297_p3, %p7296_p2 }
 0xfe8   :  { %v5113_v56 = vpack.c.bf16 %v5104_v22, %v5103_v1  ;;  %v4185_v45 = vadd.f32 %v9927_v61, %v10477_v37 }
 0xfe9   :  { %p7299_p5 = pnand %p7298_p4, %p7292_p1 }
 0xfeb   :  { %6606 = vmatmul.mubr.bf16.vlgmr.msra.gmra.mxu1 %v5108_v15 }
 0xfec   :  { %6609 = vmatprep.mubr.bf16.mxu1 %v5109_v47  ;;  %6622 = vmatpush3.bf16.msra.mxu1 %v10467_v11  ;;  %v7225_v11 = vpop.eup %7224  ;;  %v10473_v47 = vld [vmem:[#allocation22_spill] sm:$0xff] }
 0xfed   :  { %6623 = vmatprep.subr.bf16.mxu1 %v10468_v40  ;;  %v5101_v35 = vmul.f32 %v7225_v11, %v9882_v36  ;;  %v7227_v34 = vpop.eup %7226  ;;  %v4169_v24 = vadd.f32 %v9919_v48, %v10473_v47 }
 0xfee   :  { %v7229_v54 = vpop.eup %7228  ;;  %v5106_v16 = vmul.f32 %v7227_v34, %v9898_v39 }
 0xfef   :  { %v5112_v5 = vpack.c.bf16 %v5102_v50, %v5101_v35  ;;  %v5105_v44 = vmul.f32 %v7229_v54, %v9879_v58  ;;  %v4132_v58 = vadd.f32 %v9909_v60, %v9598_v17  ;;  %v10472_v60 = vld [vmem:[#allocation12_spill] sm:$0xff] }
 0xff0   :  { %6624 = vmatpush3.bf16.msra.mxu1 %v10468_v40  ;;  %v4148_v20 = vadd.f32 %v9917_v2, %v10472_v60  ;;  %v10478_v50 = vld [vmem:[#allocation80_spill] sm:$0xff] }
 0xff1   :  { %v5114_v7 = vpack.c.bf16 %v5106_v16, %v5105_v44  ;;  %v4177_v1 = vadd.f32 %v9929_v14, %v10478_v50  ;;  %v10479_v35 = vld [vmem:[#allocation60_spill] sm:$0xff] }
 0xff3   :  { %6610 = vmatmul.mubr.bf16.gmra.mxu1 %v5110_v57  ;;  %v4164_v57 = vadd.f32 %v9925_v55, %v10476_v62 }
 0xff4   :  { %6613 = vmatprep.mubr.bf16.mxu1 %v5111_v28 }
 0xffb   :  { %6614 = vmatmul.mubr.bf16.gmra.mxu1 %v5112_v5  ;;  %v4188_v5 = vadd.f32 %v9931_v26, %v10479_v35 }
 0xffc   :  { %6617 = vmatprep.mubr.bf16.mxu1 %v5113_v56  ;;  %v10480_v56 = vld [vmem:[#allocation56_spill] sm:$0xff] }
 0xffd   :  { %v4180_v54 = vadd.f32 %v9933_v63, %v10480_v56 }
0x1003   :  { %6618 = vmatmul.mubr.bf16.gmra.mxu1 %v5114_v7 }
0x1064   :  { %v6543_v49 = vpop.f32.mrf.mxu1 }
0x1065   :  { %v9968_v36 = vadd.f32 %v6543_v49, %v4137_v42 }
0x1066   :  { %v4707_v46 = vpop.f32.mrf.mxu1 }
0x1067   :  { %v9972_v3 = vadd.f32 %v4707_v46, %v4129_v31 }
0x1068   :  { %v6544_v39 = vpop.f32.mrf.mxu1 }
0x1069   :  { %v9976_v59 = vadd.f32 %v6544_v39, %v4140_v33 }
0x106a   :  { %v4710_v6 = vpop.f32.mrf.mxu1 }
0x106b   :  { %v9980_v23 = vadd.f32 %v4710_v6, %v4132_v58 }
0x106c   :  { %v6547_v53 = vpop.f32.mrf.mxu1 }
0x106d   :  { %v9984_v38 = vadd.f32 %v6547_v53, %v4153_v51 }
0x106e   :  { %v4723_v13 = vpop.f32.mrf.mxu1 }
0x106f   :  { %v9988_v15 = vadd.f32 %v4723_v13, %v4145_v25 }
0x1070   :  { %v6548_v17 = vpop.f32.mrf.mxu1 }
0x1071   :  { %v9992_v12 = vadd.f32 %v6548_v17, %v4156_v29 }
0x1072   :  { %v4726_v30 = vpop.f32.mrf.mxu1 }
0x1073   :  { %v9996_v41 = vadd.f32 %v4726_v30, %v4148_v20 }
0x1074   :  { %v6551_v8 = vpop.f32.mrf.mxu1 }
0x1075   :  { %v10000_v40 = vadd.f32 %v6551_v8, %v4169_v24 }
0x1076   :  { %v4739_v27 = vpop.f32.mrf.mxu1 }
0x1077   :  { %v10004_v43 = vadd.f32 %v4739_v27, %v4161_v19 }
0x1078   :  { %v6552_v2 = vpop.f32.mrf.mxu1 }
0x1079   :  { %v10008_v4 = vadd.f32 %v6552_v2, %v4172_v21 }
0x107a   :  { %v4742_v48 = vpop.f32.mrf.mxu1 }
0x107b   :  { %v10010_v28 = vadd.f32 %v4742_v48, %v4164_v57 }
0x10a3   :  { %v6555_v11 = vpop.f32.mrf.mxu1 }
0x10a4   :  { %v10016_v22 = vadd.f32 %v6555_v11, %v4185_v45 }
0x10a5   :  { %v4755_v10 = vpop.f32.mrf.mxu1 }
0x10a6   :  { %v10020_v34 = vadd.f32 %v4755_v10, %v4177_v1 }
0x10a7   :  { %v6556_v55 = vpop.f32.mrf.mxu1 }
0x10a8   :  { %v10024_v16 = vadd.f32 %v6556_v55, %v4188_v5 }
0x10a9   :  { %v4758_v44 = vpop.f32.mrf.mxu1 }
0x10aa   :  { %v10026_v61 = vadd.f32 %v4758_v44, %v4180_v54 }
0x10ab   :  { %v6607_v7 = vpop.f32.mrf.mxu1 }
0x10ad   :  { %v5173_v42 = vpop.f32.mrf.mxu1 }
0x10af   :  { %v6608_v14 = vpop.f32.mrf.mxu1 }
0x10b0   :  { %v5237_v46 = vpack.c.bf16 %v6608_v14, %v6607_v7 }
0x10b1   :  { %v5176_v49 = vpop.f32.mrf.mxu1 }
0x10b2   :  { %v5236_v31 = vpack.c.bf16 %v5176_v49, %v5173_v42 }
0x10b3   :  { %v6611_v33 = vpop.f32.mrf.mxu1 }
0x10b4   :  { %6625 = vmatprep.mubr.msk.bf16.mxu1 %vm686_vm0, %v5236_v31 }
0x10b5   :  { %v5189_v26 = vpop.f32.mrf.mxu1  ;;  %6626 = vmatmul.mubr.msk.bf16.vlgmr.msra.gmra.mxu1 %vm686_vm0, %v5237_v46 }
0x10b7   :  { %v6612_v39 = vpop.f32.mrf.mxu1 }
0x10b8   :  { %v5239_v6 = vpack.c.bf16 %v6612_v39, %v6611_v33 }
0x10b9   :  { %v5192_v58 = vpop.f32.mrf.mxu1 }
0x10ba   :  { %v5238_v63 = vpack.c.bf16 %v5192_v58, %v5189_v26 }
0x10bb   :  { %v6615_v32 = vpop.f32.mrf.mxu1 }
0x10bc   :  { %6629 = vmatprep.mubr.msk.bf16.mxu1 %vm686_vm0, %v5238_v63 }
0x10bd   :  { %v5205_v51 = vpop.f32.mrf.mxu1  ;;  %6630 = vmatmul.mubr.msk.bf16.gmra.mxu1 %vm686_vm0, %v5239_v6 }
0x10bf   :  { %v6616_v53 = vpop.f32.mrf.mxu1 }
0x10c0   :  { %v5241_v13 = vpack.c.bf16 %v6616_v53, %v6615_v32 }
0x10c1   :  { %v5208_v18 = vpop.f32.mrf.mxu1 }
0x10c2   :  { %v5240_v25 = vpack.c.bf16 %v5208_v18, %v5205_v51 }
0x10c3   :  { %v6619_v52 = vpop.f32.mrf.mxu1 }
0x10c4   :  { %6633 = vmatprep.mubr.msk.bf16.mxu1 %vm686_vm0, %v5240_v25 }
0x10c5   :  { %v5221_v29 = vpop.f32.mrf.mxu1  ;;  %6634 = vmatmul.mubr.msk.bf16.gmra.mxu1 %vm686_vm0, %v5241_v13 }
0x10c7   :  { %v6620_v17 = vpop.f32.mrf.mxu1 }
0x10c8   :  { %v5243_v30 = vpack.c.bf16 %v6620_v17, %v6619_v52 }
0x10c9   :  { %v5224_v60 = vpop.f32.mrf.mxu1 }
0x10ca   :  { %v5242_v20 = vpack.c.bf16 %v5224_v60, %v5221_v29 }
0x10cc   :  { %6637 = vmatprep.mubr.msk.bf16.mxu1 %vm686_vm0, %v5242_v20 }
0x10cd   :  { %6638 = vmatmul.mubr.msk.bf16.gmra.mxu1 %vm686_vm0, %v5243_v30 }
0x1175   :  { %v6627_v47 = vpop.f32.mrf.mxu1 }
0x1176   :  { %v5367_v24 = vadd.f32 %v6627_v47, %v9968_v36 }
0x1177   :  { %v5302_v8 = vpop.f32.mrf.mxu1 }
0x1178   :  { %v5383_v19 = vadd.f32 %v7230_v0, %v5367_v24  ;;  %v5365_v27 = vadd.f32 %v5302_v8, %v9972_v3 }
0x1179   :  { %v6628_v9 = vpop.f32.mrf.mxu1 }
0x117a   :  { %5400 = vst [vmem:[#allocation8 + $0x90] sm:$0xff] %v5383_v19  ;;  %v5381_v21 = vadd.f32 %v7230_v0, %v5365_v27  ;;  %v5368_v2 = vadd.f32 %v6628_v9, %v9976_v59 }
0x117b   :  { %v5305_v62 = vpop.f32.mrf.mxu1 }
0x117c   :  { %5398 = vst [vmem:[#allocation8 + $0x80] sm:$0xff] %v5381_v21  ;;  %v5384_v57 = vadd.f32 %v7230_v0, %v5368_v2  ;;  %v5366_v48 = vadd.f32 %v5305_v62, %v9980_v23 }
0x117d   :  { %v6631_v37 = vpop.f32.mrf.mxu1 }
0x117e   :  { %5401 = vst [vmem:[#allocation8 + $0x98] sm:$0xff] %v5384_v57  ;;  %v5382_v36 = vadd.f32 %v7230_v0, %v5366_v48  ;;  %v5371_v45 = vadd.f32 %v6631_v37, %v9984_v38 }
0x117f   :  { %v5318_v11 = vpop.f32.mrf.mxu1 }
0x1180   :  { %5399 = vst [vmem:[#allocation8 + $0x88] sm:$0xff] %v5382_v36  ;;  %v5387_v50 = vadd.f32 %v7230_v0, %v5371_v45  ;;  %v5369_v3 = vadd.f32 %v5318_v11, %v9988_v15 }
0x1181   :  { %v6632_v1 = vpop.f32.mrf.mxu1 }
0x1182   :  { %5404 = vst [vmem:[#allocation8 + $0xb0] sm:$0xff] %v5387_v50  ;;  %v5385_v10 = vadd.f32 %v7230_v0, %v5369_v3  ;;  %v5372_v59 = vadd.f32 %v6632_v1, %v9992_v12 }
0x1183   :  { %v5321_v35 = vpop.f32.mrf.mxu1 }
0x1184   :  { %5402 = vst [vmem:[#allocation8 + $0xa0] sm:$0xff] %v5385_v10  ;;  %v5388_v5 = vadd.f32 %v7230_v0, %v5372_v59  ;;  %v5370_v23 = vadd.f32 %v5321_v35, %v9996_v41 }
0x1185   :  { %v6635_v55 = vpop.f32.mrf.mxu1 }
0x1186   :  { %5405 = vst [vmem:[#allocation8 + $0xb8] sm:$0xff] %v5388_v5  ;;  %v5386_v56 = vadd.f32 %v7230_v0, %v5370_v23  ;;  %v5375_v38 = vadd.f32 %v6635_v55, %v10000_v40 }
0x1187   :  { %v5334_v54 = vpop.f32.mrf.mxu1 }
0x1188   :  { %5403 = vst [vmem:[#allocation8 + $0xa8] sm:$0xff] %v5386_v56  ;;  %v5391_v44 = vadd.f32 %v7230_v0, %v5375_v38  ;;  %v5373_v15 = vadd.f32 %v5334_v54, %v10004_v43 }
0x1189   :  { %v6636_v7 = vpop.f32.mrf.mxu1 }
0x118a   :  { %5408 = vst [vmem:[#allocation8 + $0xd0] sm:$0xff] %v5391_v44  ;;  %v5389_v42 = vadd.f32 %v7230_v0, %v5373_v15  ;;  %v5376_v12 = vadd.f32 %v6636_v7, %v10008_v4 }
0x118b   :  { %v5337_v14 = vpop.f32.mrf.mxu1 }
0x118c   :  { %5406 = vst [vmem:[#allocation8 + $0xc0] sm:$0xff] %v5389_v42  ;;  %v5392_v49 = vadd.f32 %v7230_v0, %v5376_v12  ;;  %v5374_v41 = vadd.f32 %v5337_v14, %v10010_v28 }
0x118d   :  { %v6639_v31 = vpop.f32.mrf.mxu1 }
0x118e   :  { %5409 = vst [vmem:[#allocation8 + $0xd8] sm:$0xff] %v5392_v49  ;;  %v5390_v46 = vadd.f32 %v7230_v0, %v5374_v41  ;;  %v5379_v40 = vadd.f32 %v6639_v31, %v10016_v22 }
0x118f   :  { %v5350_v33 = vpop.f32.mrf.mxu1 }
0x1190   :  { %5407 = vst [vmem:[#allocation8 + $0xc8] sm:$0xff] %v5390_v46  ;;  %v5395_v26 = vadd.f32 %v7230_v0, %v5379_v40  ;;  %v5377_v43 = vadd.f32 %v5350_v33, %v10020_v34 }
0x1191   :  { %v6640_v39 = vpop.f32.mrf.mxu1 }
0x1192   :  { %5412 = vst [vmem:[#allocation8 + $0xf0] sm:$0xff] %v5395_v26  ;;  %v5393_v58 = vadd.f32 %v7230_v0, %v5377_v43  ;;  %v5380_v4 = vadd.f32 %v6640_v39, %v10024_v16 }
0x1193   :  { %v5353_v63 = vpop.f32.mrf.mxu1 }
0x1194   :  { %5410 = vst [vmem:[#allocation8 + $0xe0] sm:$0xff] %v5393_v58  ;;  %v5396_v28 = vadd.f32 %v7230_v0, %v5380_v4  ;;  %v5378_v6 = vadd.f32 %v5353_v63, %v10026_v61 }
0x1196   :  { %5413 = vst [vmem:[#allocation8 + $0xf8] sm:$0xff] %v5396_v28  ;;  %v5394_v32 = vadd.f32 %v7230_v0, %v5378_v6 }
0x1198   :  { %5411 = vst [vmem:[#allocation8 + $0xe8] sm:$0xff] %v5394_v32 }
0x1199   :  { %7302 = shalt.err (!%p7299_p5)
}
0x119a   :  { %5425 = dma.vmem_to_hbm [thread:$0]  %s5420_s17, 4096, %s10066_s5, [#allocation4], %s7321_s28, %s7321_s28, %s7322_s29  }
0x119b   :  { %7315 = dma.done.wait [#allocation4], 4096  }
0x119c   :  { %7316 = vsyncadd [#allocation4], 4294963200 }
0x119d   :  { %5429 = vsyncpa [#allocation3], 1 }
0x119e   :  { %5430 = vsyncpa [#allocation6], 1 }
0x119f   :  { %5431 = vsyncpa [#allocation4], 1 }

</bundles_post_ra>
